<compile_context>
chip_gen: v6e
topology: v6e:2x2x1
jax: 0.10.0
libtpu: 0.0.40
codegen_flags: <defaults>
</compile_context>

<pallas_src>
import functools

import jax
import jax.numpy as jnp
from jax.experimental import pallas as pl
from jax.experimental.pallas import tpu as pltpu


def _round_up(x, m):
    return ((x + m - 1) // m) * m


# ----------------------------------------------------------------------------
# Fused matmul + bias + optional ReLU (MXU, bf16 in / f32 accumulate)
# ----------------------------------------------------------------------------
def _mm_bias_kernel(x_ref, w_ref, b_ref, o_ref, *, relu):
    acc = jnp.dot(x_ref[...], w_ref[...], preferred_element_type=jnp.float32)
    acc = acc + b_ref[...]
    if relu:
        acc = jnp.maximum(acc, 0.0)
    o_ref[...] = acc.astype(o_ref.dtype)


def _maybe_pad2(a, rows, cols):
    r, c = a.shape
    if r == rows and c == cols:
        return a
    return jnp.pad(a, ((0, rows - r), (0, cols - c)))


def matmul_bias_act(x, w, b, *, relu):
    """y = x @ w + b (optional ReLU).  x:(M,K) f32, w:(K,N) f32, b:(N,) -> (M,N) f32."""
    M, K = x.shape
    K2, N = w.shape
    assert K == K2

    tm = min(128, _round_up(M, 8))          # adaptive row tile (sublane multiple of 8)
    pm = _round_up(M, tm)
    pk = _round_up(K, 128)
    pn0 = _round_up(N, 128)
    tn = 256 if (pn0 % 256 == 0) else 128    # 256-wide tiles when N allows (FC1)
    pn = _round_up(N, tn)

    # bf16 MXU inputs (f32 accumulation inside the kernel); pad only if needed.
    xp = _maybe_pad2(x.astype(jnp.bfloat16), pm, pk)
    wp = _maybe_pad2(w.astype(jnp.bfloat16), pk, pn)
    bp = _maybe_pad2(b.reshape(1, N).astype(jnp.float32), 1, pn)

    out = pl.pallas_call(
        functools.partial(_mm_bias_kernel, relu=relu),
        out_shape=jax.ShapeDtypeStruct((pm, pn), jnp.float32),
        grid=(pm // tm, pn // tn),
        in_specs=[
            pl.BlockSpec((tm, pk), lambda i, j: (i, 0)),
            pl.BlockSpec((pk, tn), lambda i, j: (0, j)),
            pl.BlockSpec((1, tn), lambda i, j: (0, j)),
        ],
        out_specs=pl.BlockSpec((tm, tn), lambda i, j: (i, j)),
        compiler_params=pltpu.CompilerParams(
            dimension_semantics=("parallel", "parallel")),
    )(xp, wp, bp)
    if pm == M and pn == N:
        return out
    return out[:M, :N]


# ----------------------------------------------------------------------------
# AdaptiveAvgPool2d((4,4))  (NHWC), PyTorch floor/ceil bin boundaries
# ----------------------------------------------------------------------------
def _adaptive_bounds(in_size, out_size):
    return tuple(((i * in_size) // out_size,
                  ((i + 1) * in_size + out_size - 1) // out_size)
                 for i in range(out_size))


def _adaptive_pool_kernel(x_ref, o_ref, *, bounds_h, bounds_w):
    x = x_ref[...]  # (1, H, W, C) f32
    for oh, (hs, he) in enumerate(bounds_h):
        for ow, (ws, we) in enumerate(bounds_w):
            o_ref[:, oh:oh + 1, ow:ow + 1, :] = jnp.mean(
                x[:, hs:he, ws:we, :], axis=(1, 2), keepdims=True)


def adaptive_avg_pool_4x4(x):
    """x: (B, H, W, C) f32 -> (B, 4, 4, C) f32."""
    B, H, W, C = x.shape
    return pl.pallas_call(
        functools.partial(_adaptive_pool_kernel,
                          bounds_h=_adaptive_bounds(H, 4),
                          bounds_w=_adaptive_bounds(W, 4)),
        out_shape=jax.ShapeDtypeStruct((B, 4, 4, C), jnp.float32),
        grid=(B,),
        in_specs=[pl.BlockSpec((1, H, W, C), lambda b: (b, 0, 0, 0))],
        out_specs=pl.BlockSpec((1, 4, 4, C), lambda b: (b, 0, 0, 0)),
        compiler_params=pltpu.CompilerParams(dimension_semantics=("parallel",)),
    )(x.astype(jnp.float32))


# ----------------------------------------------------------------------------
# Parameters (synthetic, PyTorch layouts) pre-transformed ONCE into kernel layouts
# ----------------------------------------------------------------------------
def make_inception_aux_params(key, in_channels, num_classes):
    ks = jax.random.split(key, 5)
    # PyTorch-layout weights
    w_conv = jax.random.normal(ks[0], (128, in_channels, 1, 1), jnp.float32) * 0.05
    b_conv = jax.random.normal(ks[1], (128,), jnp.float32) * 0.05
    w_fc1 = jax.random.normal(ks[2], (1024, 128 * 4 * 4), jnp.float32) * 0.02  # (out, c*h*w)
    b_fc1 = jax.random.normal(ks[3], (1024,), jnp.float32) * 0.02
    w_fc2 = jax.random.normal(ks[4], (num_classes, 1024), jnp.float32) * 0.02
    b_fc2 = jnp.zeros((num_classes,), jnp.float32)

    # One-time layout transforms (hoisted out of the forward path):
    conv_w = jnp.transpose(w_conv[:, :, 0, 0], (1, 0))          # (C_in, 128)
    # fc1 input axis is flattened NCHW (c*16 + h*4 + w); our activations are flattened
    # NHWC (h*512 + w*128 + c) -> permute the K axis once, then transpose to (K, N).
    fc1_w = (w_fc1.reshape(1024, 128, 4, 4)
                  .transpose(0, 2, 3, 1)
                  .reshape(1024, 128 * 4 * 4).T)                # (2048, 1024)
    fc2_w = w_fc2.T                                             # (1024, num_classes)
    return {
        "conv": (conv_w, b_conv),
        "fc1": (fc1_w, b_fc1),
        "fc2": (fc2_w, b_fc2),
    }


# ----------------------------------------------------------------------------
# Forward pass (eval mode)
# ----------------------------------------------------------------------------
def inception_aux_forward(params, x_nchw):
    # NCHW (PyTorch) -> NHWC (channels on lanes)
    x = jnp.transpose(x_nchw, (0, 2, 3, 1)).astype(jnp.float32)
    B = x.shape[0]

    # AdaptiveAvgPool2d((4,4))
    x = adaptive_avg_pool_4x4(x)                               # (B, 4, 4, C)

    # BasicConv2d: 1x1 conv + ReLU == GEMM over channels (no im2col needed)
    w_c, b_c = params["conv"]
    y = matmul_bias_act(x.reshape(B * 16, x.shape[-1]), w_c, b_c, relu=True)  # (B*16, 128)

    # flatten(start_dim=1): NHWC flatten; fc1 weight was pre-permuted to match.
    y = y.reshape(B, 16 * 128)                                 # (B, 2048)

    # Linear(2048,1024) -> Dropout(identity in eval) -> ReLU   (ReLU fused into matmul)
    w1, b1 = params["fc1"]
    y = matmul_bias_act(y, w1, b1, relu=True)                  # (B, 1024)

    # Linear(1024, num_classes)
    w2, b2 = params["fc2"]
    y = matmul_bias_act(y, w2, b2, relu=False)                 # (B, num_classes)
    return y


if __name__ == "__main__":
    key = jax.random.PRNGKey(0)
    k_params, k_x = jax.random.split(key)

    B, C, H, W = 2, 128, 16, 16      # small shapes consistent with the module
    num_classes = 10

    params = make_inception_aux_params(k_params, in_channels=C, num_classes=num_classes)
    x = jax.random.normal(k_x, (B, C, H, W), jnp.float32)      # NCHW input

    fwd = jax.jit(inception_aux_forward)
    out = jax.block_until_ready(fwd(params, x))

    assert out.shape == (B, num_classes), out.shape
    assert bool(jnp.all(jnp.isfinite(out)))
    print("KERNEL_OK")
</pallas_src>

<mosaic_0001>
module attributes {stable_mosaic.version = 11 : i64} {
  func.func @_adaptive_pool_kernel(%arg0: i32, %arg1: memref<1x16x16x128xf32, #tpu.memory_space<vmem>>, %arg2: memref<1x4x4x128xf32, #tpu.memory_space<vmem>>) attributes {dimension_semantics = [#tpu.dimension_semantics<parallel>], iteration_bounds = array<i64: 2>, scalar_prefetch = 0 : i64, scratch_operands = 0 : i64, tpu.core_type = #tpu.core_type<tc>, window_params = [{transform_indices = @transform_0, window_bounds = array<i64: 1, 16, 16, 128>}, {transform_indices = @transform_1, window_bounds = array<i64: 1, 4, 4, 128>}]} {
    %c0 = arith.constant 0 : index
    %c0_0 = arith.constant 0 : index
    %c0_1 = arith.constant 0 : index
    %c0_2 = arith.constant 0 : index
    %0 = vector.load %arg1[%c0, %c0_0, %c0_1, %c0_2] : memref<1x16x16x128xf32, #tpu.memory_space<vmem>>, vector<1x16x16x128xf32>
    %1 = vector.extract_strided_slice %0 {offsets = [0, 0, 0, 0], sizes = [1, 4, 4, 128], strides = [1, 1, 1, 1]} : vector<1x16x16x128xf32> to vector<1x4x4x128xf32>
    %cst = arith.constant dense<0.000000e+00> : vector<1x128xf32>
    %2 = vector.multi_reduction <add>, %1, %cst [1, 2] : vector<1x4x4x128xf32> to vector<1x128xf32>
    %3 = vector.shape_cast %2 : vector<1x128xf32> to vector<1x1x1x128xf32>
    %cst_3 = arith.constant 1.600000e+01 : f32
    %4 = vector.broadcast %cst_3 : f32 to vector<1x1x1x128xf32>
    %5 = arith.divf %3, %4 : vector<1x1x1x128xf32>
    %c0_4 = arith.constant 0 : index
    %c0_5 = arith.constant 0 : index
    %c0_6 = arith.constant 0 : index
    %c0_7 = arith.constant 0 : index
    %6 = vector.load %arg2[%c0_4, %c0_5, %c0_6, %c0_7] : memref<1x4x4x128xf32, #tpu.memory_space<vmem>>, vector<1x1x1x128xf32>
    tpu.vector_store %arg2[%c0_4, %c0_5, %c0_6, %c0_7], %5 {strides = array<i32>} : memref<1x4x4x128xf32, #tpu.memory_space<vmem>>, vector<1x1x1x128xf32>,
    %7 = vector.extract_strided_slice %0 {offsets = [0, 0, 4, 0], sizes = [1, 4, 4, 128], strides = [1, 1, 1, 1]} : vector<1x16x16x128xf32> to vector<1x4x4x128xf32>
    %cst_8 = arith.constant dense<0.000000e+00> : vector<1x128xf32>
    %8 = vector.multi_reduction <add>, %7, %cst_8 [1, 2] : vector<1x4x4x128xf32> to vector<1x128xf32>
    %9 = vector.shape_cast %8 : vector<1x128xf32> to vector<1x1x1x128xf32>
    %cst_9 = arith.constant 1.600000e+01 : f32
    %10 = vector.broadcast %cst_9 : f32 to vector<1x1x1x128xf32>
    %11 = arith.divf %9, %10 : vector<1x1x1x128xf32>
    %c0_10 = arith.constant 0 : index
    %c0_11 = arith.constant 0 : index
    %c1 = arith.constant 1 : index
    %c0_12 = arith.constant 0 : index
    %12 = vector.load %arg2[%c0_10, %c0_11, %c1, %c0_12] : memref<1x4x4x128xf32, #tpu.memory_space<vmem>>, vector<1x1x1x128xf32>
    tpu.vector_store %arg2[%c0_10, %c0_11, %c1, %c0_12], %11 {strides = array<i32>} : memref<1x4x4x128xf32, #tpu.memory_space<vmem>>, vector<1x1x1x128xf32>,
    %13 = vector.extract_strided_slice %0 {offsets = [0, 0, 8, 0], sizes = [1, 4, 4, 128], strides = [1, 1, 1, 1]} : vector<1x16x16x128xf32> to vector<1x4x4x128xf32>
    %cst_13 = arith.constant dense<0.000000e+00> : vector<1x128xf32>
    %14 = vector.multi_reduction <add>, %13, %cst_13 [1, 2] : vector<1x4x4x128xf32> to vector<1x128xf32>
    %15 = vector.shape_cast %14 : vector<1x128xf32> to vector<1x1x1x128xf32>
    %cst_14 = arith.constant 1.600000e+01 : f32
    %16 = vector.broadcast %cst_14 : f32 to vector<1x1x1x128xf32>
    %17 = arith.divf %15, %16 : vector<1x1x1x128xf32>
    %c0_15 = arith.constant 0 : index
    %c0_16 = arith.constant 0 : index
    %c2 = arith.constant 2 : index
    %c0_17 = arith.constant 0 : index
    %18 = vector.load %arg2[%c0_15, %c0_16, %c2, %c0_17] : memref<1x4x4x128xf32, #tpu.memory_space<vmem>>, vector<1x1x1x128xf32>
    tpu.vector_store %arg2[%c0_15, %c0_16, %c2, %c0_17], %17 {strides = array<i32>} : memref<1x4x4x128xf32, #tpu.memory_space<vmem>>, vector<1x1x1x128xf32>,
    %19 = vector.extract_strided_slice %0 {offsets = [0, 0, 12, 0], sizes = [1, 4, 4, 128], strides = [1, 1, 1, 1]} : vector<1x16x16x128xf32> to vector<1x4x4x128xf32>
    %cst_18 = arith.constant dense<0.000000e+00> : vector<1x128xf32>
    %20 = vector.multi_reduction <add>, %19, %cst_18 [1, 2] : vector<1x4x4x128xf32> to vector<1x128xf32>
    %21 = vector.shape_cast %20 : vector<1x128xf32> to vector<1x1x1x128xf32>
    %cst_19 = arith.constant 1.600000e+01 : f32
    %22 = vector.broadcast %cst_19 : f32 to vector<1x1x1x128xf32>
    %23 = arith.divf %21, %22 : vector<1x1x1x128xf32>
    %c0_20 = arith.constant 0 : index
    %c0_21 = arith.constant 0 : index
    %c3 = arith.constant 3 : index
    %c0_22 = arith.constant 0 : index
    %24 = vector.load %arg2[%c0_20, %c0_21, %c3, %c0_22] : memref<1x4x4x128xf32, #tpu.memory_space<vmem>>, vector<1x1x1x128xf32>
    tpu.vector_store %arg2[%c0_20, %c0_21, %c3, %c0_22], %23 {strides = array<i32>} : memref<1x4x4x128xf32, #tpu.memory_space<vmem>>, vector<1x1x1x128xf32>,
    %25 = vector.extract_strided_slice %0 {offsets = [0, 4, 0, 0], sizes = [1, 4, 4, 128], strides = [1, 1, 1, 1]} : vector<1x16x16x128xf32> to vector<1x4x4x128xf32>
    %cst_23 = arith.constant dense<0.000000e+00> : vector<1x128xf32>
    %26 = vector.multi_reduction <add>, %25, %cst_23 [1, 2] : vector<1x4x4x128xf32> to vector<1x128xf32>
    %27 = vector.shape_cast %26 : vector<1x128xf32> to vector<1x1x1x128xf32>
    %cst_24 = arith.constant 1.600000e+01 : f32
    %28 = vector.broadcast %cst_24 : f32 to vector<1x1x1x128xf32>
    %29 = arith.divf %27, %28 : vector<1x1x1x128xf32>
    %c0_25 = arith.constant 0 : index
    %c1_26 = arith.constant 1 : index
    %c0_27 = arith.constant 0 : index
    %c0_28 = arith.constant 0 : index
    %30 = vector.load %arg2[%c0_25, %c1_26, %c0_27, %c0_28] : memref<1x4x4x128xf32, #tpu.memory_space<vmem>>, vector<1x1x1x128xf32>
    tpu.vector_store %arg2[%c0_25, %c1_26, %c0_27, %c0_28], %29 {strides = array<i32>} : memref<1x4x4x128xf32, #tpu.memory_space<vmem>>, vector<1x1x1x128xf32>,
    %31 = vector.extract_strided_slice %0 {offsets = [0, 4, 4, 0], sizes = [1, 4, 4, 128], strides = [1, 1, 1, 1]} : vector<1x16x16x128xf32> to vector<1x4x4x128xf32>
    %cst_29 = arith.constant dense<0.000000e+00> : vector<1x128xf32>
    %32 = vector.multi_reduction <add>, %31, %cst_29 [1, 2] : vector<1x4x4x128xf32> to vector<1x128xf32>
    %33 = vector.shape_cast %32 : vector<1x128xf32> to vector<1x1x1x128xf32>
    %cst_30 = arith.constant 1.600000e+01 : f32
    %34 = vector.broadcast %cst_30 : f32 to vector<1x1x1x128xf32>
    %35 = arith.divf %33, %34 : vector<1x1x1x128xf32>
    %c0_31 = arith.constant 0 : index
    %c1_32 = arith.constant 1 : index
    %c1_33 = arith.constant 1 : index
    %c0_34 = arith.constant 0 : index
    %36 = vector.load %arg2[%c0_31, %c1_32, %c1_33, %c0_34] : memref<1x4x4x128xf32, #tpu.memory_space<vmem>>, vector<1x1x1x128xf32>
    tpu.vector_store %arg2[%c0_31, %c1_32, %c1_33, %c0_34], %35 {strides = array<i32>} : memref<1x4x4x128xf32, #tpu.memory_space<vmem>>, vector<1x1x1x128xf32>,
    %37 = vector.extract_strided_slice %0 {offsets = [0, 4, 8, 0], sizes = [1, 4, 4, 128], strides = [1, 1, 1, 1]} : vector<1x16x16x128xf32> to vector<1x4x4x128xf32>
    %cst_35 = arith.constant dense<0.000000e+00> : vector<1x128xf32>
    %38 = vector.multi_reduction <add>, %37, %cst_35 [1, 2] : vector<1x4x4x128xf32> to vector<1x128xf32>
    %39 = vector.shape_cast %38 : vector<1x128xf32> to vector<1x1x1x128xf32>
    %cst_36 = arith.constant 1.600000e+01 : f32
    %40 = vector.broadcast %cst_36 : f32 to vector<1x1x1x128xf32>
    %41 = arith.divf %39, %40 : vector<1x1x1x128xf32>
    %c0_37 = arith.constant 0 : index
    %c1_38 = arith.constant 1 : index
    %c2_39 = arith.constant 2 : index
    %c0_40 = arith.constant 0 : index
    %42 = vector.load %arg2[%c0_37, %c1_38, %c2_39, %c0_40] : memref<1x4x4x128xf32, #tpu.memory_space<vmem>>, vector<1x1x1x128xf32>
    tpu.vector_store %arg2[%c0_37, %c1_38, %c2_39, %c0_40], %41 {strides = array<i32>} : memref<1x4x4x128xf32, #tpu.memory_space<vmem>>, vector<1x1x1x128xf32>,
    %43 = vector.extract_strided_slice %0 {offsets = [0, 4, 12, 0], sizes = [1, 4, 4, 128], strides = [1, 1, 1, 1]} : vector<1x16x16x128xf32> to vector<1x4x4x128xf32>
    %cst_41 = arith.constant dense<0.000000e+00> : vector<1x128xf32>
    %44 = vector.multi_reduction <add>, %43, %cst_41 [1, 2] : vector<1x4x4x128xf32> to vector<1x128xf32>
    %45 = vector.shape_cast %44 : vector<1x128xf32> to vector<1x1x1x128xf32>
    %cst_42 = arith.constant 1.600000e+01 : f32
    %46 = vector.broadcast %cst_42 : f32 to vector<1x1x1x128xf32>
    %47 = arith.divf %45, %46 : vector<1x1x1x128xf32>
    %c0_43 = arith.constant 0 : index
    %c1_44 = arith.constant 1 : index
    %c3_45 = arith.constant 3 : index
    %c0_46 = arith.constant 0 : index
    %48 = vector.load %arg2[%c0_43, %c1_44, %c3_45, %c0_46] : memref<1x4x4x128xf32, #tpu.memory_space<vmem>>, vector<1x1x1x128xf32>
    tpu.vector_store %arg2[%c0_43, %c1_44, %c3_45, %c0_46], %47 {strides = array<i32>} : memref<1x4x4x128xf32, #tpu.memory_space<vmem>>, vector<1x1x1x128xf32>,
    %49 = vector.extract_strided_slice %0 {offsets = [0, 8, 0, 0], sizes = [1, 4, 4, 128], strides = [1, 1, 1, 1]} : vector<1x16x16x128xf32> to vector<1x4x4x128xf32>
    %cst_47 = arith.constant dense<0.000000e+00> : vector<1x128xf32>
    %50 = vector.multi_reduction <add>, %49, %cst_47 [1, 2] : vector<1x4x4x128xf32> to vector<1x128xf32>
    %51 = vector.shape_cast %50 : vector<1x128xf32> to vector<1x1x1x128xf32>
    %cst_48 = arith.constant 1.600000e+01 : f32
    %52 = vector.broadcast %cst_48 : f32 to vector<1x1x1x128xf32>
    %53 = arith.divf %51, %52 : vector<1x1x1x128xf32>
    %c0_49 = arith.constant 0 : index
    %c2_50 = arith.constant 2 : index
    %c0_51 = arith.constant 0 : index
    %c0_52 = arith.constant 0 : index
    %54 = vector.load %arg2[%c0_49, %c2_50, %c0_51, %c0_52] : memref<1x4x4x128xf32, #tpu.memory_space<vmem>>, vector<1x1x1x128xf32>
    tpu.vector_store %arg2[%c0_49, %c2_50, %c0_51, %c0_52], %53 {strides = array<i32>} : memref<1x4x4x128xf32, #tpu.memory_space<vmem>>, vector<1x1x1x128xf32>,
    %55 = vector.extract_strided_slice %0 {offsets = [0, 8, 4, 0], sizes = [1, 4, 4, 128], strides = [1, 1, 1, 1]} : vector<1x16x16x128xf32> to vector<1x4x4x128xf32>
    %cst_53 = arith.constant dense<0.000000e+00> : vector<1x128xf32>
    %56 = vector.multi_reduction <add>, %55, %cst_53 [1, 2] : vector<1x4x4x128xf32> to vector<1x128xf32>
    %57 = vector.shape_cast %56 : vector<1x128xf32> to vector<1x1x1x128xf32>
    %cst_54 = arith.constant 1.600000e+01 : f32
    %58 = vector.broadcast %cst_54 : f32 to vector<1x1x1x128xf32>
    %59 = arith.divf %57, %58 : vector<1x1x1x128xf32>
    %c0_55 = arith.constant 0 : index
    %c2_56 = arith.constant 2 : index
    %c1_57 = arith.constant 1 : index
    %c0_58 = arith.constant 0 : index
    %60 = vector.load %arg2[%c0_55, %c2_56, %c1_57, %c0_58] : memref<1x4x4x128xf32, #tpu.memory_space<vmem>>, vector<1x1x1x128xf32>
    tpu.vector_store %arg2[%c0_55, %c2_56, %c1_57, %c0_58], %59 {strides = array<i32>} : memref<1x4x4x128xf32, #tpu.memory_space<vmem>>, vector<1x1x1x128xf32>,
    %61 = vector.extract_strided_slice %0 {offsets = [0, 8, 8, 0], sizes = [1, 4, 4, 128], strides = [1, 1, 1, 1]} : vector<1x16x16x128xf32> to vector<1x4x4x128xf32>
    %cst_59 = arith.constant dense<0.000000e+00> : vector<1x128xf32>
    %62 = vector.multi_reduction <add>, %61, %cst_59 [1, 2] : vector<1x4x4x128xf32> to vector<1x128xf32>
    %63 = vector.shape_cast %62 : vector<1x128xf32> to vector<1x1x1x128xf32>
    %cst_60 = arith.constant 1.600000e+01 : f32
    %64 = vector.broadcast %cst_60 : f32 to vector<1x1x1x128xf32>
    %65 = arith.divf %63, %64 : vector<1x1x1x128xf32>
    %c0_61 = arith.constant 0 : index
    %c2_62 = arith.constant 2 : index
    %c2_63 = arith.constant 2 : index
    %c0_64 = arith.constant 0 : index
    %66 = vector.load %arg2[%c0_61, %c2_62, %c2_63, %c0_64] : memref<1x4x4x128xf32, #tpu.memory_space<vmem>>, vector<1x1x1x128xf32>
    tpu.vector_store %arg2[%c0_61, %c2_62, %c2_63, %c0_64], %65 {strides = array<i32>} : memref<1x4x4x128xf32, #tpu.memory_space<vmem>>, vector<1x1x1x128xf32>,
    %67 = vector.extract_strided_slice %0 {offsets = [0, 8, 12, 0], sizes = [1, 4, 4, 128], strides = [1, 1, 1, 1]} : vector<1x16x16x128xf32> to vector<1x4x4x128xf32>
    %cst_65 = arith.constant dense<0.000000e+00> : vector<1x128xf32>
    %68 = vector.multi_reduction <add>, %67, %cst_65 [1, 2] : vector<1x4x4x128xf32> to vector<1x128xf32>
    %69 = vector.shape_cast %68 : vector<1x128xf32> to vector<1x1x1x128xf32>
    %cst_66 = arith.constant 1.600000e+01 : f32
    %70 = vector.broadcast %cst_66 : f32 to vector<1x1x1x128xf32>
    %71 = arith.divf %69, %70 : vector<1x1x1x128xf32>
    %c0_67 = arith.constant 0 : index
    %c2_68 = arith.constant 2 : index
    %c3_69 = arith.constant 3 : index
    %c0_70 = arith.constant 0 : index
    %72 = vector.load %arg2[%c0_67, %c2_68, %c3_69, %c0_70] : memref<1x4x4x128xf32, #tpu.memory_space<vmem>>, vector<1x1x1x128xf32>
    tpu.vector_store %arg2[%c0_67, %c2_68, %c3_69, %c0_70], %71 {strides = array<i32>} : memref<1x4x4x128xf32, #tpu.memory_space<vmem>>, vector<1x1x1x128xf32>,
    %73 = vector.extract_strided_slice %0 {offsets = [0, 12, 0, 0], sizes = [1, 4, 4, 128], strides = [1, 1, 1, 1]} : vector<1x16x16x128xf32> to vector<1x4x4x128xf32>
    %cst_71 = arith.constant dense<0.000000e+00> : vector<1x128xf32>
    %74 = vector.multi_reduction <add>, %73, %cst_71 [1, 2] : vector<1x4x4x128xf32> to vector<1x128xf32>
    %75 = vector.shape_cast %74 : vector<1x128xf32> to vector<1x1x1x128xf32>
    %cst_72 = arith.constant 1.600000e+01 : f32
    %76 = vector.broadcast %cst_72 : f32 to vector<1x1x1x128xf32>
    %77 = arith.divf %75, %76 : vector<1x1x1x128xf32>
    %c0_73 = arith.constant 0 : index
    %c3_74 = arith.constant 3 : index
    %c0_75 = arith.constant 0 : index
    %c0_76 = arith.constant 0 : index
    %78 = vector.load %arg2[%c0_73, %c3_74, %c0_75, %c0_76] : memref<1x4x4x128xf32, #tpu.memory_space<vmem>>, vector<1x1x1x128xf32>
    tpu.vector_store %arg2[%c0_73, %c3_74, %c0_75, %c0_76], %77 {strides = array<i32>} : memref<1x4x4x128xf32, #tpu.memory_space<vmem>>, vector<1x1x1x128xf32>,
    %79 = vector.extract_strided_slice %0 {offsets = [0, 12, 4, 0], sizes = [1, 4, 4, 128], strides = [1, 1, 1, 1]} : vector<1x16x16x128xf32> to vector<1x4x4x128xf32>
    %cst_77 = arith.constant dense<0.000000e+00> : vector<1x128xf32>
    %80 = vector.multi_reduction <add>, %79, %cst_77 [1, 2] : vector<1x4x4x128xf32> to vector<1x128xf32>
    %81 = vector.shape_cast %80 : vector<1x128xf32> to vector<1x1x1x128xf32>
    %cst_78 = arith.constant 1.600000e+01 : f32
    %82 = vector.broadcast %cst_78 : f32 to vector<1x1x1x128xf32>
    %83 = arith.divf %81, %82 : vector<1x1x1x128xf32>
    %c0_79 = arith.constant 0 : index
    %c3_80 = arith.constant 3 : index
    %c1_81 = arith.constant 1 : index
    %c0_82 = arith.constant 0 : index
    %84 = vector.load %arg2[%c0_79, %c3_80, %c1_81, %c0_82] : memref<1x4x4x128xf32, #tpu.memory_space<vmem>>, vector<1x1x1x128xf32>
    tpu.vector_store %arg2[%c0_79, %c3_80, %c1_81, %c0_82], %83 {strides = array<i32>} : memref<1x4x4x128xf32, #tpu.memory_space<vmem>>, vector<1x1x1x128xf32>,
    %85 = vector.extract_strided_slice %0 {offsets = [0, 12, 8, 0], sizes = [1, 4, 4, 128], strides = [1, 1, 1, 1]} : vector<1x16x16x128xf32> to vector<1x4x4x128xf32>
    %cst_83 = arith.constant dense<0.000000e+00> : vector<1x128xf32>
    %86 = vector.multi_reduction <add>, %85, %cst_83 [1, 2] : vector<1x4x4x128xf32> to vector<1x128xf32>
    %87 = vector.shape_cast %86 : vector<1x128xf32> to vector<1x1x1x128xf32>
    %cst_84 = arith.constant 1.600000e+01 : f32
    %88 = vector.broadcast %cst_84 : f32 to vector<1x1x1x128xf32>
    %89 = arith.divf %87, %88 : vector<1x1x1x128xf32>
    %c0_85 = arith.constant 0 : index
    %c3_86 = arith.constant 3 : index
    %c2_87 = arith.constant 2 : index
    %c0_88 = arith.constant 0 : index
    %90 = vector.load %arg2[%c0_85, %c3_86, %c2_87, %c0_88] : memref<1x4x4x128xf32, #tpu.memory_space<vmem>>, vector<1x1x1x128xf32>
    tpu.vector_store %arg2[%c0_85, %c3_86, %c2_87, %c0_88], %89 {strides = array<i32>} : memref<1x4x4x128xf32, #tpu.memory_space<vmem>>, vector<1x1x1x128xf32>,
    %91 = vector.extract_strided_slice %0 {offsets = [0, 12, 12, 0], sizes = [1, 4, 4, 128], strides = [1, 1, 1, 1]} : vector<1x16x16x128xf32> to vector<1x4x4x128xf32>
    %cst_89 = arith.constant dense<0.000000e+00> : vector<1x128xf32>
    %92 = vector.multi_reduction <add>, %91, %cst_89 [1, 2] : vector<1x4x4x128xf32> to vector<1x128xf32>
    %93 = vector.shape_cast %92 : vector<1x128xf32> to vector<1x1x1x128xf32>
    %cst_90 = arith.constant 1.600000e+01 : f32
    %94 = vector.broadcast %cst_90 : f32 to vector<1x1x1x128xf32>
    %95 = arith.divf %93, %94 : vector<1x1x1x128xf32>
    %c0_91 = arith.constant 0 : index
    %c3_92 = arith.constant 3 : index
    %c3_93 = arith.constant 3 : index
    %c0_94 = arith.constant 0 : index
    %96 = vector.load %arg2[%c0_91, %c3_92, %c3_93, %c0_94] : memref<1x4x4x128xf32, #tpu.memory_space<vmem>>, vector<1x1x1x128xf32>
    tpu.vector_store %arg2[%c0_91, %c3_92, %c3_93, %c0_94], %95 {strides = array<i32>} : memref<1x4x4x128xf32, #tpu.memory_space<vmem>>, vector<1x1x1x128xf32>,
    return
  }
  func.func @transform_0(%arg0: i32) -> (i32, i32, i32, i32) {
    %c0_i32 = arith.constant 0 : i32
    %c0_i32_0 = arith.constant 0 : i32
    %c0_i32_1 = arith.constant 0 : i32
    %c0_i32_2 = arith.constant 0 : i32
    return %arg0, %c0_i32, %c0_i32_0, %c0_i32_1 : i32, i32, i32, i32
  }
  func.func @transform_1(%arg0: i32) -> (i32, i32, i32, i32) {
    %c0_i32 = arith.constant 0 : i32
    %c0_i32_0 = arith.constant 0 : i32
    %c0_i32_1 = arith.constant 0 : i32
    %c0_i32_2 = arith.constant 0 : i32
    return %arg0, %c0_i32, %c0_i32_0, %c0_i32_1 : i32, i32, i32, i32
  }
}

module attributes {stable_mosaic.version = 11 : i64} {
  func.func @_mm_bias_kernel(%arg0: i32, %arg1: i32, %arg2: memref<32x128xbf16, #tpu.memory_space<vmem>>, %arg3: memref<128x128xbf16, #tpu.memory_space<vmem>>, %arg4: memref<1x128xf32, #tpu.memory_space<vmem>>, %arg5: memref<32x128xf32, #tpu.memory_space<vmem>>) attributes {dimension_semantics = [#tpu.dimension_semantics<parallel>, #tpu.dimension_semantics<parallel>], iteration_bounds = array<i64: 1, 1>, scalar_prefetch = 0 : i64, scratch_operands = 0 : i64, tpu.core_type = #tpu.core_type<tc>, window_params = [{transform_indices = @transform_0, window_bounds = array<i64: 32, 128>}, {transform_indices = @transform_1, window_bounds = array<i64: 128, 128>}, {transform_indices = @transform_2, window_bounds = array<i64: 1, 128>}, {transform_indices = @transform_3, window_bounds = array<i64: 32, 128>}]} {
    %c0 = arith.constant 0 : index
    %c0_0 = arith.constant 0 : index
    %0 = vector.load %arg2[%c0, %c0_0] : memref<32x128xbf16, #tpu.memory_space<vmem>>, vector<32x128xbf16>
    %c0_1 = arith.constant 0 : index
    %c0_2 = arith.constant 0 : index
    %1 = vector.load %arg3[%c0_1, %c0_2] : memref<128x128xbf16, #tpu.memory_space<vmem>>, vector<128x128xbf16>
    %cst = arith.constant dense<0.000000e+00> : vector<32x128xf32>
    %2 = tpu.matmul %0, %1, %cst {dimension_numbers = #tpu.dot_dimension_numbers<[1], [0], [0], [1], [0, 0, 1, 1], [], []>} : vector<32x128xbf16>, vector<128x128xbf16>, vector<32x128xf32> -> vector<32x128xf32>
    %c0_3 = arith.constant 0 : index
    %c0_4 = arith.constant 0 : index
    %3 = vector.load %arg4[%c0_3, %c0_4] : memref<1x128xf32, #tpu.memory_space<vmem>>, vector<1x128xf32>
    %4 = vector.broadcast %3 : vector<1x128xf32> to vector<32x128xf32>
    %5 = arith.addf %2, %4 : vector<32x128xf32>
    %cst_5 = arith.constant 0.000000e+00 : f32
    %6 = vector.broadcast %cst_5 : f32 to vector<32x128xf32>
    %7 = arith.maximumf %5, %6 : vector<32x128xf32>
    %c0_6 = arith.constant 0 : index
    %c0_7 = arith.constant 0 : index
    %8 = vector.load %arg5[%c0_6, %c0_7] : memref<32x128xf32, #tpu.memory_space<vmem>>, vector<32x128xf32>
    tpu.vector_store %arg5[%c0_6, %c0_7], %7 {strides = array<i32>} : memref<32x128xf32, #tpu.memory_space<vmem>>, vector<32x128xf32>,
    return
  }
  func.func @transform_0(%arg0: i32, %arg1: i32) -> (i32, i32) {
    %c0_i32 = arith.constant 0 : i32
    %c0_i32_0 = arith.constant 0 : i32
    return %arg0, %c0_i32 : i32, i32
  }
  func.func @transform_1(%arg0: i32, %arg1: i32) -> (i32, i32) {
    %c0_i32 = arith.constant 0 : i32
    %c0_i32_0 = arith.constant 0 : i32
    return %c0_i32, %arg1 : i32, i32
  }
  func.func @transform_2(%arg0: i32, %arg1: i32) -> (i32, i32) {
    %c0_i32 = arith.constant 0 : i32
    %c0_i32_0 = arith.constant 0 : i32
    return %c0_i32, %arg1 : i32, i32
  }
  func.func @transform_3(%arg0: i32, %arg1: i32) -> (i32, i32) {
    %c0_i32 = arith.constant 0 : i32
    return %arg0, %arg1 : i32, i32
  }
}

module attributes {stable_mosaic.version = 11 : i64} {
  func.func @_mm_bias_kernel(%arg0: i32, %arg1: i32, %arg2: memref<8x2048xbf16, #tpu.memory_space<vmem>>, %arg3: memref<2048x256xbf16, #tpu.memory_space<vmem>>, %arg4: memref<1x256xf32, #tpu.memory_space<vmem>>, %arg5: memref<8x256xf32, #tpu.memory_space<vmem>>) attributes {dimension_semantics = [#tpu.dimension_semantics<parallel>, #tpu.dimension_semantics<parallel>], iteration_bounds = array<i64: 1, 4>, scalar_prefetch = 0 : i64, scratch_operands = 0 : i64, tpu.core_type = #tpu.core_type<tc>, window_params = [{transform_indices = @transform_0, window_bounds = array<i64: 8, 2048>}, {transform_indices = @transform_1, window_bounds = array<i64: 2048, 256>}, {transform_indices = @transform_2, window_bounds = array<i64: 1, 256>}, {transform_indices = @transform_3, window_bounds = array<i64: 8, 256>}]} {
    %c0 = arith.constant 0 : index
    %c0_0 = arith.constant 0 : index
    %0 = vector.load %arg2[%c0, %c0_0] : memref<8x2048xbf16, #tpu.memory_space<vmem>>, vector<8x2048xbf16>
    %c0_1 = arith.constant 0 : index
    %c0_2 = arith.constant 0 : index
    %1 = vector.load %arg3[%c0_1, %c0_2] : memref<2048x256xbf16, #tpu.memory_space<vmem>>, vector<2048x256xbf16>
    %cst = arith.constant dense<0.000000e+00> : vector<8x256xf32>
    %2 = tpu.matmul %0, %1, %cst {dimension_numbers = #tpu.dot_dimension_numbers<[1], [0], [0], [1], [0, 0, 1, 1], [], []>} : vector<8x2048xbf16>, vector<2048x256xbf16>, vector<8x256xf32> -> vector<8x256xf32>
    %c0_3 = arith.constant 0 : index
    %c0_4 = arith.constant 0 : index
    %3 = vector.load %arg4[%c0_3, %c0_4] : memref<1x256xf32, #tpu.memory_space<vmem>>, vector<1x256xf32>
    %4 = vector.broadcast %3 : vector<1x256xf32> to vector<8x256xf32>
    %5 = arith.addf %2, %4 : vector<8x256xf32>
    %cst_5 = arith.constant 0.000000e+00 : f32
    %6 = vector.broadcast %cst_5 : f32 to vector<8x256xf32>
    %7 = arith.maximumf %5, %6 : vector<8x256xf32>
    %c0_6 = arith.constant 0 : index
    %c0_7 = arith.constant 0 : index
    %8 = vector.load %arg5[%c0_6, %c0_7] : memref<8x256xf32, #tpu.memory_space<vmem>>, vector<8x256xf32>
    tpu.vector_store %arg5[%c0_6, %c0_7], %7 {strides = array<i32>} : memref<8x256xf32, #tpu.memory_space<vmem>>, vector<8x256xf32>,
    return
  }
  func.func @transform_0(%arg0: i32, %arg1: i32) -> (i32, i32) {
    %c0_i32 = arith.constant 0 : i32
    %c0_i32_0 = arith.constant 0 : i32
    return %arg0, %c0_i32 : i32, i32
  }
  func.func @transform_1(%arg0: i32, %arg1: i32) -> (i32, i32) {
    %c0_i32 = arith.constant 0 : i32
    %c0_i32_0 = arith.constant 0 : i32
    return %c0_i32, %arg1 : i32, i32
  }
  func.func @transform_2(%arg0: i32, %arg1: i32) -> (i32, i32) {
    %c0_i32 = arith.constant 0 : i32
    %c0_i32_0 = arith.constant 0 : i32
    return %c0_i32, %arg1 : i32, i32
  }
  func.func @transform_3(%arg0: i32, %arg1: i32) -> (i32, i32) {
    %c0_i32 = arith.constant 0 : i32
    return %arg0, %arg1 : i32, i32
  }
}

module attributes {stable_mosaic.version = 11 : i64} {
  func.func @_mm_bias_kernel(%arg0: i32, %arg1: i32, %arg2: memref<8x1024xbf16, #tpu.memory_space<vmem>>, %arg3: memref<1024x128xbf16, #tpu.memory_space<vmem>>, %arg4: memref<1x128xf32, #tpu.memory_space<vmem>>, %arg5: memref<8x128xf32, #tpu.memory_space<vmem>>) attributes {dimension_semantics = [#tpu.dimension_semantics<parallel>, #tpu.dimension_semantics<parallel>], iteration_bounds = array<i64: 1, 1>, scalar_prefetch = 0 : i64, scratch_operands = 0 : i64, tpu.core_type = #tpu.core_type<tc>, window_params = [{transform_indices = @transform_0, window_bounds = array<i64: 8, 1024>}, {transform_indices = @transform_1, window_bounds = array<i64: 1024, 128>}, {transform_indices = @transform_2, window_bounds = array<i64: 1, 128>}, {transform_indices = @transform_3, window_bounds = array<i64: 8, 128>}]} {
    %c0 = arith.constant 0 : index
    %c0_0 = arith.constant 0 : index
    %0 = vector.load %arg2[%c0, %c0_0] : memref<8x1024xbf16, #tpu.memory_space<vmem>>, vector<8x1024xbf16>
    %c0_1 = arith.constant 0 : index
    %c0_2 = arith.constant 0 : index
    %1 = vector.load %arg3[%c0_1, %c0_2] : memref<1024x128xbf16, #tpu.memory_space<vmem>>, vector<1024x128xbf16>
    %cst = arith.constant dense<0.000000e+00> : vector<8x128xf32>
    %2 = tpu.matmul %0, %1, %cst {dimension_numbers = #tpu.dot_dimension_numbers<[1], [0], [0], [1], [0, 0, 1, 1], [], []>} : vector<8x1024xbf16>, vector<1024x128xbf16>, vector<8x128xf32> -> vector<8x128xf32>
    %c0_3 = arith.constant 0 : index
    %c0_4 = arith.constant 0 : index
    %3 = vector.load %arg4[%c0_3, %c0_4] : memref<1x128xf32, #tpu.memory_space<vmem>>, vector<1x128xf32>
    %4 = vector.broadcast %3 : vector<1x128xf32> to vector<8x128xf32>
    %5 = arith.addf %2, %4 : vector<8x128xf32>
    %c0_5 = arith.constant 0 : index
    %c0_6 = arith.constant 0 : index
    %6 = vector.load %arg5[%c0_5, %c0_6] : memref<8x128xf32, #tpu.memory_space<vmem>>, vector<8x128xf32>
    tpu.vector_store %arg5[%c0_5, %c0_6], %5 {strides = array<i32>} : memref<8x128xf32, #tpu.memory_space<vmem>>, vector<8x128xf32>,
    return
  }
  func.func @transform_0(%arg0: i32, %arg1: i32) -> (i32, i32) {
    %c0_i32 = arith.constant 0 : i32
    %c0_i32_0 = arith.constant 0 : i32
    return %arg0, %c0_i32 : i32, i32
  }
  func.func @transform_1(%arg0: i32, %arg1: i32) -> (i32, i32) {
    %c0_i32 = arith.constant 0 : i32
    %c0_i32_0 = arith.constant 0 : i32
    return %c0_i32, %arg1 : i32, i32
  }
  func.func @transform_2(%arg0: i32, %arg1: i32) -> (i32, i32) {
    %c0_i32 = arith.constant 0 : i32
    %c0_i32_0 = arith.constant 0 : i32
    return %c0_i32, %arg1 : i32, i32
  }
  func.func @transform_3(%arg0: i32, %arg1: i32) -> (i32, i32) {
    %c0_i32 = arith.constant 0 : i32
    return %arg0, %arg1 : i32, i32
  }
}

</mosaic_0001>

<bundles_post_ra>
// kernel: inception_aux_forward.5
= control target key start
LH: loop header
LB: loop body
LE: loop exit
PB: predicated region body
PF: predicated region fallthrough
CT: control target
= control target key end

     0   :  { %s279_s1 = inlined_call_operand.vmem [shape: bf16[128,128], index: 1, kind: input, shape index: {}]   ;;  %s280_s0 = inlined_call_operand.vmem [shape: bf16[32,128], index: 0, kind: input, shape index: {}]   ;;  %s281_s2 = inlined_call_operand.vmem [shape: f32[1,128], index: 2, kind: input, shape index: {}]   ;;  %s282_s3 = inlined_call_operand.vmem [shape: f32[32,128], index: 3, kind: output, shape index: {}]  }
   0x1   :  { %v204_v0 = vld [vmem:[%s279_s1 + $0x38] sm:$0xff]   ;;  %v205_v1 = vld [vmem:[%s279_s1 + $0x30] sm:$0xff]   ;;  %v206_v2 = vld [vmem:[%s279_s1 + $0x28] sm:$0xff]  }
   0x2   :  { %184 = vmatprep.subr.bf16.mxu0 %v204_v0  ;;  %v207_v3 = vld [vmem:[%s279_s1 + $0x20] sm:$0xff]   ;;  %v208_v5 = vld [vmem:[%s279_s1 + $0x18] sm:$0xff]   ;;  %v209_v6 = vld [vmem:[%s279_s1 + $0x10] sm:$0xff]  }
   0x3   :  { %185 = vmatpush3.bf16.msra.mxu0 %v204_v0  ;;  %v212_v4 = vld [vmem:[%s280_s0] sm:$0xff]   ;;  %v210_v7 = vld [vmem:[%s279_s1 + $0x8] sm:$0xff]  }
   0x4   :  { %186 = vmatprep.subr.bf16.mxu0 %v205_v1  ;;  %200 = vmatprep.mubr.bf16.mxu0 %v212_v4  ;;  %v211_v8 = vld [vmem:[%s279_s1] sm:$0xff]   ;;  %v213_v9 = vld [vmem:[%s280_s0 + $0x8] sm:$0xff]  }
   0x5   :  { %v163_v10 = vld [vmem:[%s281_s2] ss:$0 sm:$0xff] }
   0x7   :  { %187 = vmatpush3.bf16.msra.mxu0 %v205_v1 }
   0x8   :  { %188 = vmatprep.subr.bf16.mxu0 %v206_v2 }
   0xb   :  { %189 = vmatpush3.bf16.msra.mxu0 %v206_v2 }
   0xc   :  { %190 = vmatprep.subr.bf16.mxu0 %v207_v3 }
   0xf   :  { %191 = vmatpush3.bf16.msra.mxu0 %v207_v3 }
  0x10   :  { %192 = vmatprep.subr.bf16.mxu0 %v208_v5 }
  0x13   :  { %193 = vmatpush3.bf16.msra.mxu0 %v208_v5 }
  0x14   :  { %194 = vmatprep.subr.bf16.mxu0 %v209_v6 }
  0x17   :  { %195 = vmatpush3.bf16.msra.mxu0 %v209_v6 }
  0x18   :  { %196 = vmatprep.subr.bf16.mxu0 %v210_v7 }
  0x1b   :  { %197 = vmatpush3.bf16.msra.mxu0 %v210_v7 }
  0x1c   :  { %198 = vmatprep.subr.bf16.mxu0 %v211_v8 }
  0x1f   :  { %199 = vmatpush3.bf16.msra.mxu0 %v211_v8 }
  0x22   :  { %201 = vmatmul.mubr.bf16.vlgmr.msra.gmra.mxu0 %v213_v9 }
  0xe2   :  { %v202_v11 = vpop.f32.mrf.mxu0 }
  0xe3   :  { %v145_v12 = vadd.f32 %v202_v11, %v163_v10 }
  0xe4   :  { %v136_v13 = vpop.f32.mrf.mxu0 }
  0xe5   :  { %v153_v14 = vmax.f32 %v145_v12, 0.0  ;;  %v137_v15 = vadd.f32 %v163_v10, %v136_v13 }
  0xe6   :  { %v203_v16 = vpop.f32.mrf.mxu0 }
  0xe7   :  { %157 = vst [vmem:[%s282_s3 + $0x10] sm:$0xff] %v153_v14  ;;  %v151_v17 = vmax.f32 %v137_v15, 0.0  ;;  %v148_v18 = vadd.f32 %v203_v16, %v163_v10 }
  0xe8   :  { %v139_v19 = vpop.f32.mrf.mxu0 }
  0xe9   :  { %155 = vst [vmem:[%s282_s3] sm:$0xff] %v151_v17  ;;  %v154_v20 = vmax.f32 %v148_v18, 0.0  ;;  %v140_v21 = vadd.f32 %v163_v10, %v139_v19 }
  0xeb   :  { %158 = vst [vmem:[%s282_s3 + $0x18] sm:$0xff] %v154_v20  ;;  %v152_v22 = vmax.f32 %v140_v21, 0.0 }
  0xed   :  { %156 = vst [vmem:[%s282_s3 + $0x8] sm:$0xff] %v152_v22 }

// kernel: inception_aux_forward.4
= control target key start
LH: loop header
LB: loop body
LE: loop exit
PB: predicated region body
PF: predicated region fallthrough
CT: control target
= control target key end

     0   :  { %s596_s6 = smov 0   ;;  %s733_s0 = inlined_call_operand.vmem [shape: f32[2,16,16,128], index: 0, kind: input, shape index: {}]   ;;  %s734_s1 = inlined_call_operand.vmem [shape: f32[2,4,4,128], index: 1, kind: output, shape index: {}]  }
   0x1 LB: > { %s545_s7 = sadd.s32 4294967295, %s584_s6   ;;  %p549_p0 = scmp.ge.s32.totalorder %s584_s6, 1  ;;  %s584_s6 = sphi %s596_s6, %s11_s6  }
   0x2   : > { %p87_p1 = scmp.lt.s32.totalorder %s584_s6, 3 }
   0x4   : > { %p88_p2 = pnand %p549_p0, %p87_p1 }
   0x5   : > { %p107_p3 = scmp.lt.s32.totalorder (!%p88_p2), %s545_s7, 1 }
   0x6   : > { %91 = sbr.rel (%p88_p2) target bundleno = 93 (0x5d), region = 24 }
   0xb   : > { %s736_s7 = smov (!%p107_p3, %s545_s7), 1  ;;  %vm149_vm0 = vcmask 1043456  }
   0xc   : > { %s568_s8 = sshll.u32 %s736_s7, 8  ;;  %s569_s12 = sshll.u32 %s736_s7, 4 }
   0xd   : > { %s610_s11 = scalar_lea.vmem %s733_s0, %s568_s8  ;;  %s655_s15 = scalar_lea.vmem %s734_s1, %s569_s12 }
   0xe   : > { %v117_v0 = vld [vmem:[%s610_s11] sm:$0xff]  ;;  %v119_v1 = vld [vmem:[%s610_s11 + $0x10] sm:$0xff]  ;;  %v118_v12 = vld [vmem:[%s610_s11 + $0x8] sm:$0xff] }
   0xf   : > { %v121_v2 = vld [vmem:[%s610_s11 + $0x20] sm:$0xff]  ;;  %v123_v3 = vld [vmem:[%s610_s11 + $0x30] sm:$0xff]  ;;  %v150_v4 = vsel %vm149_vm0, %v117_v0, 0.0  ;;  %v151_v5 = vsel %vm149_vm0, %v119_v1, 0.0  ;;  %v170_v7 = vrot.slane %v117_v0, 4  ;;  %v171_v10 = vrot.slane %v119_v1, 4 }
  0x10   : > { %v153_v6 = vsel %vm149_vm0, %v121_v2, 0.0  ;;  %v152_v8 = vadd.f32 %v151_v5, %v150_v4  ;;  %v155_v9 = vsel %vm149_vm0, %v123_v3, 0.0  ;;  %v172_v11 = vrot.slane %v121_v2, 4  ;;  %v120_v13 = vld [vmem:[%s610_s11 + $0x18] sm:$0xff]  ;;  %v122_v21 = vld [vmem:[%s610_s11 + $0x28] sm:$0xff]  ;;  %v125_v32 = vld [vmem:[%s610_s11 + $0x40] sm:$0xff] }
  0x11   : > { %v173_v14 = vrot.slane %v123_v3, 4  ;;  %v178_v15 = vsel %vm149_vm0, %v170_v7, 0.0  ;;  %v193_v16 = vsel %vm149_vm0, %v118_v12, 0.0  ;;  %v194_v17 = vsel %vm149_vm0, %v120_v13, 0.0  ;;  %v124_v22 = vld [vmem:[%s610_s11 + $0x38] sm:$0xff]  ;;  %v127_v45 = vld [vmem:[%s610_s11 + $0x50] sm:$0xff] }
  0x12   : > { %v154_v18 = vadd.f32 %v153_v6, %v152_v8  ;;  %v179_v19 = vsel %vm149_vm0, %v171_v10, 0.0  ;;  %v181_v20 = vsel %vm149_vm0, %v172_v11, 0.0  ;;  %v195_v23 = vadd.f32 %v194_v17, %v193_v16  ;;  %v129_v46 = vld [vmem:[%s610_s11 + $0x60] sm:$0xff]  ;;  %v131_v49 = vld [vmem:[%s610_s11 + $0x70] sm:$0xff]  ;;  %v126_v16 = vld [vmem:[%s610_s11 + $0x48] sm:$0xff] }
  0x13   : > { %v180_v24 = vadd.f32 %v179_v19, %v178_v15  ;;  %v183_v25 = vsel %vm149_vm0, %v173_v14, 0.0  ;;  %v196_v26 = vsel %vm149_vm0, %v122_v21, 0.0  ;;  %v198_v27 = vsel %vm149_vm0, %v124_v22, 0.0 }
  0x14   : > { %v156_v28 = vadd.f32 %v155_v9, %v154_v18  ;;  %v197_v29 = vadd.f32 %v196_v26, %v195_v23  ;;  %v212_v30 = vrot.slane %v118_v12, 4  ;;  %v213_v31 = vrot.slane %v120_v13, 4 }
  0x15   : > { %v182_v33 = vadd.f32 %v181_v20, %v180_v24  ;;  %v214_v34 = vrot.slane %v122_v21, 4  ;;  %v215_v35 = vrot.slane %v124_v22, 4  ;;  %v235_v36 = vsel %vm149_vm0, %v125_v32, 0.0  ;;  %v128_v20 = vld [vmem:[%s610_s11 + $0x58] sm:$0xff] }
  0x16   : > { %v157_v37 = vrot.slane %v156_v28, 4  ;;  %v199_v38 = vadd.f32 %v198_v27, %v197_v29  ;;  %v220_v39 = vsel %vm149_vm0, %v212_v30, 0.0  ;;  %v221_v40 = vsel %vm149_vm0, %v213_v31, 0.0  ;;  %v130_v29 = vld [vmem:[%s610_s11 + $0x68] sm:$0xff] }
  0x17   : > { %v184_v41 = vadd.f32 %v183_v25, %v182_v33  ;;  %v222_v42 = vadd.f32 %v221_v40, %v220_v39  ;;  %v223_v43 = vsel %vm149_vm0, %v214_v34, 0.0  ;;  %v225_v44 = vsel %vm149_vm0, %v215_v35, 0.0  ;;  %v132_v34 = vld [vmem:[%s610_s11 + $0x78] sm:$0xff] }
  0x18   : > { %v158_v47 = vadd.f32 %v157_v37, %v156_v28  ;;  %v200_v48 = vrot.slane %v199_v38, 4  ;;  %v236_v50 = vsel %vm149_vm0, %v127_v45, 0.0  ;;  %v238_v51 = vsel %vm149_vm0, %v129_v46, 0.0 }
  0x19   : > { %v185_v52 = vrot.slane %v184_v41, 4  ;;  %v224_v53 = vadd.f32 %v223_v43, %v222_v42  ;;  %v237_v54 = vadd.f32 %v236_v50, %v235_v36  ;;  %v240_v55 = vsel %vm149_vm0, %v131_v49, 0.0 }
  0x1a   : > { %v159_v56 = vrot.slane %v158_v47, 2  ;;  %v201_v57 = vadd.f32 %v200_v48, %v199_v38  ;;  %v255_v58 = vrot.slane %v125_v32, 4  ;;  %v256_v59 = vrot.slane %v127_v45, 4 }
  0x1b   : > { %v186_v60 = vadd.f32 %v185_v52, %v184_v41  ;;  %v226_v61 = vadd.f32 %v225_v44, %v224_v53  ;;  %v239_v62 = vadd.f32 %v238_v51, %v237_v54  ;;  %v257_v63 = vrot.slane %v129_v46, 4 }
  0x1c   : > { %v160_v0 = vadd.f32 %v159_v56, %v158_v47  ;;  %v202_v1 = vrot.slane %v201_v57, 2  ;;  %v258_v2 = vrot.slane %v131_v49, 4  ;;  %v263_v3 = vsel %vm149_vm0, %v255_v58, 0.0 }
  0x1d   : > { %v187_v4 = vrot.slane %v186_v60, 2  ;;  %v227_v5 = vrot.slane %v226_v61, 4  ;;  %v241_v6 = vadd.f32 %v240_v55, %v239_v62  ;;  %v264_v7 = vsel %vm149_vm0, %v256_v59, 0.0 }
  0x1e   : > { %v161_v8 = vrot.slane %v160_v0, 1  ;;  %v203_v9 = vadd.f32 %v202_v1, %v201_v57  ;;  %v265_v10 = vadd.f32 %v264_v7, %v263_v3  ;;  %v266_v11 = vsel %vm149_vm0, %v257_v63, 0.0 }
  0x1f   : > { %v188_v12 = vadd.f32 %v187_v4, %v186_v60  ;;  %v228_v13 = vadd.f32 %v227_v5, %v226_v61  ;;  %v242_v14 = vrot.slane %v241_v6, 4  ;;  %v268_v15 = vsel %vm149_vm0, %v258_v2, 0.0  ;;  %v133_v60 = vld [vmem:[%s610_s11 + $0x80] sm:$0xff]  ;;  %v135_v61 = vld [vmem:[%s610_s11 + $0x90] sm:$0xff] }
  0x20   : > { %v162_v17 = vadd.f32 %v161_v8, %v160_v0  ;;  %v204_v18 = vrot.slane %v203_v9, 1  ;;  %v267_v19 = vadd.f32 %v266_v11, %v265_v10  ;;  %v278_v21 = vsel %vm149_vm0, %v126_v16, 0.0  ;;  %v137_v0 = vld [vmem:[%s610_s11 + $0xa0] sm:$0xff]  ;;  %v139_v5 = vld [vmem:[%s610_s11 + $0xb0] sm:$0xff] }
  0x21   : > { %v189_v22 = vrot.slane %v188_v12, 1  ;;  %v229_v23 = vrot.slane %v228_v13, 2  ;;  %v243_v24 = vadd.f32 %v242_v14, %v241_v6  ;;  %v279_v25 = vsel %vm149_vm0, %v128_v20, 0.0 }
  0x22   : > { %v164_v26 = vmul.f32 0.0625, %v162_v17  ;;  %v205_v27 = vadd.f32 %v204_v18, %v203_v9  ;;  %v269_v28 = vadd.f32 %v268_v15, %v267_v19  ;;  %v280_v30 = vadd.f32 %v279_v25, %v278_v21 }
  0x23   : > { %v190_v31 = vadd.f32 %v189_v22, %v188_v12  ;;  %v230_v32 = vadd.f32 %v229_v23, %v228_v13  ;;  %v244_v33 = vrot.slane %v243_v24, 2  ;;  %v281_v35 = vsel %vm149_vm0, %v130_v29, 0.0 }
  0x24   : > { %165 = vst [vmem:[%s655_s15] sm:$0x1] %v164_v26  ;;  %v206_v36 = vmul.f32 0.0625, %v205_v27  ;;  %v270_v37 = vrot.slane %v269_v28, 4  ;;  %v282_v38 = vadd.f32 %v281_v35, %v280_v30  ;;  %v283_v39 = vsel %vm149_vm0, %v132_v34, 0.0 }
  0x25   : > { %v191_v40 = vmul.f32 0.0625, %v190_v31  ;;  %v231_v41 = vrot.slane %v230_v32, 1  ;;  %v245_v42 = vadd.f32 %v244_v33, %v243_v24  ;;  %v297_v43 = vrot.slane %v126_v16, 4 }
  0x26   : > { %207 = vst [vmem:[%s655_s15 + $0x2] sm:$0x1] %v206_v36  ;;  %v271_v44 = vadd.f32 %v270_v37, %v269_v28  ;;  %v284_v45 = vadd.f32 %v283_v39, %v282_v38  ;;  %v298_v46 = vrot.slane %v128_v20, 4  ;;  %v299_v47 = vrot.slane %v130_v29, 4  ;;  %v134_v28 = vld [vmem:[%s610_s11 + $0x88] sm:$0xff]  ;;  %v136_v29 = vld [vmem:[%s610_s11 + $0x98] sm:$0xff] }
  0x27   : > { %192 = vst [vmem:[%s655_s15 + $0x1] sm:$0x1] %v191_v40  ;;  %v232_v48 = vadd.f32 %v231_v41, %v230_v32  ;;  %v246_v49 = vrot.slane %v245_v42, 1  ;;  %v300_v50 = vrot.slane %v132_v34, 4  ;;  %v305_v51 = vsel %vm149_vm0, %v297_v43, 0.0  ;;  %v138_v32 = vld [vmem:[%s610_s11 + $0xa8] sm:$0xff] }
  0x28   : > { %v272_v52 = vrot.slane %v271_v44, 2  ;;  %v285_v53 = vrot.slane %v284_v45, 4  ;;  %v306_v54 = vsel %vm149_vm0, %v298_v46, 0.0  ;;  %v308_v55 = vsel %vm149_vm0, %v299_v47, 0.0  ;;  %v140_v37 = vld [vmem:[%s610_s11 + $0xb8] sm:$0xff] }
  0x29   : > { %v233_v56 = vmul.f32 0.0625, %v232_v48  ;;  %v247_v57 = vadd.f32 %v246_v49, %v245_v42  ;;  %v307_v58 = vadd.f32 %v306_v54, %v305_v51  ;;  %v310_v59 = vsel %vm149_vm0, %v300_v50, 0.0 }
  0x2a   : > { %v273_v62 = vadd.f32 %v272_v52, %v271_v44  ;;  %v286_v63 = vadd.f32 %v285_v53, %v284_v45  ;;  %v320_v1 = vsel %vm149_vm0, %v133_v60, 0.0  ;;  %v321_v2 = vsel %vm149_vm0, %v135_v61, 0.0 }
  0x2b   : > { %234 = vst [vmem:[%s655_s15 + $0x3] sm:$0x1] %v233_v56  ;;  %v248_v3 = vmul.f32 0.0625, %v247_v57  ;;  %v309_v4 = vadd.f32 %v308_v55, %v307_v58  ;;  %v322_v6 = vadd.f32 %v321_v2, %v320_v1  ;;  %v323_v7 = vsel %vm149_vm0, %v137_v0, 0.0 }
  0x2c   : > { %v274_v8 = vrot.slane %v273_v62, 1  ;;  %v287_v9 = vrot.slane %v286_v63, 2  ;;  %v325_v10 = vsel %vm149_vm0, %v139_v5, 0.0  ;;  %v340_v11 = vrot.slane %v133_v60, 4  ;;  %v141_v60 = vld [vmem:[%s610_s11 + $0xc0] sm:$0xff] }
  0x2d   : > { %554 = vst [vmem:[%s655_s15 + $0x4] sm:$0x1] %v248_v3  ;;  %v311_v12 = vadd.f32 %v310_v59, %v309_v4  ;;  %v324_v13 = vadd.f32 %v323_v7, %v322_v6  ;;  %v341_v14 = vrot.slane %v135_v61, 4  ;;  %v342_v15 = vrot.slane %v137_v0, 4  ;;  %v143_v0 = vld [vmem:[%s610_s11 + $0xd0] sm:$0xff] }
  0x2e   : > { %v275_v16 = vadd.f32 %v274_v8, %v273_v62  ;;  %v288_v17 = vadd.f32 %v287_v9, %v286_v63  ;;  %v343_v18 = vrot.slane %v139_v5, 4  ;;  %v348_v19 = vsel %vm149_vm0, %v340_v11, 0.0  ;;  %v145_v5 = vld [vmem:[%s610_s11 + $0xe0] sm:$0xff]  ;;  %v147_v9 = vld [vmem:[%s610_s11 + $0xf0] sm:$0xff] }
  0x2f   : > { %v312_v20 = vrot.slane %v311_v12, 4  ;;  %v326_v21 = vadd.f32 %v325_v10, %v324_v13  ;;  %v349_v22 = vsel %vm149_vm0, %v341_v14, 0.0  ;;  %v351_v23 = vsel %vm149_vm0, %v342_v15, 0.0 }
  0x30   : > { %v276_v24 = vmul.f32 0.0625, %v275_v16  ;;  %v289_v25 = vrot.slane %v288_v17, 1  ;;  %v350_v26 = vadd.f32 %v349_v22, %v348_v19  ;;  %v353_v27 = vsel %vm149_vm0, %v343_v18, 0.0 }
  0x31   : > { %v313_v30 = vadd.f32 %v312_v20, %v311_v12  ;;  %v327_v31 = vrot.slane %v326_v21, 4  ;;  %v363_v33 = vsel %vm149_vm0, %v134_v28, 0.0  ;;  %v364_v34 = vsel %vm149_vm0, %v136_v29, 0.0 }
  0x32   : > { %555 = vst [vmem:[%s655_s15 + $0x5] sm:$0x1] %v276_v24  ;;  %v290_v35 = vadd.f32 %v289_v25, %v288_v17  ;;  %v352_v36 = vadd.f32 %v351_v23, %v350_v26  ;;  %v365_v38 = vadd.f32 %v364_v34, %v363_v33  ;;  %v366_v39 = vsel %vm149_vm0, %v138_v32, 0.0 }
  0x33   : > { %v314_v40 = vrot.slane %v313_v30, 2  ;;  %v328_v41 = vadd.f32 %v327_v31, %v326_v21  ;;  %v368_v42 = vsel %vm149_vm0, %v140_v37, 0.0  ;;  %v382_v43 = vrot.slane %v134_v28, 4 }
  0x34   : > { %v291_v44 = vmul.f32 0.0625, %v290_v35  ;;  %v354_v45 = vadd.f32 %v353_v27, %v352_v36  ;;  %v367_v46 = vadd.f32 %v366_v39, %v365_v38  ;;  %v383_v47 = vrot.slane %v136_v29, 4  ;;  %v142_v36 = vld [vmem:[%s610_s11 + $0xc8] sm:$0xff] }
  0x35   : > { %v315_v48 = vadd.f32 %v314_v40, %v313_v30  ;;  %v329_v49 = vrot.slane %v328_v41, 2  ;;  %v384_v50 = vrot.slane %v138_v32, 4  ;;  %v385_v51 = vrot.slane %v140_v37, 4  ;;  %v144_v37 = vld [vmem:[%s610_s11 + $0xd8] sm:$0xff] }
  0x36   : > { %556 = vst [vmem:[%s655_s15 + $0x6] sm:$0x1] %v291_v44  ;;  %v355_v52 = vrot.slane %v354_v45, 4  ;;  %v369_v53 = vadd.f32 %v368_v42, %v367_v46  ;;  %v390_v54 = vsel %vm149_vm0, %v382_v43, 0.0  ;;  %v391_v55 = vsel %vm149_vm0, %v383_v47, 0.0  ;;  %v146_v46 = vld [vmem:[%s610_s11 + $0xe8] sm:$0xff] }
  0x37   : > { %v316_v56 = vrot.slane %v315_v48, 1  ;;  %v330_v57 = vadd.f32 %v329_v49, %v328_v41  ;;  %v392_v58 = vadd.f32 %v391_v55, %v390_v54  ;;  %v393_v59 = vsel %vm149_vm0, %v384_v50, 0.0  ;;  %v148_v47 = vld [vmem:[%s610_s11 + $0xf8] sm:$0xff] }
  0x38   : > { %v356_v61 = vadd.f32 %v355_v52, %v354_v45  ;;  %v370_v62 = vrot.slane %v369_v53, 4  ;;  %v395_v63 = vsel %vm149_vm0, %v385_v51, 0.0  ;;  %v405_v1 = vsel %vm149_vm0, %v141_v60, 0.0 }
  0x39   : > { %v317_v2 = vadd.f32 %v316_v56, %v315_v48  ;;  %v331_v3 = vrot.slane %v330_v57, 1  ;;  %v394_v4 = vadd.f32 %v393_v59, %v392_v58  ;;  %v406_v6 = vsel %vm149_vm0, %v143_v0, 0.0 }
  0x3a   : > { %v357_v7 = vrot.slane %v356_v61, 2  ;;  %v371_v8 = vadd.f32 %v370_v62, %v369_v53  ;;  %v407_v10 = vadd.f32 %v406_v6, %v405_v1  ;;  %v408_v11 = vsel %vm149_vm0, %v145_v5, 0.0 }
  0x3b   : > { %v318_v12 = vmul.f32 0.0625, %v317_v2  ;;  %v332_v13 = vadd.f32 %v331_v3, %v330_v57  ;;  %v396_v14 = vadd.f32 %v395_v63, %v394_v4  ;;  %v410_v15 = vsel %vm149_vm0, %v147_v9, 0.0 }
  0x3c   : > { %v358_v16 = vadd.f32 %v357_v7, %v356_v61  ;;  %v372_v17 = vrot.slane %v371_v8, 2  ;;  %v409_v18 = vadd.f32 %v408_v11, %v407_v10  ;;  %v425_v19 = vrot.slane %v141_v60, 4 }
  0x3d   : > { %557 = vst [vmem:[%s655_s15 + $0x7] sm:$0x1] %v318_v12  ;;  %v333_v20 = vmul.f32 0.0625, %v332_v13  ;;  %v397_v21 = vrot.slane %v396_v14, 4  ;;  %v426_v22 = vrot.slane %v143_v0, 4  ;;  %v427_v23 = vrot.slane %v145_v5, 4 }
  0x3e   : > { %v359_v24 = vrot.slane %v358_v16, 1  ;;  %v373_v25 = vadd.f32 %v372_v17, %v371_v8  ;;  %v411_v26 = vadd.f32 %v410_v15, %v409_v18  ;;  %v428_v27 = vrot.slane %v147_v9, 4 }
  0x3f   : > { %558 = vst [vmem:[%s655_s15 + $0x8] sm:$0x1] %v333_v20  ;;  %v398_v28 = vadd.f32 %v397_v21, %v396_v14  ;;  %v433_v29 = vsel %vm149_vm0, %v425_v19, 0.0  ;;  %v434_v30 = vsel %vm149_vm0, %v426_v22, 0.0  ;;  %v436_v31 = vsel %vm149_vm0, %v427_v23, 0.0 }
  0x40   : > { %v360_v32 = vadd.f32 %v359_v24, %v358_v16  ;;  %v374_v33 = vrot.slane %v373_v25, 1  ;;  %v412_v34 = vrot.slane %v411_v26, 4  ;;  %v435_v35 = vadd.f32 %v434_v30, %v433_v29 }
  0x41   : > { %v399_v38 = vrot.slane %v398_v28, 2  ;;  %v438_v39 = vsel %vm149_vm0, %v428_v27, 0.0  ;;  %v448_v40 = vsel %vm149_vm0, %v142_v36, 0.0  ;;  %v449_v41 = vsel %vm149_vm0, %v144_v37, 0.0 }
  0x42   : > { %v361_v42 = vmul.f32 0.0625, %v360_v32  ;;  %v375_v43 = vadd.f32 %v374_v33, %v373_v25  ;;  %v413_v44 = vadd.f32 %v412_v34, %v411_v26  ;;  %v437_v45 = vadd.f32 %v436_v31, %v435_v35 }
  0x43   : > { %v400_v48 = vadd.f32 %v399_v38, %v398_v28  ;;  %v450_v49 = vadd.f32 %v449_v41, %v448_v40  ;;  %v451_v50 = vsel %vm149_vm0, %v146_v46, 0.0  ;;  %v453_v51 = vsel %vm149_vm0, %v148_v47, 0.0 }
  0x44   : > { %559 = vst [vmem:[%s655_s15 + $0x9] sm:$0x1] %v361_v42  ;;  %v376_v52 = vmul.f32 0.0625, %v375_v43  ;;  %v414_v53 = vrot.slane %v413_v44, 2  ;;  %v439_v54 = vadd.f32 %v438_v39, %v437_v45  ;;  %v467_v55 = vrot.slane %v142_v36, 4 }
  0x45   : > { %v401_v56 = vrot.slane %v400_v48, 1  ;;  %v452_v57 = vadd.f32 %v451_v50, %v450_v49  ;;  %v468_v58 = vrot.slane %v144_v37, 4  ;;  %v469_v59 = vrot.slane %v146_v46, 4 }
  0x46   : > { %560 = vst [vmem:[%s655_s15 + $0xa] sm:$0x1] %v376_v52  ;;  %v415_v60 = vadd.f32 %v414_v53, %v413_v44  ;;  %v440_v61 = vrot.slane %v439_v54, 4  ;;  %v470_v62 = vrot.slane %v148_v47, 4  ;;  %v475_v63 = vsel %vm149_vm0, %v467_v55, 0.0 }
  0x47   : > { %v402_v0 = vadd.f32 %v401_v56, %v400_v48  ;;  %v454_v1 = vadd.f32 %v453_v51, %v452_v57  ;;  %v476_v2 = vsel %vm149_vm0, %v468_v58, 0.0  ;;  %v478_v3 = vsel %vm149_vm0, %v469_v59, 0.0 }
  0x48   : > { %v416_v4 = vrot.slane %v415_v60, 1  ;;  %v441_v5 = vadd.f32 %v440_v61, %v439_v54  ;;  %v477_v6 = vadd.f32 %v476_v2, %v475_v63  ;;  %v480_v9 = vsel %vm149_vm0, %v470_v62, 0.0 }
  0x49   : > { %v403_v7 = vmul.f32 0.0625, %v402_v0  ;;  %v455_v8 = vrot.slane %v454_v1, 4 }
  0x4a   : > { %v417_v10 = vadd.f32 %v416_v4, %v415_v60  ;;  %v442_v11 = vrot.slane %v441_v5, 2  ;;  %v479_v12 = vadd.f32 %v478_v3, %v477_v6 }
  0x4b   : > { %561 = vst [vmem:[%s655_s15 + $0xb] sm:$0x1] %v403_v7  ;;  %v456_v13 = vadd.f32 %v455_v8, %v454_v1 }
  0x4c   : > { %v418_v14 = vmul.f32 0.0625, %v417_v10  ;;  %v443_v15 = vadd.f32 %v442_v11, %v441_v5  ;;  %v481_v16 = vadd.f32 %v480_v9, %v479_v12 }
  0x4d   : > { %v457_v17 = vrot.slane %v456_v13, 2 }
  0x4e   : > { %562 = vst [vmem:[%s655_s15 + $0xc] sm:$0x1] %v418_v14  ;;  %v444_v18 = vrot.slane %v443_v15, 1  ;;  %v482_v19 = vrot.slane %v481_v16, 4 }
  0x4f   : > { %v458_v20 = vadd.f32 %v457_v17, %v456_v13 }
  0x50   : > { %v445_v21 = vadd.f32 %v444_v18, %v443_v15  ;;  %v483_v22 = vadd.f32 %v482_v19, %v481_v16 }
  0x51   : > { %v459_v23 = vrot.slane %v458_v20, 1 }
  0x52   : > { %v446_v24 = vmul.f32 0.0625, %v445_v21  ;;  %v484_v25 = vrot.slane %v483_v22, 2 }
  0x53   : > { %v460_v26 = vadd.f32 %v459_v23, %v458_v20 }
  0x54   : > { %563 = vst [vmem:[%s655_s15 + $0xd] sm:$0x1] %v446_v24  ;;  %v485_v27 = vadd.f32 %v484_v25, %v483_v22 }
  0x55   : > { %v461_v28 = vmul.f32 0.0625, %v460_v26 }
  0x56   : > { %v486_v29 = vrot.slane %v485_v27, 1 }
  0x57   : > { %564 = vst [vmem:[%s655_s15 + $0xe] sm:$0x1] %v461_v28 }
  0x58   : > { %v487_v30 = vadd.f32 %v486_v29, %v485_v27 }
  0x5a   : > { %v488_v31 = vmul.f32 0.0625, %v487_v30 }
  0x5c   : > { %565 = vst [vmem:[%s655_s15 + $0xf] sm:$0x1] %v488_v31 }
  0x5d PF: > { %s11_s6 = sadd.s32 1, %s584_s6  }
  0x5e   : > { %p8_p4 = scmp.ge.s32.totalorder %s11_s6, 4  }
  0x60   :  { %10 = sbr.rel (!%p8_p4) target bundleno = 1 (0x1), region = 57 }

// kernel: inception_aux_forward.7
= control target key start
LH: loop header
LB: loop body
LE: loop exit
PB: predicated region body
PF: predicated region fallthrough
CT: control target
= control target key end

     0   :  { %s1194_s1 = inlined_call_operand.vmem [shape: bf16[1024,128], index: 1, kind: input, shape index: {}]   ;;  %s1195_s0 = inlined_call_operand.vmem [shape: bf16[8,1024], index: 0, kind: input, shape index: {}]   ;;  %s1196_s2 = inlined_call_operand.vmem [shape: f32[1,128], index: 2, kind: input, shape index: {}]   ;;  %s1197_s3 = inlined_call_operand.vmem [shape: f32[8,128], index: 3, kind: output, shape index: {}]  }
   0x1   :  { %v892_v0 = vld [vmem:[%s1194_s1 + $0x78] sm:$0xff]   ;;  %v896_v4 = vld [vmem:[%s1194_s1 + $0x70] sm:$0xff]   ;;  %v900_v8 = vld [vmem:[%s1194_s1 + $0x68] sm:$0xff]  }
   0x2   :  { %v893_v1 = vld [vmem:[%s1194_s1 + $0xf8] sm:$0xff]   ;;  %804 = vmatprep.subr.bf16.mxu0 %v892_v0  ;;  %v897_v5 = vld [vmem:[%s1194_s1 + $0xf0] sm:$0xff]   ;;  %v901_v9 = vld [vmem:[%s1194_s1 + $0xe8] sm:$0xff]  }
   0x3   :  { %v894_v2 = vld [vmem:[%s1194_s1 + $0x38] sm:$0xff]   ;;  %826 = vmatprep.subr.bf16.mxu1 %v893_v1  ;;  %v898_v6 = vld [vmem:[%s1194_s1 + $0x30] sm:$0xff]   ;;  %v902_v10 = vld [vmem:[%s1194_s1 + $0x28] sm:$0xff]  }
   0x4   :  { %v895_v3 = vld [vmem:[%s1194_s1 + $0xb8] sm:$0xff]   ;;  %805 = vmatpush3.bf16.msra.mxu0 %v894_v2  ;;  %v899_v7 = vld [vmem:[%s1194_s1 + $0xb0] sm:$0xff]   ;;  %v903_v11 = vld [vmem:[%s1194_s1 + $0xa8] sm:$0xff]  }
   0x5   :  { %827 = vmatpush3.bf16.msra.mxu1 %v895_v3  ;;  %806 = vmatprep.subr.bf16.mxu0 %v896_v4  ;;  %v904_v12 = vld [vmem:[%s1194_s1 + $0x60] sm:$0xff]   ;;  %v908_v16 = vld [vmem:[%s1194_s1 + $0x58] sm:$0xff]   ;;  %v912_v20 = vld [vmem:[%s1194_s1 + $0x50] sm:$0xff]  }
   0x6   :  { %828 = vmatprep.subr.bf16.mxu1 %v897_v5  ;;  %v905_v13 = vld [vmem:[%s1194_s1 + $0xe0] sm:$0xff]   ;;  %v909_v17 = vld [vmem:[%s1194_s1 + $0xd8] sm:$0xff]   ;;  %v913_v21 = vld [vmem:[%s1194_s1 + $0xd0] sm:$0xff]  }
   0x7   :  { %v906_v14 = vld [vmem:[%s1194_s1 + $0x20] sm:$0xff]   ;;  %v910_v18 = vld [vmem:[%s1194_s1 + $0x18] sm:$0xff]   ;;  %v914_v22 = vld [vmem:[%s1194_s1 + $0x10] sm:$0xff]  }
   0x8   :  { %807 = vmatpush3.bf16.msra.mxu0 %v898_v6  ;;  %v907_v15 = vld [vmem:[%s1194_s1 + $0xa0] sm:$0xff]   ;;  %v911_v19 = vld [vmem:[%s1194_s1 + $0x98] sm:$0xff]   ;;  %v915_v23 = vld [vmem:[%s1194_s1 + $0x90] sm:$0xff]  }
   0x9   :  { %829 = vmatpush3.bf16.msra.mxu1 %v899_v7  ;;  %808 = vmatprep.subr.bf16.mxu0 %v900_v8  ;;  %v916_v24 = vld [vmem:[%s1194_s1 + $0x48] sm:$0xff]   ;;  %v920_v28 = vld [vmem:[%s1194_s1 + $0x40] sm:$0xff]   ;;  %v928_v38 = vld [vmem:[%s1194_s1 + $0x178] sm:$0xff]  }
   0xa   :  { %830 = vmatprep.subr.bf16.mxu1 %v901_v9  ;;  %v917_v25 = vld [vmem:[%s1194_s1 + $0xc8] sm:$0xff]   ;;  %v921_v29 = vld [vmem:[%s1194_s1 + $0xc0] sm:$0xff]   ;;  %v929_v39 = vld [vmem:[%s1194_s1 + $0x1f8] sm:$0xff]  }
   0xb   :  { %v918_v26 = vld [vmem:[%s1194_s1 + $0x8] sm:$0xff]   ;;  %v922_v30 = vld [vmem:[%s1194_s1] sm:$0xff]   ;;  %v930_v40 = vld [vmem:[%s1194_s1 + $0x138] sm:$0xff]  }
   0xc   :  { %809 = vmatpush3.bf16.msra.mxu0 %v902_v10  ;;  %v919_v27 = vld [vmem:[%s1194_s1 + $0x88] sm:$0xff]   ;;  %v923_v31 = vld [vmem:[%s1194_s1 + $0x80] sm:$0xff]   ;;  %v931_v41 = vld [vmem:[%s1194_s1 + $0x1b8] sm:$0xff]  }
   0xd   :  { %831 = vmatpush3.bf16.msra.mxu1 %v903_v11  ;;  %810 = vmatprep.subr.bf16.mxu0 %v904_v12  ;;  %v15_v32 = vld [vmem:[%s1195_s0] sm:$0xff]  ;;  %v16_v33 = vld [vmem:[%s1195_s0 + $0x8] sm:$0xff]  ;;  %v932_v42 = vld [vmem:[%s1194_s1 + $0x170] sm:$0xff]  }
   0xe   :  { %832 = vmatprep.subr.bf16.mxu1 %v905_v13  ;;  %v732_v34 = vcombine.low %v15_v32, %v15_v32  ;;  %v733_v35 = vcombine.high %v15_v32, %v15_v32  ;;  %v734_v36 = vcombine.low %v16_v33, %v16_v33  ;;  %v735_v37 = vcombine.high %v16_v33, %v16_v33  ;;  %v933_v43 = vld [vmem:[%s1194_s1 + $0x1f0] sm:$0xff]   ;;  %v936_v46 = vld [vmem:[%s1194_s1 + $0x168] sm:$0xff]   ;;  %v940_v50 = vld [vmem:[%s1194_s1 + $0x160] sm:$0xff]  }
   0xf   :  { %v934_v44 = vld [vmem:[%s1194_s1 + $0x130] sm:$0xff]   ;;  %v937_v47 = vld [vmem:[%s1194_s1 + $0x1e8] sm:$0xff]   ;;  %v941_v51 = vld [vmem:[%s1194_s1 + $0x1e0] sm:$0xff]  }
  0x10   :  { %811 = vmatpush3.bf16.msra.mxu0 %v906_v14  ;;  %598 = vmatprep.mubr.bf16.mxu0 %v733_v35  ;;  %v935_v45 = vld [vmem:[%s1194_s1 + $0x1b0] sm:$0xff]   ;;  %v938_v48 = vld [vmem:[%s1194_s1 + $0x128] sm:$0xff]   ;;  %v942_v52 = vld [vmem:[%s1194_s1 + $0x120] sm:$0xff]  }
  0x11   :  { %833 = vmatpush3.bf16.msra.mxu1 %v907_v15  ;;  %812 = vmatprep.subr.bf16.mxu0 %v908_v16  ;;  %v939_v49 = vld [vmem:[%s1194_s1 + $0x1a8] sm:$0xff]   ;;  %v943_v53 = vld [vmem:[%s1194_s1 + $0x1a0] sm:$0xff]   ;;  %v944_v54 = vld [vmem:[%s1194_s1 + $0x158] sm:$0xff]  }
  0x12   :  { %834 = vmatprep.subr.bf16.mxu1 %v909_v17  ;;  %638 = vmatprep.mubr.bf16.mxu1 %v735_v37  ;;  %v945_v55 = vld [vmem:[%s1194_s1 + $0x1d8] sm:$0xff]   ;;  %v948_v58 = vld [vmem:[%s1194_s1 + $0x150] sm:$0xff]   ;;  %v952_v62 = vld [vmem:[%s1194_s1 + $0x148] sm:$0xff]  }
  0x13   :  { %v946_v56 = vld [vmem:[%s1194_s1 + $0x118] sm:$0xff]   ;;  %v949_v59 = vld [vmem:[%s1194_s1 + $0x1d0] sm:$0xff]   ;;  %v953_v63 = vld [vmem:[%s1194_s1 + $0x1c8] sm:$0xff]  }
  0x14   :  { %813 = vmatpush3.bf16.msra.mxu0 %v910_v18  ;;  %v947_v57 = vld [vmem:[%s1194_s1 + $0x198] sm:$0xff]   ;;  %v950_v60 = vld [vmem:[%s1194_s1 + $0x110] sm:$0xff]   ;;  %v954_v0 = vld [vmem:[%s1194_s1 + $0x108] sm:$0xff]  }
  0x15   :  { %835 = vmatpush3.bf16.msra.mxu1 %v911_v19  ;;  %814 = vmatprep.subr.bf16.mxu0 %v912_v20  ;;  %v951_v61 = vld [vmem:[%s1194_s1 + $0x190] sm:$0xff]   ;;  %v955_v1 = vld [vmem:[%s1194_s1 + $0x188] sm:$0xff]   ;;  %v956_v2 = vld [vmem:[%s1194_s1 + $0x140] sm:$0xff]  }
  0x16   :  { %836 = vmatprep.subr.bf16.mxu1 %v913_v21  ;;  %v957_v3 = vld [vmem:[%s1194_s1 + $0x1c0] sm:$0xff]   ;;  %v17_v6 = vld [vmem:[%s1195_s0 + $0x10] sm:$0xff]  ;;  %v18_v9 = vld [vmem:[%s1195_s0 + $0x18] sm:$0xff] }
  0x17   :  { %v958_v4 = vld [vmem:[%s1194_s1 + $0x100] sm:$0xff]   ;;  %v736_v7 = vcombine.low %v17_v6, %v17_v6  ;;  %v737_v8 = vcombine.high %v17_v6, %v17_v6  ;;  %v738_v10 = vcombine.low %v18_v9, %v18_v9  ;;  %v739_v11 = vcombine.high %v18_v9, %v18_v9 }
  0x18   :  { %815 = vmatpush3.bf16.msra.mxu0 %v914_v22  ;;  %v959_v5 = vld [vmem:[%s1194_s1 + $0x180] sm:$0xff]  }
  0x19   :  { %837 = vmatpush3.bf16.msra.mxu1 %v915_v23  ;;  %816 = vmatprep.subr.bf16.mxu0 %v916_v24  ;;  %v731_v21 = vld [vmem:[%s1196_s2] ss:$0 sm:$0xff] }
  0x1a   :  { %838 = vmatprep.subr.bf16.mxu1 %v917_v25 }
  0x1c   :  { %817 = vmatpush3.bf16.msra.mxu0 %v918_v26 }
  0x1d   :  { %839 = vmatpush3.bf16.msra.mxu1 %v919_v27  ;;  %818 = vmatprep.subr.bf16.mxu0 %v920_v28 }
  0x1e   :  { %840 = vmatprep.subr.bf16.mxu1 %v921_v29 }
  0x20   :  { %819 = vmatpush3.bf16.msra.mxu0 %v922_v30 }
  0x21   :  { %841 = vmatpush3.bf16.msra.mxu1 %v923_v31  ;;  %848 = vmatprep.subr.bf16.mxu0 %v928_v38 }
  0x22   :  { %870 = vmatprep.subr.bf16.mxu1 %v929_v39 }
  0x23   :  { %599 = vmatmul.mubr.bf16.vlgmr.msra.gmra.mxu0 %v732_v34 }
  0x24   :  { %639 = vmatmul.mubr.bf16.vlgmr.msra.gmra.mxu1 %v734_v36  ;;  %849 = vmatpush3.bf16.msra.mxu0 %v930_v40 }
  0x25   :  { %871 = vmatpush3.bf16.msra.mxu1 %v931_v41  ;;  %850 = vmatprep.subr.bf16.mxu0 %v932_v42 }
  0x26   :  { %872 = vmatprep.subr.bf16.mxu1 %v933_v43  ;;  %678 = vmatprep.mubr.bf16.mxu0 %v737_v8 }
  0x27   :  { %718 = vmatprep.mubr.bf16.mxu1 %v739_v11 }
  0x28   :  { %851 = vmatpush3.bf16.msra.mxu0 %v934_v44 }
  0x29   :  { %873 = vmatpush3.bf16.msra.mxu1 %v935_v45  ;;  %852 = vmatprep.subr.bf16.mxu0 %v936_v46 }
  0x2a   :  { %874 = vmatprep.subr.bf16.mxu1 %v937_v47 }
  0x2c   :  { %853 = vmatpush3.bf16.msra.mxu0 %v938_v48 }
  0x2d   :  { %875 = vmatpush3.bf16.msra.mxu1 %v939_v49  ;;  %854 = vmatprep.subr.bf16.mxu0 %v940_v50 }
  0x2e   :  { %876 = vmatprep.subr.bf16.mxu1 %v941_v51 }
  0x30   :  { %855 = vmatpush3.bf16.msra.mxu0 %v942_v52 }
  0x31   :  { %877 = vmatpush3.bf16.msra.mxu1 %v943_v53  ;;  %856 = vmatprep.subr.bf16.mxu0 %v944_v54 }
  0x32   :  { %878 = vmatprep.subr.bf16.mxu1 %v945_v55 }
  0x34   :  { %857 = vmatpush3.bf16.msra.mxu0 %v946_v56 }
  0x35   :  { %879 = vmatpush3.bf16.msra.mxu1 %v947_v57  ;;  %858 = vmatprep.subr.bf16.mxu0 %v948_v58 }
  0x36   :  { %880 = vmatprep.subr.bf16.mxu1 %v949_v59 }
  0x38   :  { %859 = vmatpush3.bf16.msra.mxu0 %v950_v60 }
  0x39   :  { %881 = vmatpush3.bf16.msra.mxu1 %v951_v61  ;;  %860 = vmatprep.subr.bf16.mxu0 %v952_v62 }
  0x3a   :  { %882 = vmatprep.subr.bf16.mxu1 %v953_v63 }
  0x3c   :  { %861 = vmatpush3.bf16.msra.mxu0 %v954_v0 }
  0x3d   :  { %883 = vmatpush3.bf16.msra.mxu1 %v955_v1  ;;  %862 = vmatprep.subr.bf16.mxu0 %v956_v2 }
  0x3e   :  { %884 = vmatprep.subr.bf16.mxu1 %v957_v3 }
  0x40   :  { %863 = vmatpush3.bf16.msra.mxu0 %v958_v4 }
  0x41   :  { %885 = vmatpush3.bf16.msra.mxu1 %v959_v5 }
  0x43   :  { %679 = vmatmul.mubr.bf16.vlgmr.msra.gmra.mxu0 %v736_v7 }
  0x44   :  { %719 = vmatmul.mubr.bf16.vlgmr.msra.gmra.mxu1 %v738_v10 }
  0xe3   :  { %v820_v12 = vpop.f32.mrf.mxu0 }
  0xe4   :  { %v842_v13 = vpop.f32.mrf.mxu1 }
  0xe5   :  { %v821_v14 = vpop.f32.mrf.mxu0 }
  0xe6   :  { %v843_v15 = vpop.f32.mrf.mxu1  ;;  %v822_v20 = vadd.f32 %v821_v14, %v820_v12 }
  0xe7   :  { %v823_v16 = vpop.f32.mrf.mxu0  ;;  %v844_v23 = vadd.f32 %v843_v15, %v842_v13 }
  0xe8   :  { %v845_v17 = vpop.f32.mrf.mxu1  ;;  %v601_v22 = vadd.f32 %v822_v20, %v731_v21 }
  0xe9   :  { %v824_v18 = vpop.f32.mrf.mxu0 }
  0xea   :  { %v846_v19 = vpop.f32.mrf.mxu1  ;;  %v641_v28 = vadd.f32 %v844_v23, %v601_v22 }
 0x103   :  { %v864_v24 = vpop.f32.mrf.mxu0 }
 0x104   :  { %v886_v25 = vpop.f32.mrf.mxu1 }
 0x105   :  { %v865_v26 = vpop.f32.mrf.mxu0 }
 0x106   :  { %v887_v27 = vpop.f32.mrf.mxu1  ;;  %v866_v29 = vadd.f32 %v865_v26, %v864_v24 }
 0x107   :  { %v867_v30 = vpop.f32.mrf.mxu0  ;;  %v888_v33 = vadd.f32 %v887_v27, %v886_v25 }
 0x108   :  { %v889_v31 = vpop.f32.mrf.mxu1  ;;  %v681_v32 = vadd.f32 %v866_v29, %v641_v28 }
 0x109   :  { %v868_v34 = vpop.f32.mrf.mxu0 }
 0x10a   :  { %v890_v35 = vpop.f32.mrf.mxu1  ;;  %v721_v36 = vadd.f32 %v888_v33, %v681_v32 }
 0x10c   :  { %726 = vst [vmem:[%s1197_s3] sm:$0xff] %v721_v36 }

// kernel: inception_aux_forward.6
= control target key start
LH: loop header
LB: loop body
LE: loop exit
PB: predicated region body
PF: predicated region fallthrough
CT: control target
= control target key end

     0   :  { %s4133_s12 = smov 0   ;;  %s4135_s13 = smov 0   ;;  %s5051_s0 = inlined_call_operand.vmem [shape: bf16[8,2048], index: 0, kind: input, shape index: {}]   ;;  %s5052_s1 = inlined_call_operand.vmem [shape: bf16[2048,1024], index: 1, kind: input, shape index: {}]   ;;  %s5053_s2 = inlined_call_operand.vmem [shape: f32[1,1024], index: 2, kind: input, shape index: {}]   ;;  %s5054_s3 = inlined_call_operand.vmem [shape: f32[8,1024], index: 3, kind: output, shape index: {}]  }
   0x1   :  { %s4137_s14 = smov 0   ;;  %s4139_s15 = smov 0  }
   0x2   :  { %s4141_s16 = smov 0  }
   0x3 LB: > { %s22_s17 = sadd.s32 1, %s4107_s15  ;;  %p65_p1 = scmp.ne.s32.totalorder %s4099_s13, %s4095_s12  ;;  %s4111_s16 = sphi %s4141_s16, %s13_s16   ;;  %s4107_s15 = sphi %s4139_s15, %s5058_s15   ;;  %s4103_s14 = sphi %s4137_s14, %s5057_s14   ;;  %s4099_s13 = sphi %s4135_s13, %s5056_s13   ;;  %s4095_s12 = sphi %s4133_s12, %s5055_s12  }
   0x4   : > { %p23_p0 = scmp.ge.s32.totalorder %s22_s17, 4  ;;  %p66_p2 = scmp.eq.s32.totalorder %s4111_s16, 0 }
   0x5   : > { %s58_s19 = sadd.s32 1, %s4099_s13  ;;  %p3349_p5 = scmp.ge.s32.totalorder %s4111_s16, 4 }
   0x6   : > { %s5060_s17 = smov (%p23_p0, %s22_s17), 0  ;;  %p67_p3 = por %p66_p2, %p65_p1 }
   0x7   : > { %s55_s18 = ssub.s32 %s4107_s15, %s5060_s17  ;;  %153 = sbr.rel (%p3349_p5) target bundleno = 272 (0x110), region = 20 }
   0x8   : > { %p56_p4 = scmp.eq.s32.totalorder %s55_s18, 0 }
   0xa   : > { %s4168_s20 = scalar_select %p56_p4, %s4099_s13, %s58_s19  }
   0xc   : > { %156 = sbr.rel (!%p67_p3) target bundleno = 272 (0x110), region = 24  ;;  %s158_s21 = sand.u32 (%p67_p3), 1, %s4099_s13  }
   0xd   : > { %s3632_s22 = sshll.u32 (%p67_p3), %s4107_s15, 3  ;;  %s3350_s23 = sshll.u32 (%p67_p3), %s158_s21, 11 }
   0xe   : > { %s4176_s26 = scalar_lea.vmem (%p67_p3), %s5052_s1, %s3632_s22  ;;  %s4181_s27 = scalar_lea.vmem (%p67_p3), [#allocation2], %s3350_s23 }
   0xf   : > { %v702_v0 = vld [vmem:[%s4176_s26] sm:$0xff] (%p67_p3) }
  0x10   : > { %v704_v1 = vld [vmem:[%s4176_s26 + $0x20] sm:$0xff] (%p67_p3)  ;;  %703 = vst [vmem:[%s4181_s27] sm:$0xff] (%p67_p3), %v702_v0 }
  0x11   : > { %v706_v2 = vld [vmem:[%s4176_s26 + $0x40] sm:$0xff]  ;;  %705 = vst [vmem:[%s4181_s27 + $0x8] sm:$0xff] %v704_v1 }
  0x12   : > { %707 = vst [vmem:[%s4181_s27 + $0x10] sm:$0xff] %v706_v2  ;;  %v708_v3 = vld [vmem:[%s4176_s26 + $0x60] sm:$0xff] }
  0x13   : > { %v710_v4 = vld [vmem:[%s4176_s26 + $0x80] sm:$0xff]  ;;  %709 = vst [vmem:[%s4181_s27 + $0x18] sm:$0xff] %v708_v3 }
  0x14   : > { %v712_v5 = vld [vmem:[%s4176_s26 + $0xa0] sm:$0xff]  ;;  %711 = vst [vmem:[%s4181_s27 + $0x20] sm:$0xff] %v710_v4 }
  0x15   : > { %713 = vst [vmem:[%s4181_s27 + $0x28] sm:$0xff] %v712_v5  ;;  %v714_v6 = vld [vmem:[%s4176_s26 + $0xc0] sm:$0xff] }
  0x16   : > { %v716_v7 = vld [vmem:[%s4176_s26 + $0xe0] sm:$0xff]  ;;  %715 = vst [vmem:[%s4181_s27 + $0x30] sm:$0xff] %v714_v6 }
  0x17   : > { %v718_v8 = vld [vmem:[%s4176_s26 + $0x100] sm:$0xff]  ;;  %717 = vst [vmem:[%s4181_s27 + $0x38] sm:$0xff] %v716_v7 }
  0x18   : > { %719 = vst [vmem:[%s4181_s27 + $0x40] sm:$0xff] %v718_v8  ;;  %v720_v9 = vld [vmem:[%s4176_s26 + $0x120] sm:$0xff] }
  0x19   : > { %v722_v10 = vld [vmem:[%s4176_s26 + $0x140] sm:$0xff]  ;;  %721 = vst [vmem:[%s4181_s27 + $0x48] sm:$0xff] %v720_v9 }
  0x1a   : > { %v724_v11 = vld [vmem:[%s4176_s26 + $0x160] sm:$0xff]  ;;  %723 = vst [vmem:[%s4181_s27 + $0x50] sm:$0xff] %v722_v10 }
  0x1b   : > { %725 = vst [vmem:[%s4181_s27 + $0x58] sm:$0xff] %v724_v11  ;;  %v726_v12 = vld [vmem:[%s4176_s26 + $0x180] sm:$0xff] }
  0x1c   : > { %v728_v13 = vld [vmem:[%s4176_s26 + $0x1a0] sm:$0xff]  ;;  %727 = vst [vmem:[%s4181_s27 + $0x60] sm:$0xff] %v726_v12 }
  0x1d   : > { %v730_v14 = vld [vmem:[%s4176_s26 + $0x1c0] sm:$0xff]  ;;  %729 = vst [vmem:[%s4181_s27 + $0x68] sm:$0xff] %v728_v13 }
  0x1e   : > { %731 = vst [vmem:[%s4181_s27 + $0x70] sm:$0xff] %v730_v14  ;;  %v732_v15 = vld [vmem:[%s4176_s26 + $0x1e0] sm:$0xff] }
  0x1f   : > { %v734_v16 = vld [vmem:[%s4176_s26 + $0x200] sm:$0xff]  ;;  %733 = vst [vmem:[%s4181_s27 + $0x78] sm:$0xff] %v732_v15 }
  0x20   : > { %v736_v17 = vld [vmem:[%s4176_s26 + $0x220] sm:$0xff]  ;;  %735 = vst [vmem:[%s4181_s27 + $0x80] sm:$0xff] %v734_v16 }
  0x21   : > { %737 = vst [vmem:[%s4181_s27 + $0x88] sm:$0xff] %v736_v17  ;;  %v738_v18 = vld [vmem:[%s4176_s26 + $0x240] sm:$0xff] }
  0x22   : > { %v740_v19 = vld [vmem:[%s4176_s26 + $0x260] sm:$0xff]  ;;  %739 = vst [vmem:[%s4181_s27 + $0x90] sm:$0xff] %v738_v18 }
  0x23   : > { %v742_v20 = vld [vmem:[%s4176_s26 + $0x280] sm:$0xff]  ;;  %741 = vst [vmem:[%s4181_s27 + $0x98] sm:$0xff] %v740_v19 }
  0x24   : > { %743 = vst [vmem:[%s4181_s27 + $0xa0] sm:$0xff] %v742_v20  ;;  %v744_v21 = vld [vmem:[%s4176_s26 + $0x2a0] sm:$0xff] }
  0x25   : > { %v746_v22 = vld [vmem:[%s4176_s26 + $0x2c0] sm:$0xff]  ;;  %745 = vst [vmem:[%s4181_s27 + $0xa8] sm:$0xff] %v744_v21 }
  0x26   : > { %v748_v23 = vld [vmem:[%s4176_s26 + $0x2e0] sm:$0xff]  ;;  %747 = vst [vmem:[%s4181_s27 + $0xb0] sm:$0xff] %v746_v22 }
  0x27   : > { %749 = vst [vmem:[%s4181_s27 + $0xb8] sm:$0xff] %v748_v23  ;;  %v750_v24 = vld [vmem:[%s4176_s26 + $0x300] sm:$0xff] }
  0x28   : > { %v752_v25 = vld [vmem:[%s4176_s26 + $0x320] sm:$0xff]  ;;  %751 = vst [vmem:[%s4181_s27 + $0xc0] sm:$0xff] %v750_v24 }
  0x29   : > { %v754_v26 = vld [vmem:[%s4176_s26 + $0x340] sm:$0xff]  ;;  %753 = vst [vmem:[%s4181_s27 + $0xc8] sm:$0xff] %v752_v25 }
  0x2a   : > { %755 = vst [vmem:[%s4181_s27 + $0xd0] sm:$0xff] %v754_v26  ;;  %v756_v27 = vld [vmem:[%s4176_s26 + $0x360] sm:$0xff] }
  0x2b   : > { %v758_v28 = vld [vmem:[%s4176_s26 + $0x380] sm:$0xff]  ;;  %757 = vst [vmem:[%s4181_s27 + $0xd8] sm:$0xff] %v756_v27 }
  0x2c   : > { %v760_v29 = vld [vmem:[%s4176_s26 + $0x3a0] sm:$0xff]  ;;  %759 = vst [vmem:[%s4181_s27 + $0xe0] sm:$0xff] %v758_v28 }
  0x2d   : > { %761 = vst [vmem:[%s4181_s27 + $0xe8] sm:$0xff] %v760_v29  ;;  %v762_v30 = vld [vmem:[%s4176_s26 + $0x3c0] sm:$0xff] }
  0x2e   : > { %v764_v31 = vld [vmem:[%s4176_s26 + $0x3e0] sm:$0xff]  ;;  %763 = vst [vmem:[%s4181_s27 + $0xf0] sm:$0xff] %v762_v30 }
  0x2f   : > { %v766_v32 = vld [vmem:[%s4176_s26 + $0x400] sm:$0xff]  ;;  %765 = vst [vmem:[%s4181_s27 + $0xf8] sm:$0xff] %v764_v31 }
  0x30   : > { %767 = vst [vmem:[%s4181_s27 + $0x100] sm:$0xff] %v766_v32  ;;  %v768_v33 = vld [vmem:[%s4176_s26 + $0x420] sm:$0xff] }
  0x31   : > { %v770_v34 = vld [vmem:[%s4176_s26 + $0x440] sm:$0xff]  ;;  %769 = vst [vmem:[%s4181_s27 + $0x108] sm:$0xff] %v768_v33 }
  0x32   : > { %v772_v35 = vld [vmem:[%s4176_s26 + $0x460] sm:$0xff]  ;;  %771 = vst [vmem:[%s4181_s27 + $0x110] sm:$0xff] %v770_v34 }
  0x33   : > { %773 = vst [vmem:[%s4181_s27 + $0x118] sm:$0xff] %v772_v35  ;;  %v774_v36 = vld [vmem:[%s4176_s26 + $0x480] sm:$0xff] }
  0x34   : > { %v776_v37 = vld [vmem:[%s4176_s26 + $0x4a0] sm:$0xff]  ;;  %775 = vst [vmem:[%s4181_s27 + $0x120] sm:$0xff] %v774_v36 }
  0x35   : > { %v778_v38 = vld [vmem:[%s4176_s26 + $0x4c0] sm:$0xff]  ;;  %777 = vst [vmem:[%s4181_s27 + $0x128] sm:$0xff] %v776_v37 }
  0x36   : > { %779 = vst [vmem:[%s4181_s27 + $0x130] sm:$0xff] %v778_v38  ;;  %v780_v39 = vld [vmem:[%s4176_s26 + $0x4e0] sm:$0xff] }
  0x37   : > { %v782_v40 = vld [vmem:[%s4176_s26 + $0x500] sm:$0xff]  ;;  %781 = vst [vmem:[%s4181_s27 + $0x138] sm:$0xff] %v780_v39 }
  0x38   : > { %v784_v41 = vld [vmem:[%s4176_s26 + $0x520] sm:$0xff]  ;;  %783 = vst [vmem:[%s4181_s27 + $0x140] sm:$0xff] %v782_v40 }
  0x39   : > { %785 = vst [vmem:[%s4181_s27 + $0x148] sm:$0xff] %v784_v41  ;;  %v786_v42 = vld [vmem:[%s4176_s26 + $0x540] sm:$0xff] }
  0x3a   : > { %v788_v43 = vld [vmem:[%s4176_s26 + $0x560] sm:$0xff]  ;;  %787 = vst [vmem:[%s4181_s27 + $0x150] sm:$0xff] %v786_v42 }
  0x3b   : > { %v790_v44 = vld [vmem:[%s4176_s26 + $0x580] sm:$0xff]  ;;  %789 = vst [vmem:[%s4181_s27 + $0x158] sm:$0xff] %v788_v43 }
  0x3c   : > { %791 = vst [vmem:[%s4181_s27 + $0x160] sm:$0xff] %v790_v44  ;;  %v792_v45 = vld [vmem:[%s4176_s26 + $0x5a0] sm:$0xff] }
  0x3d   : > { %v794_v46 = vld [vmem:[%s4176_s26 + $0x5c0] sm:$0xff]  ;;  %793 = vst [vmem:[%s4181_s27 + $0x168] sm:$0xff] %v792_v45 }
  0x3e   : > { %v796_v47 = vld [vmem:[%s4176_s26 + $0x5e0] sm:$0xff]  ;;  %795 = vst [vmem:[%s4181_s27 + $0x170] sm:$0xff] %v794_v46 }
  0x3f   : > { %797 = vst [vmem:[%s4181_s27 + $0x178] sm:$0xff] %v796_v47  ;;  %v798_v48 = vld [vmem:[%s4176_s26 + $0x600] sm:$0xff] }
  0x40   : > { %v800_v49 = vld [vmem:[%s4176_s26 + $0x620] sm:$0xff]  ;;  %799 = vst [vmem:[%s4181_s27 + $0x180] sm:$0xff] %v798_v48 }
  0x41   : > { %v802_v50 = vld [vmem:[%s4176_s26 + $0x640] sm:$0xff]  ;;  %801 = vst [vmem:[%s4181_s27 + $0x188] sm:$0xff] %v800_v49 }
  0x42   : > { %803 = vst [vmem:[%s4181_s27 + $0x190] sm:$0xff] %v802_v50  ;;  %v804_v51 = vld [vmem:[%s4176_s26 + $0x660] sm:$0xff] }
  0x43   : > { %v806_v52 = vld [vmem:[%s4176_s26 + $0x680] sm:$0xff]  ;;  %805 = vst [vmem:[%s4181_s27 + $0x198] sm:$0xff] %v804_v51 }
  0x44   : > { %v808_v53 = vld [vmem:[%s4176_s26 + $0x6a0] sm:$0xff]  ;;  %807 = vst [vmem:[%s4181_s27 + $0x1a0] sm:$0xff] %v806_v52 }
  0x45   : > { %809 = vst [vmem:[%s4181_s27 + $0x1a8] sm:$0xff] %v808_v53  ;;  %v810_v54 = vld [vmem:[%s4176_s26 + $0x6c0] sm:$0xff] }
  0x46   : > { %v812_v55 = vld [vmem:[%s4176_s26 + $0x6e0] sm:$0xff]  ;;  %811 = vst [vmem:[%s4181_s27 + $0x1b0] sm:$0xff] %v810_v54 }
  0x47   : > { %v814_v56 = vld [vmem:[%s4176_s26 + $0x700] sm:$0xff]  ;;  %813 = vst [vmem:[%s4181_s27 + $0x1b8] sm:$0xff] %v812_v55 }
  0x48   : > { %815 = vst [vmem:[%s4181_s27 + $0x1c0] sm:$0xff] %v814_v56  ;;  %v816_v57 = vld [vmem:[%s4176_s26 + $0x720] sm:$0xff] }
  0x49   : > { %v818_v58 = vld [vmem:[%s4176_s26 + $0x740] sm:$0xff]  ;;  %817 = vst [vmem:[%s4181_s27 + $0x1c8] sm:$0xff] %v816_v57 }
  0x4a   : > { %v820_v59 = vld [vmem:[%s4176_s26 + $0x760] sm:$0xff]  ;;  %819 = vst [vmem:[%s4181_s27 + $0x1d0] sm:$0xff] %v818_v58 }
  0x4b   : > { %821 = vst [vmem:[%s4181_s27 + $0x1d8] sm:$0xff] %v820_v59  ;;  %v822_v60 = vld [vmem:[%s4176_s26 + $0x780] sm:$0xff] }
  0x4c   : > { %v824_v61 = vld [vmem:[%s4176_s26 + $0x7a0] sm:$0xff]  ;;  %823 = vst [vmem:[%s4181_s27 + $0x1e0] sm:$0xff] %v822_v60 }
  0x4d   : > { %v826_v62 = vld [vmem:[%s4176_s26 + $0x7c0] sm:$0xff]  ;;  %825 = vst [vmem:[%s4181_s27 + $0x1e8] sm:$0xff] %v824_v61 }
  0x4e   : > { %827 = vst [vmem:[%s4181_s27 + $0x1f0] sm:$0xff] %v826_v62  ;;  %v828_v63 = vld [vmem:[%s4176_s26 + $0x7e0] sm:$0xff] }
  0x4f   : > { %v830_v0 = vld [vmem:[%s4176_s26 + $0x800] sm:$0xff]  ;;  %829 = vst [vmem:[%s4181_s27 + $0x1f8] sm:$0xff] %v828_v63 }
  0x50   : > { %v832_v1 = vld [vmem:[%s4176_s26 + $0x820] sm:$0xff]  ;;  %831 = vst [vmem:[%s4181_s27 + $0x200] sm:$0xff] %v830_v0 }
  0x51   : > { %833 = vst [vmem:[%s4181_s27 + $0x208] sm:$0xff] %v832_v1  ;;  %v834_v2 = vld [vmem:[%s4176_s26 + $0x840] sm:$0xff] }
  0x52   : > { %v836_v3 = vld [vmem:[%s4176_s26 + $0x860] sm:$0xff]  ;;  %835 = vst [vmem:[%s4181_s27 + $0x210] sm:$0xff] %v834_v2 }
  0x53   : > { %v838_v4 = vld [vmem:[%s4176_s26 + $0x880] sm:$0xff]  ;;  %837 = vst [vmem:[%s4181_s27 + $0x218] sm:$0xff] %v836_v3 }
  0x54   : > { %839 = vst [vmem:[%s4181_s27 + $0x220] sm:$0xff] %v838_v4  ;;  %v840_v5 = vld [vmem:[%s4176_s26 + $0x8a0] sm:$0xff] }
  0x55   : > { %v842_v6 = vld [vmem:[%s4176_s26 + $0x8c0] sm:$0xff]  ;;  %841 = vst [vmem:[%s4181_s27 + $0x228] sm:$0xff] %v840_v5 }
  0x56   : > { %v844_v7 = vld [vmem:[%s4176_s26 + $0x8e0] sm:$0xff]  ;;  %843 = vst [vmem:[%s4181_s27 + $0x230] sm:$0xff] %v842_v6 }
  0x57   : > { %845 = vst [vmem:[%s4181_s27 + $0x238] sm:$0xff] %v844_v7  ;;  %v846_v8 = vld [vmem:[%s4176_s26 + $0x900] sm:$0xff] }
  0x58   : > { %v848_v9 = vld [vmem:[%s4176_s26 + $0x920] sm:$0xff]  ;;  %847 = vst [vmem:[%s4181_s27 + $0x240] sm:$0xff] %v846_v8 }
  0x59   : > { %v850_v10 = vld [vmem:[%s4176_s26 + $0x940] sm:$0xff]  ;;  %849 = vst [vmem:[%s4181_s27 + $0x248] sm:$0xff] %v848_v9 }
  0x5a   : > { %851 = vst [vmem:[%s4181_s27 + $0x250] sm:$0xff] %v850_v10  ;;  %v852_v11 = vld [vmem:[%s4176_s26 + $0x960] sm:$0xff] }
  0x5b   : > { %v854_v12 = vld [vmem:[%s4176_s26 + $0x980] sm:$0xff]  ;;  %853 = vst [vmem:[%s4181_s27 + $0x258] sm:$0xff] %v852_v11 }
  0x5c   : > { %v856_v13 = vld [vmem:[%s4176_s26 + $0x9a0] sm:$0xff]  ;;  %855 = vst [vmem:[%s4181_s27 + $0x260] sm:$0xff] %v854_v12 }
  0x5d   : > { %857 = vst [vmem:[%s4181_s27 + $0x268] sm:$0xff] %v856_v13  ;;  %v858_v14 = vld [vmem:[%s4176_s26 + $0x9c0] sm:$0xff] }
  0x5e   : > { %v860_v15 = vld [vmem:[%s4176_s26 + $0x9e0] sm:$0xff]  ;;  %859 = vst [vmem:[%s4181_s27 + $0x270] sm:$0xff] %v858_v14 }
  0x5f   : > { %v862_v16 = vld [vmem:[%s4176_s26 + $0xa00] sm:$0xff]  ;;  %861 = vst [vmem:[%s4181_s27 + $0x278] sm:$0xff] %v860_v15 }
  0x60   : > { %863 = vst [vmem:[%s4181_s27 + $0x280] sm:$0xff] %v862_v16  ;;  %v864_v17 = vld [vmem:[%s4176_s26 + $0xa20] sm:$0xff] }
  0x61   : > { %v866_v18 = vld [vmem:[%s4176_s26 + $0xa40] sm:$0xff]  ;;  %865 = vst [vmem:[%s4181_s27 + $0x288] sm:$0xff] %v864_v17 }
  0x62   : > { %v868_v19 = vld [vmem:[%s4176_s26 + $0xa60] sm:$0xff]  ;;  %867 = vst [vmem:[%s4181_s27 + $0x290] sm:$0xff] %v866_v18 }
  0x63   : > { %869 = vst [vmem:[%s4181_s27 + $0x298] sm:$0xff] %v868_v19  ;;  %v870_v20 = vld [vmem:[%s4176_s26 + $0xa80] sm:$0xff] }
  0x64   : > { %v872_v21 = vld [vmem:[%s4176_s26 + $0xaa0] sm:$0xff]  ;;  %871 = vst [vmem:[%s4181_s27 + $0x2a0] sm:$0xff] %v870_v20 }
  0x65   : > { %v874_v22 = vld [vmem:[%s4176_s26 + $0xac0] sm:$0xff]  ;;  %873 = vst [vmem:[%s4181_s27 + $0x2a8] sm:$0xff] %v872_v21 }
  0x66   : > { %875 = vst [vmem:[%s4181_s27 + $0x2b0] sm:$0xff] %v874_v22  ;;  %v876_v23 = vld [vmem:[%s4176_s26 + $0xae0] sm:$0xff] }
  0x67   : > { %v878_v24 = vld [vmem:[%s4176_s26 + $0xb00] sm:$0xff]  ;;  %877 = vst [vmem:[%s4181_s27 + $0x2b8] sm:$0xff] %v876_v23 }
  0x68   : > { %v880_v25 = vld [vmem:[%s4176_s26 + $0xb20] sm:$0xff]  ;;  %879 = vst [vmem:[%s4181_s27 + $0x2c0] sm:$0xff] %v878_v24 }
  0x69   : > { %881 = vst [vmem:[%s4181_s27 + $0x2c8] sm:$0xff] %v880_v25  ;;  %v882_v26 = vld [vmem:[%s4176_s26 + $0xb40] sm:$0xff] }
  0x6a   : > { %v884_v27 = vld [vmem:[%s4176_s26 + $0xb60] sm:$0xff]  ;;  %883 = vst [vmem:[%s4181_s27 + $0x2d0] sm:$0xff] %v882_v26 }
  0x6b   : > { %v886_v28 = vld [vmem:[%s4176_s26 + $0xb80] sm:$0xff]  ;;  %885 = vst [vmem:[%s4181_s27 + $0x2d8] sm:$0xff] %v884_v27 }
  0x6c   : > { %887 = vst [vmem:[%s4181_s27 + $0x2e0] sm:$0xff] %v886_v28  ;;  %v888_v29 = vld [vmem:[%s4176_s26 + $0xba0] sm:$0xff] }
  0x6d   : > { %v890_v30 = vld [vmem:[%s4176_s26 + $0xbc0] sm:$0xff]  ;;  %889 = vst [vmem:[%s4181_s27 + $0x2e8] sm:$0xff] %v888_v29 }
  0x6e   : > { %v892_v31 = vld [vmem:[%s4176_s26 + $0xbe0] sm:$0xff]  ;;  %891 = vst [vmem:[%s4181_s27 + $0x2f0] sm:$0xff] %v890_v30 }
  0x6f   : > { %893 = vst [vmem:[%s4181_s27 + $0x2f8] sm:$0xff] %v892_v31  ;;  %v894_v32 = vld [vmem:[%s4176_s26 + $0xc00] sm:$0xff] }
  0x70   : > { %v896_v33 = vld [vmem:[%s4176_s26 + $0xc20] sm:$0xff]  ;;  %895 = vst [vmem:[%s4181_s27 + $0x300] sm:$0xff] %v894_v32 }
  0x71   : > { %v898_v34 = vld [vmem:[%s4176_s26 + $0xc40] sm:$0xff]  ;;  %897 = vst [vmem:[%s4181_s27 + $0x308] sm:$0xff] %v896_v33 }
  0x72   : > { %899 = vst [vmem:[%s4181_s27 + $0x310] sm:$0xff] %v898_v34  ;;  %v900_v35 = vld [vmem:[%s4176_s26 + $0xc60] sm:$0xff] }
  0x73   : > { %v902_v36 = vld [vmem:[%s4176_s26 + $0xc80] sm:$0xff]  ;;  %901 = vst [vmem:[%s4181_s27 + $0x318] sm:$0xff] %v900_v35 }
  0x74   : > { %v904_v37 = vld [vmem:[%s4176_s26 + $0xca0] sm:$0xff]  ;;  %903 = vst [vmem:[%s4181_s27 + $0x320] sm:$0xff] %v902_v36 }
  0x75   : > { %905 = vst [vmem:[%s4181_s27 + $0x328] sm:$0xff] %v904_v37  ;;  %v906_v38 = vld [vmem:[%s4176_s26 + $0xcc0] sm:$0xff] }
  0x76   : > { %v908_v39 = vld [vmem:[%s4176_s26 + $0xce0] sm:$0xff]  ;;  %907 = vst [vmem:[%s4181_s27 + $0x330] sm:$0xff] %v906_v38 }
  0x77   : > { %v910_v40 = vld [vmem:[%s4176_s26 + $0xd00] sm:$0xff]  ;;  %909 = vst [vmem:[%s4181_s27 + $0x338] sm:$0xff] %v908_v39 }
  0x78   : > { %911 = vst [vmem:[%s4181_s27 + $0x340] sm:$0xff] %v910_v40  ;;  %v912_v41 = vld [vmem:[%s4176_s26 + $0xd20] sm:$0xff] }
  0x79   : > { %v914_v42 = vld [vmem:[%s4176_s26 + $0xd40] sm:$0xff]  ;;  %913 = vst [vmem:[%s4181_s27 + $0x348] sm:$0xff] %v912_v41 }
  0x7a   : > { %v916_v43 = vld [vmem:[%s4176_s26 + $0xd60] sm:$0xff]  ;;  %915 = vst [vmem:[%s4181_s27 + $0x350] sm:$0xff] %v914_v42 }
  0x7b   : > { %917 = vst [vmem:[%s4181_s27 + $0x358] sm:$0xff] %v916_v43  ;;  %v918_v44 = vld [vmem:[%s4176_s26 + $0xd80] sm:$0xff] }
  0x7c   : > { %v920_v45 = vld [vmem:[%s4176_s26 + $0xda0] sm:$0xff]  ;;  %919 = vst [vmem:[%s4181_s27 + $0x360] sm:$0xff] %v918_v44 }
  0x7d   : > { %v922_v46 = vld [vmem:[%s4176_s26 + $0xdc0] sm:$0xff]  ;;  %921 = vst [vmem:[%s4181_s27 + $0x368] sm:$0xff] %v920_v45 }
  0x7e   : > { %923 = vst [vmem:[%s4181_s27 + $0x370] sm:$0xff] %v922_v46  ;;  %v924_v47 = vld [vmem:[%s4176_s26 + $0xde0] sm:$0xff] }
  0x7f   : > { %v926_v48 = vld [vmem:[%s4176_s26 + $0xe00] sm:$0xff]  ;;  %925 = vst [vmem:[%s4181_s27 + $0x378] sm:$0xff] %v924_v47 }
  0x80   : > { %v928_v49 = vld [vmem:[%s4176_s26 + $0xe20] sm:$0xff]  ;;  %927 = vst [vmem:[%s4181_s27 + $0x380] sm:$0xff] %v926_v48 }
  0x81   : > { %929 = vst [vmem:[%s4181_s27 + $0x388] sm:$0xff] %v928_v49  ;;  %v930_v50 = vld [vmem:[%s4176_s26 + $0xe40] sm:$0xff] }
  0x82   : > { %v932_v51 = vld [vmem:[%s4176_s26 + $0xe60] sm:$0xff]  ;;  %931 = vst [vmem:[%s4181_s27 + $0x390] sm:$0xff] %v930_v50 }
  0x83   : > { %v934_v52 = vld [vmem:[%s4176_s26 + $0xe80] sm:$0xff]  ;;  %933 = vst [vmem:[%s4181_s27 + $0x398] sm:$0xff] %v932_v51 }
  0x84   : > { %935 = vst [vmem:[%s4181_s27 + $0x3a0] sm:$0xff] %v934_v52  ;;  %v936_v53 = vld [vmem:[%s4176_s26 + $0xea0] sm:$0xff] }
  0x85   : > { %v938_v54 = vld [vmem:[%s4176_s26 + $0xec0] sm:$0xff]  ;;  %937 = vst [vmem:[%s4181_s27 + $0x3a8] sm:$0xff] %v936_v53 }
  0x86   : > { %v940_v55 = vld [vmem:[%s4176_s26 + $0xee0] sm:$0xff]  ;;  %939 = vst [vmem:[%s4181_s27 + $0x3b0] sm:$0xff] %v938_v54 }
  0x87   : > { %941 = vst [vmem:[%s4181_s27 + $0x3b8] sm:$0xff] %v940_v55  ;;  %v942_v56 = vld [vmem:[%s4176_s26 + $0xf00] sm:$0xff] }
  0x88   : > { %v944_v57 = vld [vmem:[%s4176_s26 + $0xf20] sm:$0xff]  ;;  %943 = vst [vmem:[%s4181_s27 + $0x3c0] sm:$0xff] %v942_v56 }
  0x89   : > { %v946_v58 = vld [vmem:[%s4176_s26 + $0xf40] sm:$0xff]  ;;  %945 = vst [vmem:[%s4181_s27 + $0x3c8] sm:$0xff] %v944_v57 }
  0x8a   : > { %947 = vst [vmem:[%s4181_s27 + $0x3d0] sm:$0xff] %v946_v58  ;;  %v948_v59 = vld [vmem:[%s4176_s26 + $0xf60] sm:$0xff] }
  0x8b   : > { %v950_v60 = vld [vmem:[%s4176_s26 + $0xf80] sm:$0xff]  ;;  %949 = vst [vmem:[%s4181_s27 + $0x3d8] sm:$0xff] %v948_v59 }
  0x8c   : > { %v952_v61 = vld [vmem:[%s4176_s26 + $0xfa0] sm:$0xff]  ;;  %951 = vst [vmem:[%s4181_s27 + $0x3e0] sm:$0xff] %v950_v60 }
  0x8d   : > { %953 = vst [vmem:[%s4181_s27 + $0x3e8] sm:$0xff] %v952_v61  ;;  %v954_v62 = vld [vmem:[%s4176_s26 + $0xfc0] sm:$0xff] }
  0x8e   : > { %v956_v63 = vld [vmem:[%s4176_s26 + $0xfe0] sm:$0xff]  ;;  %955 = vst [vmem:[%s4181_s27 + $0x3f0] sm:$0xff] %v954_v62 }
  0x8f   : > { %v958_v0 = vld [vmem:[%s4176_s26 + $0x1000] sm:$0xff]  ;;  %957 = vst [vmem:[%s4181_s27 + $0x3f8] sm:$0xff] %v956_v63 }
  0x90   : > { %959 = vst [vmem:[%s4181_s27 + $0x400] sm:$0xff] %v958_v0  ;;  %v960_v1 = vld [vmem:[%s4176_s26 + $0x1020] sm:$0xff] }
  0x91   : > { %v962_v2 = vld [vmem:[%s4176_s26 + $0x1040] sm:$0xff]  ;;  %961 = vst [vmem:[%s4181_s27 + $0x408] sm:$0xff] %v960_v1 }
  0x92   : > { %v964_v3 = vld [vmem:[%s4176_s26 + $0x1060] sm:$0xff]  ;;  %963 = vst [vmem:[%s4181_s27 + $0x410] sm:$0xff] %v962_v2 }
  0x93   : > { %965 = vst [vmem:[%s4181_s27 + $0x418] sm:$0xff] %v964_v3  ;;  %v966_v4 = vld [vmem:[%s4176_s26 + $0x1080] sm:$0xff] }
  0x94   : > { %v968_v5 = vld [vmem:[%s4176_s26 + $0x10a0] sm:$0xff]  ;;  %967 = vst [vmem:[%s4181_s27 + $0x420] sm:$0xff] %v966_v4 }
  0x95   : > { %v970_v6 = vld [vmem:[%s4176_s26 + $0x10c0] sm:$0xff]  ;;  %969 = vst [vmem:[%s4181_s27 + $0x428] sm:$0xff] %v968_v5 }
  0x96   : > { %971 = vst [vmem:[%s4181_s27 + $0x430] sm:$0xff] %v970_v6  ;;  %v972_v7 = vld [vmem:[%s4176_s26 + $0x10e0] sm:$0xff] }
  0x97   : > { %v974_v8 = vld [vmem:[%s4176_s26 + $0x1100] sm:$0xff]  ;;  %973 = vst [vmem:[%s4181_s27 + $0x438] sm:$0xff] %v972_v7 }
  0x98   : > { %v976_v9 = vld [vmem:[%s4176_s26 + $0x1120] sm:$0xff]  ;;  %975 = vst [vmem:[%s4181_s27 + $0x440] sm:$0xff] %v974_v8 }
  0x99   : > { %977 = vst [vmem:[%s4181_s27 + $0x448] sm:$0xff] %v976_v9  ;;  %v978_v10 = vld [vmem:[%s4176_s26 + $0x1140] sm:$0xff] }
  0x9a   : > { %v980_v11 = vld [vmem:[%s4176_s26 + $0x1160] sm:$0xff]  ;;  %979 = vst [vmem:[%s4181_s27 + $0x450] sm:$0xff] %v978_v10 }
  0x9b   : > { %v982_v12 = vld [vmem:[%s4176_s26 + $0x1180] sm:$0xff]  ;;  %981 = vst [vmem:[%s4181_s27 + $0x458] sm:$0xff] %v980_v11 }
  0x9c   : > { %983 = vst [vmem:[%s4181_s27 + $0x460] sm:$0xff] %v982_v12  ;;  %v984_v13 = vld [vmem:[%s4176_s26 + $0x11a0] sm:$0xff] }
  0x9d   : > { %v986_v14 = vld [vmem:[%s4176_s26 + $0x11c0] sm:$0xff]  ;;  %985 = vst [vmem:[%s4181_s27 + $0x468] sm:$0xff] %v984_v13 }
  0x9e   : > { %v988_v15 = vld [vmem:[%s4176_s26 + $0x11e0] sm:$0xff]  ;;  %987 = vst [vmem:[%s4181_s27 + $0x470] sm:$0xff] %v986_v14 }
  0x9f   : > { %989 = vst [vmem:[%s4181_s27 + $0x478] sm:$0xff] %v988_v15  ;;  %v990_v16 = vld [vmem:[%s4176_s26 + $0x1200] sm:$0xff] }
  0xa0   : > { %v992_v17 = vld [vmem:[%s4176_s26 + $0x1220] sm:$0xff]  ;;  %991 = vst [vmem:[%s4181_s27 + $0x480] sm:$0xff] %v990_v16 }
  0xa1   : > { %v994_v18 = vld [vmem:[%s4176_s26 + $0x1240] sm:$0xff]  ;;  %993 = vst [vmem:[%s4181_s27 + $0x488] sm:$0xff] %v992_v17 }
  0xa2   : > { %995 = vst [vmem:[%s4181_s27 + $0x490] sm:$0xff] %v994_v18  ;;  %v996_v19 = vld [vmem:[%s4176_s26 + $0x1260] sm:$0xff] }
  0xa3   : > { %v998_v20 = vld [vmem:[%s4176_s26 + $0x1280] sm:$0xff]  ;;  %997 = vst [vmem:[%s4181_s27 + $0x498] sm:$0xff] %v996_v19 }
  0xa4   : > { %v1000_v21 = vld [vmem:[%s4176_s26 + $0x12a0] sm:$0xff]  ;;  %999 = vst [vmem:[%s4181_s27 + $0x4a0] sm:$0xff] %v998_v20 }
  0xa5   : > { %1001 = vst [vmem:[%s4181_s27 + $0x4a8] sm:$0xff] %v1000_v21  ;;  %v1002_v22 = vld [vmem:[%s4176_s26 + $0x12c0] sm:$0xff] }
  0xa6   : > { %v1004_v23 = vld [vmem:[%s4176_s26 + $0x12e0] sm:$0xff]  ;;  %1003 = vst [vmem:[%s4181_s27 + $0x4b0] sm:$0xff] %v1002_v22 }
  0xa7   : > { %v1006_v24 = vld [vmem:[%s4176_s26 + $0x1300] sm:$0xff]  ;;  %1005 = vst [vmem:[%s4181_s27 + $0x4b8] sm:$0xff] %v1004_v23 }
  0xa8   : > { %1007 = vst [vmem:[%s4181_s27 + $0x4c0] sm:$0xff] %v1006_v24  ;;  %v1008_v25 = vld [vmem:[%s4176_s26 + $0x1320] sm:$0xff] }
  0xa9   : > { %v1010_v26 = vld [vmem:[%s4176_s26 + $0x1340] sm:$0xff]  ;;  %1009 = vst [vmem:[%s4181_s27 + $0x4c8] sm:$0xff] %v1008_v25 }
  0xaa   : > { %v1012_v27 = vld [vmem:[%s4176_s26 + $0x1360] sm:$0xff]  ;;  %1011 = vst [vmem:[%s4181_s27 + $0x4d0] sm:$0xff] %v1010_v26 }
  0xab   : > { %1013 = vst [vmem:[%s4181_s27 + $0x4d8] sm:$0xff] %v1012_v27  ;;  %v1014_v28 = vld [vmem:[%s4176_s26 + $0x1380] sm:$0xff] }
  0xac   : > { %v1016_v29 = vld [vmem:[%s4176_s26 + $0x13a0] sm:$0xff]  ;;  %1015 = vst [vmem:[%s4181_s27 + $0x4e0] sm:$0xff] %v1014_v28 }
  0xad   : > { %v1018_v30 = vld [vmem:[%s4176_s26 + $0x13c0] sm:$0xff]  ;;  %1017 = vst [vmem:[%s4181_s27 + $0x4e8] sm:$0xff] %v1016_v29 }
  0xae   : > { %1019 = vst [vmem:[%s4181_s27 + $0x4f0] sm:$0xff] %v1018_v30  ;;  %v1020_v31 = vld [vmem:[%s4176_s26 + $0x13e0] sm:$0xff] }
  0xaf   : > { %v1022_v32 = vld [vmem:[%s4176_s26 + $0x1400] sm:$0xff]  ;;  %1021 = vst [vmem:[%s4181_s27 + $0x4f8] sm:$0xff] %v1020_v31 }
  0xb0   : > { %v1024_v33 = vld [vmem:[%s4176_s26 + $0x1420] sm:$0xff]  ;;  %1023 = vst [vmem:[%s4181_s27 + $0x500] sm:$0xff] %v1022_v32 }
  0xb1   : > { %1025 = vst [vmem:[%s4181_s27 + $0x508] sm:$0xff] %v1024_v33  ;;  %v1026_v34 = vld [vmem:[%s4176_s26 + $0x1440] sm:$0xff] }
  0xb2   : > { %v1028_v35 = vld [vmem:[%s4176_s26 + $0x1460] sm:$0xff]  ;;  %1027 = vst [vmem:[%s4181_s27 + $0x510] sm:$0xff] %v1026_v34 }
  0xb3   : > { %v1030_v36 = vld [vmem:[%s4176_s26 + $0x1480] sm:$0xff]  ;;  %1029 = vst [vmem:[%s4181_s27 + $0x518] sm:$0xff] %v1028_v35 }
  0xb4   : > { %1031 = vst [vmem:[%s4181_s27 + $0x520] sm:$0xff] %v1030_v36  ;;  %v1032_v37 = vld [vmem:[%s4176_s26 + $0x14a0] sm:$0xff] }
  0xb5   : > { %v1034_v38 = vld [vmem:[%s4176_s26 + $0x14c0] sm:$0xff]  ;;  %1033 = vst [vmem:[%s4181_s27 + $0x528] sm:$0xff] %v1032_v37 }
  0xb6   : > { %v1036_v39 = vld [vmem:[%s4176_s26 + $0x14e0] sm:$0xff]  ;;  %1035 = vst [vmem:[%s4181_s27 + $0x530] sm:$0xff] %v1034_v38 }
  0xb7   : > { %1037 = vst [vmem:[%s4181_s27 + $0x538] sm:$0xff] %v1036_v39  ;;  %v1038_v40 = vld [vmem:[%s4176_s26 + $0x1500] sm:$0xff] }
  0xb8   : > { %v1040_v41 = vld [vmem:[%s4176_s26 + $0x1520] sm:$0xff]  ;;  %1039 = vst [vmem:[%s4181_s27 + $0x540] sm:$0xff] %v1038_v40 }
  0xb9   : > { %v1042_v42 = vld [vmem:[%s4176_s26 + $0x1540] sm:$0xff]  ;;  %1041 = vst [vmem:[%s4181_s27 + $0x548] sm:$0xff] %v1040_v41 }
  0xba   : > { %1043 = vst [vmem:[%s4181_s27 + $0x550] sm:$0xff] %v1042_v42  ;;  %v1044_v43 = vld [vmem:[%s4176_s26 + $0x1560] sm:$0xff] }
  0xbb   : > { %v1046_v44 = vld [vmem:[%s4176_s26 + $0x1580] sm:$0xff]  ;;  %1045 = vst [vmem:[%s4181_s27 + $0x558] sm:$0xff] %v1044_v43 }
  0xbc   : > { %v1048_v45 = vld [vmem:[%s4176_s26 + $0x15a0] sm:$0xff]  ;;  %1047 = vst [vmem:[%s4181_s27 + $0x560] sm:$0xff] %v1046_v44 }
  0xbd   : > { %1049 = vst [vmem:[%s4181_s27 + $0x568] sm:$0xff] %v1048_v45  ;;  %v1050_v46 = vld [vmem:[%s4176_s26 + $0x15c0] sm:$0xff] }
  0xbe   : > { %v1052_v47 = vld [vmem:[%s4176_s26 + $0x15e0] sm:$0xff]  ;;  %1051 = vst [vmem:[%s4181_s27 + $0x570] sm:$0xff] %v1050_v46 }
  0xbf   : > { %v1054_v48 = vld [vmem:[%s4176_s26 + $0x1600] sm:$0xff]  ;;  %1053 = vst [vmem:[%s4181_s27 + $0x578] sm:$0xff] %v1052_v47 }
  0xc0   : > { %1055 = vst [vmem:[%s4181_s27 + $0x580] sm:$0xff] %v1054_v48  ;;  %v1056_v49 = vld [vmem:[%s4176_s26 + $0x1620] sm:$0xff] }
  0xc1   : > { %v1058_v50 = vld [vmem:[%s4176_s26 + $0x1640] sm:$0xff]  ;;  %1057 = vst [vmem:[%s4181_s27 + $0x588] sm:$0xff] %v1056_v49 }
  0xc2   : > { %v1060_v51 = vld [vmem:[%s4176_s26 + $0x1660] sm:$0xff]  ;;  %1059 = vst [vmem:[%s4181_s27 + $0x590] sm:$0xff] %v1058_v50 }
  0xc3   : > { %1061 = vst [vmem:[%s4181_s27 + $0x598] sm:$0xff] %v1060_v51  ;;  %v1062_v52 = vld [vmem:[%s4176_s26 + $0x1680] sm:$0xff] }
  0xc4   : > { %v1064_v53 = vld [vmem:[%s4176_s26 + $0x16a0] sm:$0xff]  ;;  %1063 = vst [vmem:[%s4181_s27 + $0x5a0] sm:$0xff] %v1062_v52 }
  0xc5   : > { %v1066_v54 = vld [vmem:[%s4176_s26 + $0x16c0] sm:$0xff]  ;;  %1065 = vst [vmem:[%s4181_s27 + $0x5a8] sm:$0xff] %v1064_v53 }
  0xc6   : > { %1067 = vst [vmem:[%s4181_s27 + $0x5b0] sm:$0xff] %v1066_v54  ;;  %v1068_v55 = vld [vmem:[%s4176_s26 + $0x16e0] sm:$0xff] }
  0xc7   : > { %v1070_v56 = vld [vmem:[%s4176_s26 + $0x1700] sm:$0xff]  ;;  %1069 = vst [vmem:[%s4181_s27 + $0x5b8] sm:$0xff] %v1068_v55 }
  0xc8   : > { %v1072_v57 = vld [vmem:[%s4176_s26 + $0x1720] sm:$0xff]  ;;  %1071 = vst [vmem:[%s4181_s27 + $0x5c0] sm:$0xff] %v1070_v56 }
  0xc9   : > { %1073 = vst [vmem:[%s4181_s27 + $0x5c8] sm:$0xff] %v1072_v57  ;;  %v1074_v58 = vld [vmem:[%s4176_s26 + $0x1740] sm:$0xff] }
  0xca   : > { %v1076_v59 = vld [vmem:[%s4176_s26 + $0x1760] sm:$0xff]  ;;  %1075 = vst [vmem:[%s4181_s27 + $0x5d0] sm:$0xff] %v1074_v58 }
  0xcb   : > { %v1078_v60 = vld [vmem:[%s4176_s26 + $0x1780] sm:$0xff]  ;;  %1077 = vst [vmem:[%s4181_s27 + $0x5d8] sm:$0xff] %v1076_v59 }
  0xcc   : > { %1079 = vst [vmem:[%s4181_s27 + $0x5e0] sm:$0xff] %v1078_v60  ;;  %v1080_v61 = vld [vmem:[%s4176_s26 + $0x17a0] sm:$0xff] }
  0xcd   : > { %v1082_v62 = vld [vmem:[%s4176_s26 + $0x17c0] sm:$0xff]  ;;  %1081 = vst [vmem:[%s4181_s27 + $0x5e8] sm:$0xff] %v1080_v61 }
  0xce   : > { %v1084_v63 = vld [vmem:[%s4176_s26 + $0x17e0] sm:$0xff]  ;;  %1083 = vst [vmem:[%s4181_s27 + $0x5f0] sm:$0xff] %v1082_v62 }
  0xcf   : > { %1085 = vst [vmem:[%s4181_s27 + $0x5f8] sm:$0xff] %v1084_v63  ;;  %v1086_v0 = vld [vmem:[%s4176_s26 + $0x1800] sm:$0xff] }
  0xd0   : > { %v1088_v1 = vld [vmem:[%s4176_s26 + $0x1820] sm:$0xff]  ;;  %1087 = vst [vmem:[%s4181_s27 + $0x600] sm:$0xff] %v1086_v0 }
  0xd1   : > { %v1090_v2 = vld [vmem:[%s4176_s26 + $0x1840] sm:$0xff]  ;;  %1089 = vst [vmem:[%s4181_s27 + $0x608] sm:$0xff] %v1088_v1 }
  0xd2   : > { %1091 = vst [vmem:[%s4181_s27 + $0x610] sm:$0xff] %v1090_v2  ;;  %v1092_v3 = vld [vmem:[%s4176_s26 + $0x1860] sm:$0xff] }
  0xd3   : > { %v1094_v4 = vld [vmem:[%s4176_s26 + $0x1880] sm:$0xff]  ;;  %1093 = vst [vmem:[%s4181_s27 + $0x618] sm:$0xff] %v1092_v3 }
  0xd4   : > { %v1096_v5 = vld [vmem:[%s4176_s26 + $0x18a0] sm:$0xff]  ;;  %1095 = vst [vmem:[%s4181_s27 + $0x620] sm:$0xff] %v1094_v4 }
  0xd5   : > { %1097 = vst [vmem:[%s4181_s27 + $0x628] sm:$0xff] %v1096_v5  ;;  %v1098_v6 = vld [vmem:[%s4176_s26 + $0x18c0] sm:$0xff] }
  0xd6   : > { %v1100_v7 = vld [vmem:[%s4176_s26 + $0x18e0] sm:$0xff]  ;;  %1099 = vst [vmem:[%s4181_s27 + $0x630] sm:$0xff] %v1098_v6 }
  0xd7   : > { %v1102_v8 = vld [vmem:[%s4176_s26 + $0x1900] sm:$0xff]  ;;  %1101 = vst [vmem:[%s4181_s27 + $0x638] sm:$0xff] %v1100_v7 }
  0xd8   : > { %1103 = vst [vmem:[%s4181_s27 + $0x640] sm:$0xff] %v1102_v8  ;;  %v1104_v9 = vld [vmem:[%s4176_s26 + $0x1920] sm:$0xff] }
  0xd9   : > { %v1106_v10 = vld [vmem:[%s4176_s26 + $0x1940] sm:$0xff]  ;;  %1105 = vst [vmem:[%s4181_s27 + $0x648] sm:$0xff] %v1104_v9 }
  0xda   : > { %v1108_v11 = vld [vmem:[%s4176_s26 + $0x1960] sm:$0xff]  ;;  %1107 = vst [vmem:[%s4181_s27 + $0x650] sm:$0xff] %v1106_v10 }
  0xdb   : > { %1109 = vst [vmem:[%s4181_s27 + $0x658] sm:$0xff] %v1108_v11  ;;  %v1110_v12 = vld [vmem:[%s4176_s26 + $0x1980] sm:$0xff] }
  0xdc   : > { %v1112_v13 = vld [vmem:[%s4176_s26 + $0x19a0] sm:$0xff]  ;;  %1111 = vst [vmem:[%s4181_s27 + $0x660] sm:$0xff] %v1110_v12 }
  0xdd   : > { %v1114_v14 = vld [vmem:[%s4176_s26 + $0x19c0] sm:$0xff]  ;;  %1113 = vst [vmem:[%s4181_s27 + $0x668] sm:$0xff] %v1112_v13 }
  0xde   : > { %1115 = vst [vmem:[%s4181_s27 + $0x670] sm:$0xff] %v1114_v14  ;;  %v1116_v15 = vld [vmem:[%s4176_s26 + $0x19e0] sm:$0xff] }
  0xdf   : > { %v1118_v16 = vld [vmem:[%s4176_s26 + $0x1a00] sm:$0xff]  ;;  %1117 = vst [vmem:[%s4181_s27 + $0x678] sm:$0xff] %v1116_v15 }
  0xe0   : > { %v1120_v17 = vld [vmem:[%s4176_s26 + $0x1a20] sm:$0xff]  ;;  %1119 = vst [vmem:[%s4181_s27 + $0x680] sm:$0xff] %v1118_v16 }
  0xe1   : > { %1121 = vst [vmem:[%s4181_s27 + $0x688] sm:$0xff] %v1120_v17  ;;  %v1122_v18 = vld [vmem:[%s4176_s26 + $0x1a40] sm:$0xff] }
  0xe2   : > { %v1124_v19 = vld [vmem:[%s4176_s26 + $0x1a60] sm:$0xff]  ;;  %1123 = vst [vmem:[%s4181_s27 + $0x690] sm:$0xff] %v1122_v18 }
  0xe3   : > { %v1126_v20 = vld [vmem:[%s4176_s26 + $0x1a80] sm:$0xff]  ;;  %1125 = vst [vmem:[%s4181_s27 + $0x698] sm:$0xff] %v1124_v19 }
  0xe4   : > { %1127 = vst [vmem:[%s4181_s27 + $0x6a0] sm:$0xff] %v1126_v20  ;;  %v1128_v21 = vld [vmem:[%s4176_s26 + $0x1aa0] sm:$0xff] }
  0xe5   : > { %v1130_v22 = vld [vmem:[%s4176_s26 + $0x1ac0] sm:$0xff]  ;;  %1129 = vst [vmem:[%s4181_s27 + $0x6a8] sm:$0xff] %v1128_v21 }
  0xe6   : > { %v1132_v23 = vld [vmem:[%s4176_s26 + $0x1ae0] sm:$0xff]  ;;  %1131 = vst [vmem:[%s4181_s27 + $0x6b0] sm:$0xff] %v1130_v22 }
  0xe7   : > { %1133 = vst [vmem:[%s4181_s27 + $0x6b8] sm:$0xff] %v1132_v23  ;;  %v1134_v24 = vld [vmem:[%s4176_s26 + $0x1b00] sm:$0xff] }
  0xe8   : > { %v1136_v25 = vld [vmem:[%s4176_s26 + $0x1b20] sm:$0xff]  ;;  %1135 = vst [vmem:[%s4181_s27 + $0x6c0] sm:$0xff] %v1134_v24 }
  0xe9   : > { %v1138_v26 = vld [vmem:[%s4176_s26 + $0x1b40] sm:$0xff]  ;;  %1137 = vst [vmem:[%s4181_s27 + $0x6c8] sm:$0xff] %v1136_v25 }
  0xea   : > { %1139 = vst [vmem:[%s4181_s27 + $0x6d0] sm:$0xff] %v1138_v26  ;;  %v1140_v27 = vld [vmem:[%s4176_s26 + $0x1b60] sm:$0xff] }
  0xeb   : > { %v1142_v28 = vld [vmem:[%s4176_s26 + $0x1b80] sm:$0xff]  ;;  %1141 = vst [vmem:[%s4181_s27 + $0x6d8] sm:$0xff] %v1140_v27 }
  0xec   : > { %v1144_v29 = vld [vmem:[%s4176_s26 + $0x1ba0] sm:$0xff]  ;;  %1143 = vst [vmem:[%s4181_s27 + $0x6e0] sm:$0xff] %v1142_v28 }
  0xed   : > { %1145 = vst [vmem:[%s4181_s27 + $0x6e8] sm:$0xff] %v1144_v29  ;;  %v1146_v30 = vld [vmem:[%s4176_s26 + $0x1bc0] sm:$0xff] }
  0xee   : > { %v1148_v31 = vld [vmem:[%s4176_s26 + $0x1be0] sm:$0xff]  ;;  %1147 = vst [vmem:[%s4181_s27 + $0x6f0] sm:$0xff] %v1146_v30 }
  0xef   : > { %v1150_v32 = vld [vmem:[%s4176_s26 + $0x1c00] sm:$0xff]  ;;  %1149 = vst [vmem:[%s4181_s27 + $0x6f8] sm:$0xff] %v1148_v31 }
  0xf0   : > { %1151 = vst [vmem:[%s4181_s27 + $0x700] sm:$0xff] %v1150_v32  ;;  %v1152_v33 = vld [vmem:[%s4176_s26 + $0x1c20] sm:$0xff] }
  0xf1   : > { %v1154_v34 = vld [vmem:[%s4176_s26 + $0x1c40] sm:$0xff]  ;;  %1153 = vst [vmem:[%s4181_s27 + $0x708] sm:$0xff] %v1152_v33 }
  0xf2   : > { %v1156_v35 = vld [vmem:[%s4176_s26 + $0x1c60] sm:$0xff]  ;;  %1155 = vst [vmem:[%s4181_s27 + $0x710] sm:$0xff] %v1154_v34 }
  0xf3   : > { %1157 = vst [vmem:[%s4181_s27 + $0x718] sm:$0xff] %v1156_v35  ;;  %v1158_v36 = vld [vmem:[%s4176_s26 + $0x1c80] sm:$0xff] }
  0xf4   : > { %v1160_v37 = vld [vmem:[%s4176_s26 + $0x1ca0] sm:$0xff]  ;;  %1159 = vst [vmem:[%s4181_s27 + $0x720] sm:$0xff] %v1158_v36 }
  0xf5   : > { %v1162_v38 = vld [vmem:[%s4176_s26 + $0x1cc0] sm:$0xff]  ;;  %1161 = vst [vmem:[%s4181_s27 + $0x728] sm:$0xff] %v1160_v37 }
  0xf6   : > { %1163 = vst [vmem:[%s4181_s27 + $0x730] sm:$0xff] %v1162_v38  ;;  %v1164_v39 = vld [vmem:[%s4176_s26 + $0x1ce0] sm:$0xff] }
  0xf7   : > { %v1166_v40 = vld [vmem:[%s4176_s26 + $0x1d00] sm:$0xff]  ;;  %1165 = vst [vmem:[%s4181_s27 + $0x738] sm:$0xff] %v1164_v39 }
  0xf8   : > { %v1168_v41 = vld [vmem:[%s4176_s26 + $0x1d20] sm:$0xff]  ;;  %1167 = vst [vmem:[%s4181_s27 + $0x740] sm:$0xff] %v1166_v40 }
  0xf9   : > { %1169 = vst [vmem:[%s4181_s27 + $0x748] sm:$0xff] %v1168_v41  ;;  %v1170_v42 = vld [vmem:[%s4176_s26 + $0x1d40] sm:$0xff] }
  0xfa   : > { %v1172_v43 = vld [vmem:[%s4176_s26 + $0x1d60] sm:$0xff]  ;;  %1171 = vst [vmem:[%s4181_s27 + $0x750] sm:$0xff] %v1170_v42 }
  0xfb   : > { %v1174_v44 = vld [vmem:[%s4176_s26 + $0x1d80] sm:$0xff]  ;;  %1173 = vst [vmem:[%s4181_s27 + $0x758] sm:$0xff] %v1172_v43 }
  0xfc   : > { %1175 = vst [vmem:[%s4181_s27 + $0x760] sm:$0xff] %v1174_v44  ;;  %v1176_v45 = vld [vmem:[%s4176_s26 + $0x1da0] sm:$0xff] }
  0xfd   : > { %v1178_v46 = vld [vmem:[%s4176_s26 + $0x1dc0] sm:$0xff]  ;;  %1177 = vst [vmem:[%s4181_s27 + $0x768] sm:$0xff] %v1176_v45 }
  0xfe   : > { %v1180_v47 = vld [vmem:[%s4176_s26 + $0x1de0] sm:$0xff]  ;;  %1179 = vst [vmem:[%s4181_s27 + $0x770] sm:$0xff] %v1178_v46 }
  0xff   : > { %1181 = vst [vmem:[%s4181_s27 + $0x778] sm:$0xff] %v1180_v47  ;;  %v1182_v48 = vld [vmem:[%s4176_s26 + $0x1e00] sm:$0xff] }
 0x100   : > { %v1184_v49 = vld [vmem:[%s4176_s26 + $0x1e20] sm:$0xff]  ;;  %1183 = vst [vmem:[%s4181_s27 + $0x780] sm:$0xff] %v1182_v48 }
 0x101   : > { %v1186_v50 = vld [vmem:[%s4176_s26 + $0x1e40] sm:$0xff]  ;;  %1185 = vst [vmem:[%s4181_s27 + $0x788] sm:$0xff] %v1184_v49 }
 0x102   : > { %1187 = vst [vmem:[%s4181_s27 + $0x790] sm:$0xff] %v1186_v50  ;;  %v1188_v51 = vld [vmem:[%s4176_s26 + $0x1e60] sm:$0xff] }
 0x103   : > { %v1190_v52 = vld [vmem:[%s4176_s26 + $0x1e80] sm:$0xff]  ;;  %1189 = vst [vmem:[%s4181_s27 + $0x798] sm:$0xff] %v1188_v51 }
 0x104   : > { %v1192_v53 = vld [vmem:[%s4176_s26 + $0x1ea0] sm:$0xff]  ;;  %1191 = vst [vmem:[%s4181_s27 + $0x7a0] sm:$0xff] %v1190_v52 }
 0x105   : > { %1193 = vst [vmem:[%s4181_s27 + $0x7a8] sm:$0xff] %v1192_v53  ;;  %v1194_v54 = vld [vmem:[%s4176_s26 + $0x1ec0] sm:$0xff] }
 0x106   : > { %v1196_v55 = vld [vmem:[%s4176_s26 + $0x1ee0] sm:$0xff]  ;;  %1195 = vst [vmem:[%s4181_s27 + $0x7b0] sm:$0xff] %v1194_v54 }
 0x107   : > { %v1198_v56 = vld [vmem:[%s4176_s26 + $0x1f00] sm:$0xff]  ;;  %1197 = vst [vmem:[%s4181_s27 + $0x7b8] sm:$0xff] %v1196_v55 }
 0x108   : > { %1199 = vst [vmem:[%s4181_s27 + $0x7c0] sm:$0xff] %v1198_v56  ;;  %v1200_v57 = vld [vmem:[%s4176_s26 + $0x1f20] sm:$0xff] }
 0x109   : > { %v1202_v58 = vld [vmem:[%s4176_s26 + $0x1f40] sm:$0xff]  ;;  %1201 = vst [vmem:[%s4181_s27 + $0x7c8] sm:$0xff] %v1200_v57 }
 0x10a   : > { %v1204_v59 = vld [vmem:[%s4176_s26 + $0x1f60] sm:$0xff]  ;;  %1203 = vst [vmem:[%s4181_s27 + $0x7d0] sm:$0xff] %v1202_v58 }
 0x10b   : > { %1205 = vst [vmem:[%s4181_s27 + $0x7d8] sm:$0xff] %v1204_v59  ;;  %v1206_v60 = vld [vmem:[%s4176_s26 + $0x1f80] sm:$0xff] }
 0x10c   : > { %v1208_v61 = vld [vmem:[%s4176_s26 + $0x1fa0] sm:$0xff]  ;;  %1207 = vst [vmem:[%s4181_s27 + $0x7e0] sm:$0xff] %v1206_v60 }
 0x10d   : > { %v1210_v62 = vld [vmem:[%s4176_s26 + $0x1fc0] sm:$0xff]  ;;  %1209 = vst [vmem:[%s4181_s27 + $0x7e8] sm:$0xff] %v1208_v61 }
 0x10e   : > { %1211 = vst [vmem:[%s4181_s27 + $0x7f0] sm:$0xff] %v1210_v62  ;;  %v1212_v63 = vld [vmem:[%s4176_s26 + $0x1fe0] sm:$0xff] }
 0x10f   : > { %1213 = vst [vmem:[%s4181_s27 + $0x7f8] sm:$0xff] %v1212_v63 }
 0x110 PF: > { %p3353_p6 = scmp.ge.s32.totalorder %s4111_s16, 1  ;;  %p1226_p7 = scmp.lt.s32.totalorder %s4111_s16, 5 }
 0x112   : > { %p1227_p8 = pnand %p3353_p6, %p1226_p7 }
 0x113   : > { %s1233_s28 = sand.u32 (!%p1227_p8), 1, %s4095_s12   ;;  %s3355_s26 = sshll.u32 (!%p1227_p8), %s4103_s14, 1 }
 0x114   : > { %1230 = sbr.rel (%p1227_p8) target bundleno = 740 (0x2e4), region = 66  ;;  %s3354_s6 = sshll.u32 (!%p1227_p8), %s1233_s28, 11 }
 0x115   : > { %s4709_s7 = scalar_lea.vmem (!%p1227_p8), [#allocation2], %s3354_s6  ;;  %p1276_p9 = scmp.lt.s32.totalorder (!%p1227_p8), %s3355_s26, 7 }
 0x119   : > { %v4698_v0 = vld [vmem:[%s5051_s0] sm:$0xff]  ;;  %v4703_v1 = vld [vmem:[%s5051_s0 + $0x8] sm:$0xff]  ;;  %v3673_v4 = vld [vmem:[%s4709_s7 + $0x74] ss:$8 sps:$4 sm:$0xff]   ;;  %s5062_s26 = smov (!%p1276_p9, %s3355_s26), 7 }
 0x11a   : > { %v3359_v2 = vcombine.high %v4698_v0, %v4698_v0  ;;  %v3361_v3 = vcombine.high %v4703_v1, %v4703_v1  ;;  %v3675_v5 = vld [vmem:[%s4709_s7 + $0x174] ss:$8 sps:$4 sm:$0xff]   ;;  %2902 = vmatprep.subr.bf16.mxu0 %v3673_v4  ;;  %v3677_v6 = vld [vmem:[%s4709_s7 + $0x70] ss:$8 sps:$4 sm:$0xff]   ;;  %v3679_v8 = vld [vmem:[%s4709_s7 + $0x64] ss:$8 sps:$4 sm:$0xff]   ;;  %s1278_s28 = scalar_lea.vmem %s5053_s2, %s5062_s26 }
 0x11b   : > { %v3678_v7 = vld [vmem:[%s4709_s7 + $0x170] ss:$8 sps:$4 sm:$0xff]   ;;  %2943 = vmatprep.subr.bf16.mxu1 %v3675_v5  ;;  %2903 = vmatpush1.bf16.msra.mxu0 %v3677_v6  ;;  %v3681_v9 = vld [vmem:[%s4709_s7 + $0x164] ss:$8 sps:$4 sm:$0xff]   ;;  %v3683_v10 = vld [vmem:[%s4709_s7 + $0x60] ss:$8 sps:$4 sm:$0xff]  }
 0x11c   : > { %2934 = vmatprep.mubr.bf16.mxu0 %v3359_v2  ;;  %2975 = vmatprep.mubr.bf16.mxu1 %v3361_v3  ;;  %v3684_v11 = vld [vmem:[%s4709_s7 + $0x160] ss:$8 sps:$4 sm:$0xff]   ;;  %v3685_v12 = vld [vmem:[%s4709_s7 + $0x54] ss:$8 sps:$4 sm:$0xff]   ;;  %v3689_v14 = vld [vmem:[%s4709_s7 + $0x50] ss:$8 sps:$4 sm:$0xff]  }
 0x11d   : > { %2944 = vmatpush1.bf16.msra.mxu1 %v3678_v7  ;;  %2904 = vmatprep.subr.bf16.mxu0 %v3679_v8  ;;  %v3687_v13 = vld [vmem:[%s4709_s7 + $0x154] ss:$8 sps:$4 sm:$0xff]   ;;  %v3690_v15 = vld [vmem:[%s4709_s7 + $0x150] ss:$8 sps:$4 sm:$0xff]   ;;  %v3691_v16 = vld [vmem:[%s4709_s7 + $0x44] ss:$8 sps:$4 sm:$0xff]  }
 0x11e   : > { %2945 = vmatprep.subr.bf16.mxu1 %v3681_v9  ;;  %v3693_v17 = vld [vmem:[%s4709_s7 + $0x144] ss:$8 sps:$4 sm:$0xff]   ;;  %v3695_v18 = vld [vmem:[%s4709_s7 + $0x40] ss:$8 sps:$4 sm:$0xff]   ;;  %v3697_v20 = vld [vmem:[%s4709_s7 + $0x34] ss:$8 sps:$4 sm:$0xff]  }
 0x11f   : > { %2905 = vmatpush1.bf16.msra.mxu0 %v3683_v10  ;;  %v3696_v19 = vld [vmem:[%s4709_s7 + $0x140] ss:$8 sps:$4 sm:$0xff]   ;;  %v3699_v21 = vld [vmem:[%s4709_s7 + $0x134] ss:$8 sps:$4 sm:$0xff]   ;;  %v3701_v22 = vld [vmem:[%s4709_s7 + $0x30] ss:$8 sps:$4 sm:$0xff]   ;;  %v3358_v10 = vcombine.low %v4698_v0, %v4698_v0 }
 0x120   : > { %2906 = vmatprep.subr.bf16.mxu0 %v3685_v12  ;;  %v3702_v23 = vld [vmem:[%s4709_s7 + $0x130] ss:$8 sps:$4 sm:$0xff]   ;;  %v3703_v24 = vld [vmem:[%s4709_s7 + $0x24] ss:$8 sps:$4 sm:$0xff]   ;;  %v3707_v26 = vld [vmem:[%s4709_s7 + $0x20] ss:$8 sps:$4 sm:$0xff]  }
 0x121   : > { %2946 = vmatpush1.bf16.msra.mxu1 %v3684_v11  ;;  %v3705_v25 = vld [vmem:[%s4709_s7 + $0x124] ss:$8 sps:$4 sm:$0xff]   ;;  %v3708_v27 = vld [vmem:[%s4709_s7 + $0x120] ss:$8 sps:$4 sm:$0xff]   ;;  %v3709_v28 = vld [vmem:[%s4709_s7 + $0x14] ss:$8 sps:$4 sm:$0xff]   ;;  %v3360_v11 = vcombine.low %v4703_v1, %v4703_v1 }
 0x122   : > { %2947 = vmatprep.subr.bf16.mxu1 %v3687_v13  ;;  %v3711_v29 = vld [vmem:[%s4709_s7 + $0x114] ss:$8 sps:$4 sm:$0xff]   ;;  %v3713_v30 = vld [vmem:[%s4709_s7 + $0x10] ss:$8 sps:$4 sm:$0xff]   ;;  %v3715_v32 = vld [vmem:[%s4709_s7 + $0x4] ss:$8 sps:$4 sm:$0xff]  }
 0x123   : > { %2907 = vmatpush1.bf16.msra.mxu0 %v3689_v14  ;;  %v3714_v31 = vld [vmem:[%s4709_s7 + $0x110] ss:$8 sps:$4 sm:$0xff]   ;;  %v3717_v33 = vld [vmem:[%s4709_s7 + $0x104] ss:$8 sps:$4 sm:$0xff]   ;;  %v3719_v34 = vld [vmem:[%s4709_s7] ss:$8 sps:$4 sm:$0xff]  }
 0x124   : > { %2908 = vmatprep.subr.bf16.mxu0 %v3691_v16  ;;  %v3720_v35 = vld [vmem:[%s4709_s7 + $0x100] ss:$8 sps:$4 sm:$0xff]   ;;  %v3721_v36 = vld [vmem:[%s4709_s7 + $0xf4] ss:$8 sps:$4 sm:$0xff]   ;;  %v3725_v38 = vld [vmem:[%s4709_s7 + $0xf0] ss:$8 sps:$4 sm:$0xff]  }
 0x125   : > { %2948 = vmatpush1.bf16.msra.mxu1 %v3690_v15  ;;  %v3723_v37 = vld [vmem:[%s4709_s7 + $0x1f4] ss:$8 sps:$4 sm:$0xff]   ;;  %v3726_v39 = vld [vmem:[%s4709_s7 + $0x1f0] ss:$8 sps:$4 sm:$0xff]   ;;  %v3727_v40 = vld [vmem:[%s4709_s7 + $0xe4] ss:$8 sps:$4 sm:$0xff]  }
 0x126   : > { %2949 = vmatprep.subr.bf16.mxu1 %v3693_v17  ;;  %v3729_v41 = vld [vmem:[%s4709_s7 + $0x1e4] ss:$8 sps:$4 sm:$0xff]   ;;  %v3731_v42 = vld [vmem:[%s4709_s7 + $0xe0] ss:$8 sps:$4 sm:$0xff]   ;;  %v3733_v44 = vld [vmem:[%s4709_s7 + $0xd4] ss:$8 sps:$4 sm:$0xff]  }
 0x127   : > { %2909 = vmatpush1.bf16.msra.mxu0 %v3695_v18  ;;  %v3732_v43 = vld [vmem:[%s4709_s7 + $0x1e0] ss:$8 sps:$4 sm:$0xff]   ;;  %v3735_v45 = vld [vmem:[%s4709_s7 + $0x1d4] ss:$8 sps:$4 sm:$0xff]   ;;  %v3737_v46 = vld [vmem:[%s4709_s7 + $0xd0] ss:$8 sps:$4 sm:$0xff]  }
 0x128   : > { %2910 = vmatprep.subr.bf16.mxu0 %v3697_v20  ;;  %v3738_v47 = vld [vmem:[%s4709_s7 + $0x1d0] ss:$8 sps:$4 sm:$0xff]   ;;  %v3739_v48 = vld [vmem:[%s4709_s7 + $0xc4] ss:$8 sps:$4 sm:$0xff]   ;;  %v3743_v50 = vld [vmem:[%s4709_s7 + $0xc0] ss:$8 sps:$4 sm:$0xff]  }
 0x129   : > { %2950 = vmatpush1.bf16.msra.mxu1 %v3696_v19  ;;  %v3741_v49 = vld [vmem:[%s4709_s7 + $0x1c4] ss:$8 sps:$4 sm:$0xff]   ;;  %v3744_v51 = vld [vmem:[%s4709_s7 + $0x1c0] ss:$8 sps:$4 sm:$0xff]   ;;  %v3745_v52 = vld [vmem:[%s4709_s7 + $0xb4] ss:$8 sps:$4 sm:$0xff]  }
 0x12a   : > { %2951 = vmatprep.subr.bf16.mxu1 %v3699_v21  ;;  %v3747_v53 = vld [vmem:[%s4709_s7 + $0x1b4] ss:$8 sps:$4 sm:$0xff]   ;;  %v3749_v54 = vld [vmem:[%s4709_s7 + $0xb0] ss:$8 sps:$4 sm:$0xff]   ;;  %v3751_v56 = vld [vmem:[%s4709_s7 + $0xa4] ss:$8 sps:$4 sm:$0xff]  }
 0x12b   : > { %2911 = vmatpush1.bf16.msra.mxu0 %v3701_v22  ;;  %v3750_v55 = vld [vmem:[%s4709_s7 + $0x1b0] ss:$8 sps:$4 sm:$0xff]   ;;  %v3753_v57 = vld [vmem:[%s4709_s7 + $0x1a4] ss:$8 sps:$4 sm:$0xff]   ;;  %v3755_v58 = vld [vmem:[%s4709_s7 + $0xa0] ss:$8 sps:$4 sm:$0xff]  }
 0x12c   : > { %2912 = vmatprep.subr.bf16.mxu0 %v3703_v24  ;;  %v3756_v59 = vld [vmem:[%s4709_s7 + $0x1a0] ss:$8 sps:$4 sm:$0xff]   ;;  %v3757_v60 = vld [vmem:[%s4709_s7 + $0x94] ss:$8 sps:$4 sm:$0xff]   ;;  %v3761_v62 = vld [vmem:[%s4709_s7 + $0x90] ss:$8 sps:$4 sm:$0xff]  }
 0x12d   : > { %2952 = vmatpush1.bf16.msra.mxu1 %v3702_v23  ;;  %v3759_v61 = vld [vmem:[%s4709_s7 + $0x194] ss:$8 sps:$4 sm:$0xff]   ;;  %v3762_v63 = vld [vmem:[%s4709_s7 + $0x190] ss:$8 sps:$4 sm:$0xff]   ;;  %v3763_v2 = vld [vmem:[%s4709_s7 + $0x84] ss:$8 sps:$4 sm:$0xff]  }
 0x12e   : > { %2953 = vmatprep.subr.bf16.mxu1 %v3705_v25  ;;  %v3765_v3 = vld [vmem:[%s4709_s7 + $0x184] ss:$8 sps:$4 sm:$0xff]   ;;  %v3767_v4 = vld [vmem:[%s4709_s7 + $0x80] ss:$8 sps:$4 sm:$0xff]   ;;  %v3775_v6 = vld [vmem:[%s4709_s7 + $0x274] ss:$8 sps:$4 sm:$0xff]  }
 0x12f   : > { %2913 = vmatpush1.bf16.msra.mxu0 %v3707_v26  ;;  %v3768_v5 = vld [vmem:[%s4709_s7 + $0x180] ss:$8 sps:$4 sm:$0xff]   ;;  %v3778_v7 = vld [vmem:[%s4709_s7 + $0x374] ss:$8 sps:$4 sm:$0xff]   ;;  %v3773_v12 = vld [vmem:[%s4709_s7 + $0x270] ss:$8 sps:$4 sm:$0xff]  }
 0x130   : > { %2914 = vmatprep.subr.bf16.mxu0 %v3709_v28  ;;  %v4780_v8 = vld [vmem:[%s5051_s0 + $0x10] sm:$0xff]  ;;  %v4785_v9 = vld [vmem:[%s5051_s0 + $0x18] sm:$0xff]  ;;  %v3781_v14 = vld [vmem:[%s4709_s7 + $0x264] ss:$8 sps:$4 sm:$0xff]   ;;  %s3357_s29 = sshll.u32 %s5062_s26, 3 }
 0x131   : > { %2954 = vmatpush1.bf16.msra.mxu1 %v3708_v27  ;;  %v3776_v13 = vld [vmem:[%s4709_s7 + $0x370] ss:$8 sps:$4 sm:$0xff]   ;;  %v3784_v15 = vld [vmem:[%s4709_s7 + $0x364] ss:$8 sps:$4 sm:$0xff]   ;;  %v3363_v16 = vcombine.high %v4780_v8, %v4780_v8  ;;  %v3365_v0 = vcombine.high %v4785_v9, %v4785_v9  ;;  %v3779_v1 = vld [vmem:[%s4709_s7 + $0x260] ss:$8 sps:$4 sm:$0xff]   ;;  %s1288_s5 = scalar_lea.vmem %s5054_s3, %s3357_s29 }
 0x132   : > { %2955 = vmatprep.subr.bf16.mxu1 %v3711_v29  ;;  %v3782_v17 = vld [vmem:[%s4709_s7 + $0x360] ss:$8 sps:$4 sm:$0xff]   ;;  %v3787_v18 = vld [vmem:[%s4709_s7 + $0x254] ss:$8 sps:$4 sm:$0xff]   ;;  %v3785_v20 = vld [vmem:[%s4709_s7 + $0x250] ss:$8 sps:$4 sm:$0xff]  }
 0x133   : > { %2915 = vmatpush1.bf16.msra.mxu0 %v3713_v30  ;;  %v3790_v19 = vld [vmem:[%s4709_s7 + $0x354] ss:$8 sps:$4 sm:$0xff]   ;;  %v3788_v21 = vld [vmem:[%s4709_s7 + $0x350] ss:$8 sps:$4 sm:$0xff]   ;;  %v3793_v22 = vld [vmem:[%s4709_s7 + $0x244] ss:$8 sps:$4 sm:$0xff]  }
 0x134   : > { %2916 = vmatprep.subr.bf16.mxu0 %v3715_v32  ;;  %v3796_v23 = vld [vmem:[%s4709_s7 + $0x344] ss:$8 sps:$4 sm:$0xff]   ;;  %v3791_v24 = vld [vmem:[%s4709_s7 + $0x240] ss:$8 sps:$4 sm:$0xff]   ;;  %v3799_v26 = vld [vmem:[%s4709_s7 + $0x234] ss:$8 sps:$4 sm:$0xff]  }
 0x135   : > { %2956 = vmatpush1.bf16.msra.mxu1 %v3714_v31  ;;  %v3794_v25 = vld [vmem:[%s4709_s7 + $0x340] ss:$8 sps:$4 sm:$0xff]   ;;  %v3802_v27 = vld [vmem:[%s4709_s7 + $0x334] ss:$8 sps:$4 sm:$0xff]   ;;  %v3797_v28 = vld [vmem:[%s4709_s7 + $0x230] ss:$8 sps:$4 sm:$0xff]  }
 0x136   : > { %2957 = vmatprep.subr.bf16.mxu1 %v3717_v33  ;;  %v3800_v29 = vld [vmem:[%s4709_s7 + $0x330] ss:$8 sps:$4 sm:$0xff]   ;;  %v3805_v30 = vld [vmem:[%s4709_s7 + $0x224] ss:$8 sps:$4 sm:$0xff]   ;;  %v3803_v32 = vld [vmem:[%s4709_s7 + $0x220] ss:$8 sps:$4 sm:$0xff]  }
 0x137   : > { %2917 = vmatpush1.bf16.msra.mxu0 %v3719_v34  ;;  %v3808_v31 = vld [vmem:[%s4709_s7 + $0x324] ss:$8 sps:$4 sm:$0xff]   ;;  %v3806_v33 = vld [vmem:[%s4709_s7 + $0x320] ss:$8 sps:$4 sm:$0xff]   ;;  %v3811_v34 = vld [vmem:[%s4709_s7 + $0x214] ss:$8 sps:$4 sm:$0xff]  }
 0x138   : > { %2918 = vmatprep.subr.bf16.mxu0 %v3721_v36  ;;  %v3809_v36 = vld [vmem:[%s4709_s7 + $0x210] ss:$8 sps:$4 sm:$0xff]  }
 0x139   : > { %2958 = vmatpush1.bf16.msra.mxu1 %v3720_v35  ;;  %v3814_v35 = vld [vmem:[%s4709_s7 + $0x314] ss:$8 sps:$4 sm:$0xff]  }
 0x13a   : > { %2959 = vmatprep.subr.bf16.mxu1 %v3723_v37  ;;  %v3812_v37 = vld [vmem:[%s4709_s7 + $0x310] ss:$8 sps:$4 sm:$0xff]  }
 0x13b   : > { %2919 = vmatpush2.bf16.msra.mxu0 %v3725_v38  ;;  %v3817_v38 = vld [vmem:[%s4709_s7 + $0x204] ss:$8 sps:$4 sm:$0xff]  }
 0x13c   : > { %2920 = vmatprep.subr.bf16.mxu0 %v3727_v40  ;;  %v3815_v40 = vld [vmem:[%s4709_s7 + $0x200] ss:$8 sps:$4 sm:$0xff]  }
 0x13d   : > { %2960 = vmatpush2.bf16.msra.mxu1 %v3726_v39  ;;  %v3820_v39 = vld [vmem:[%s4709_s7 + $0x304] ss:$8 sps:$4 sm:$0xff]  }
 0x13e   : > { %2961 = vmatprep.subr.bf16.mxu1 %v3729_v41  ;;  %v3818_v41 = vld [vmem:[%s4709_s7 + $0x300] ss:$8 sps:$4 sm:$0xff]  }
 0x13f   : > { %2921 = vmatpush2.bf16.msra.mxu0 %v3731_v42  ;;  %v3823_v42 = vld [vmem:[%s4709_s7 + $0x2f4] ss:$8 sps:$4 sm:$0xff]  }
 0x140   : > { %2922 = vmatprep.subr.bf16.mxu0 %v3733_v44  ;;  %v3821_v44 = vld [vmem:[%s4709_s7 + $0x2f0] ss:$8 sps:$4 sm:$0xff]  }
 0x141   : > { %2962 = vmatpush2.bf16.msra.mxu1 %v3732_v43  ;;  %v3826_v43 = vld [vmem:[%s4709_s7 + $0x3f4] ss:$8 sps:$4 sm:$0xff]  }
 0x142   : > { %2963 = vmatprep.subr.bf16.mxu1 %v3735_v45  ;;  %v3824_v45 = vld [vmem:[%s4709_s7 + $0x3f0] ss:$8 sps:$4 sm:$0xff]  }
 0x143   : > { %2923 = vmatpush2.bf16.msra.mxu0 %v3737_v46  ;;  %v3829_v46 = vld [vmem:[%s4709_s7 + $0x2e4] ss:$8 sps:$4 sm:$0xff]  }
 0x144   : > { %2924 = vmatprep.subr.bf16.mxu0 %v3739_v48  ;;  %v3827_v48 = vld [vmem:[%s4709_s7 + $0x2e0] ss:$8 sps:$4 sm:$0xff]  }
 0x145   : > { %2964 = vmatpush2.bf16.msra.mxu1 %v3738_v47  ;;  %v3832_v47 = vld [vmem:[%s4709_s7 + $0x3e4] ss:$8 sps:$4 sm:$0xff]  }
 0x146   : > { %2965 = vmatprep.subr.bf16.mxu1 %v3741_v49  ;;  %v3830_v49 = vld [vmem:[%s4709_s7 + $0x3e0] ss:$8 sps:$4 sm:$0xff]  }
 0x147   : > { %2925 = vmatpush2.bf16.msra.mxu0 %v3743_v50  ;;  %v3835_v50 = vld [vmem:[%s4709_s7 + $0x2d4] ss:$8 sps:$4 sm:$0xff]  }
 0x148   : > { %2926 = vmatprep.subr.bf16.mxu0 %v3745_v52  ;;  %v3833_v52 = vld [vmem:[%s4709_s7 + $0x2d0] ss:$8 sps:$4 sm:$0xff]  }
 0x149   : > { %2966 = vmatpush2.bf16.msra.mxu1 %v3744_v51  ;;  %v3838_v51 = vld [vmem:[%s4709_s7 + $0x3d4] ss:$8 sps:$4 sm:$0xff]  }
 0x14a   : > { %2967 = vmatprep.subr.bf16.mxu1 %v3747_v53  ;;  %v3836_v53 = vld [vmem:[%s4709_s7 + $0x3d0] ss:$8 sps:$4 sm:$0xff]  }
 0x14b   : > { %2927 = vmatpush2.bf16.msra.mxu0 %v3749_v54  ;;  %v3841_v54 = vld [vmem:[%s4709_s7 + $0x2c4] ss:$8 sps:$4 sm:$0xff]  }
 0x14c   : > { %2928 = vmatprep.subr.bf16.mxu0 %v3751_v56  ;;  %v3839_v56 = vld [vmem:[%s4709_s7 + $0x2c0] ss:$8 sps:$4 sm:$0xff]  }
 0x14d   : > { %2968 = vmatpush2.bf16.msra.mxu1 %v3750_v55  ;;  %v3844_v55 = vld [vmem:[%s4709_s7 + $0x3c4] ss:$8 sps:$4 sm:$0xff]  }
 0x14e   : > { %2969 = vmatprep.subr.bf16.mxu1 %v3753_v57  ;;  %v3842_v57 = vld [vmem:[%s4709_s7 + $0x3c0] ss:$8 sps:$4 sm:$0xff]  }
 0x14f   : > { %2929 = vmatpush2.bf16.msra.mxu0 %v3755_v58  ;;  %v3847_v58 = vld [vmem:[%s4709_s7 + $0x2b4] ss:$8 sps:$4 sm:$0xff]  }
 0x150   : > { %2930 = vmatprep.subr.bf16.mxu0 %v3757_v60  ;;  %v3845_v60 = vld [vmem:[%s4709_s7 + $0x2b0] ss:$8 sps:$4 sm:$0xff]  }
 0x151   : > { %2970 = vmatpush2.bf16.msra.mxu1 %v3756_v59  ;;  %v3850_v59 = vld [vmem:[%s4709_s7 + $0x3b4] ss:$8 sps:$4 sm:$0xff]  }
 0x152   : > { %2971 = vmatprep.subr.bf16.mxu1 %v3759_v61  ;;  %v3848_v61 = vld [vmem:[%s4709_s7 + $0x3b0] ss:$8 sps:$4 sm:$0xff]  }
 0x153   : > { %2931 = vmatpush2.bf16.msra.mxu0 %v3761_v62  ;;  %v3853_v62 = vld [vmem:[%s4709_s7 + $0x2a4] ss:$8 sps:$4 sm:$0xff]  }
 0x154   : > { %2932 = vmatprep.subr.bf16.mxu0 %v3763_v2  ;;  %v3851_v2 = vld [vmem:[%s4709_s7 + $0x2a0] ss:$8 sps:$4 sm:$0xff]  }
 0x155   : > { %2972 = vmatpush2.bf16.msra.mxu1 %v3762_v63  ;;  %v3856_v63 = vld [vmem:[%s4709_s7 + $0x3a4] ss:$8 sps:$4 sm:$0xff]  }
 0x156   : > { %2973 = vmatprep.subr.bf16.mxu1 %v3765_v3  ;;  %v3854_v3 = vld [vmem:[%s4709_s7 + $0x3a0] ss:$8 sps:$4 sm:$0xff]  }
 0x157   : > { %2933 = vmatpush2.bf16.msra.mxu0 %v3767_v4  ;;  %v3859_v4 = vld [vmem:[%s4709_s7 + $0x294] ss:$8 sps:$4 sm:$0xff]  }
 0x158   : > { %2984 = vmatprep.subr.bf16.mxu0 %v3775_v6  ;;  %v3857_v6 = vld [vmem:[%s4709_s7 + $0x290] ss:$8 sps:$4 sm:$0xff]  }
 0x159   : > { %2974 = vmatpush2.bf16.msra.mxu1 %v3768_v5  ;;  %v3862_v5 = vld [vmem:[%s4709_s7 + $0x394] ss:$8 sps:$4 sm:$0xff]  }
 0x15a   : > { %3025 = vmatprep.subr.bf16.mxu1 %v3778_v7  ;;  %2935 = vmatmul.mubr.bf16.vlgmr.msra.gmra.mxu0 %v3358_v10  ;;  %v3860_v7 = vld [vmem:[%s4709_s7 + $0x390] ss:$8 sps:$4 sm:$0xff]   ;;  %v3865_v10 = vld [vmem:[%s4709_s7 + $0x284] ss:$8 sps:$4 sm:$0xff]  }
 0x15b   : > { %2985 = vmatpush1.bf16.msra.mxu0 %v3773_v12  ;;  %3016 = vmatprep.mubr.bf16.mxu0 %v3363_v16  ;;  %v3863_v12 = vld [vmem:[%s4709_s7 + $0x280] ss:$8 sps:$4 sm:$0xff]   ;;  %v3362_v16 = vcombine.low %v4780_v8, %v4780_v8  ;;  %v3881_v8 = vld [vmem:[%s4709_s7 + $0x464] ss:$8 sps:$4 sm:$0xff]  }
 0x15c   : > { %2976 = vmatmul.mubr.bf16.vlgmr.msra.gmra.mxu1 %v3360_v11  ;;  %2986 = vmatprep.subr.bf16.mxu0 %v3781_v14  ;;  %v3868_v11 = vld [vmem:[%s4709_s7 + $0x384] ss:$8 sps:$4 sm:$0xff]   ;;  %v3875_v14 = vld [vmem:[%s4709_s7 + $0x474] ss:$8 sps:$4 sm:$0xff]  }
 0x15d   : > { %3026 = vmatpush1.bf16.msra.mxu1 %v3776_v13  ;;  %3057 = vmatprep.mubr.bf16.mxu1 %v3365_v0  ;;  %v3866_v13 = vld [vmem:[%s4709_s7 + $0x380] ss:$8 sps:$4 sm:$0xff]   ;;  %v3364_v0 = vcombine.low %v4785_v9, %v4785_v9  ;;  %v3884_v9 = vld [vmem:[%s4709_s7 + $0x564] ss:$8 sps:$4 sm:$0xff]  }
 0x15e   : > { %3027 = vmatprep.subr.bf16.mxu1 %v3784_v15  ;;  %v3878_v15 = vld [vmem:[%s4709_s7 + $0x574] ss:$8 sps:$4 sm:$0xff]  }
 0x15f   : > { %2987 = vmatpush1.bf16.msra.mxu0 %v3779_v1  ;;  %v3873_v1 = vld [vmem:[%s4709_s7 + $0x470] ss:$8 sps:$4 sm:$0xff]  }
 0x160   : > { %2988 = vmatprep.subr.bf16.mxu0 %v3787_v18  ;;  %v4868_v18 = vld [vmem:[%s5051_s0 + $0x20] sm:$0xff] }
 0x161   : > { %3028 = vmatpush1.bf16.msra.mxu1 %v3782_v17  ;;  %v3876_v17 = vld [vmem:[%s4709_s7 + $0x570] ss:$8 sps:$4 sm:$0xff]  }
 0x162   : > { %3029 = vmatprep.subr.bf16.mxu1 %v3790_v19  ;;  %v4873_v19 = vld [vmem:[%s5051_s0 + $0x28] sm:$0xff] }
 0x163   : > { %2989 = vmatpush1.bf16.msra.mxu0 %v3785_v20  ;;  %v3367_v20 = vcombine.high %v4868_v18, %v4868_v18 }
 0x164   : > { %2990 = vmatprep.subr.bf16.mxu0 %v3793_v22  ;;  %v3879_v22 = vld [vmem:[%s4709_s7 + $0x460] ss:$8 sps:$4 sm:$0xff]  }
 0x165   : > { %3030 = vmatpush1.bf16.msra.mxu1 %v3788_v21  ;;  %v3369_v21 = vcombine.high %v4873_v19, %v4873_v19 }
 0x166   : > { %3031 = vmatprep.subr.bf16.mxu1 %v3796_v23  ;;  %v3882_v23 = vld [vmem:[%s4709_s7 + $0x560] ss:$8 sps:$4 sm:$0xff]  }
 0x167   : > { %2991 = vmatpush1.bf16.msra.mxu0 %v3791_v24  ;;  %v3887_v24 = vld [vmem:[%s4709_s7 + $0x454] ss:$8 sps:$4 sm:$0xff]  }
 0x168   : > { %2992 = vmatprep.subr.bf16.mxu0 %v3799_v26  ;;  %v3885_v26 = vld [vmem:[%s4709_s7 + $0x450] ss:$8 sps:$4 sm:$0xff]  }
 0x169   : > { %3032 = vmatpush1.bf16.msra.mxu1 %v3794_v25  ;;  %v3890_v25 = vld [vmem:[%s4709_s7 + $0x554] ss:$8 sps:$4 sm:$0xff]  }
 0x16a   : > { %3033 = vmatprep.subr.bf16.mxu1 %v3802_v27  ;;  %v3888_v27 = vld [vmem:[%s4709_s7 + $0x550] ss:$8 sps:$4 sm:$0xff]  }
 0x16b   : > { %2993 = vmatpush1.bf16.msra.mxu0 %v3797_v28  ;;  %v3893_v28 = vld [vmem:[%s4709_s7 + $0x444] ss:$8 sps:$4 sm:$0xff]  }
 0x16c   : > { %2994 = vmatprep.subr.bf16.mxu0 %v3805_v30  ;;  %v3891_v30 = vld [vmem:[%s4709_s7 + $0x440] ss:$8 sps:$4 sm:$0xff]  }
 0x16d   : > { %3034 = vmatpush1.bf16.msra.mxu1 %v3800_v29  ;;  %v3896_v29 = vld [vmem:[%s4709_s7 + $0x544] ss:$8 sps:$4 sm:$0xff]  }
 0x16e   : > { %3035 = vmatprep.subr.bf16.mxu1 %v3808_v31  ;;  %v3894_v31 = vld [vmem:[%s4709_s7 + $0x540] ss:$8 sps:$4 sm:$0xff]  }
 0x16f   : > { %2995 = vmatpush1.bf16.msra.mxu0 %v3803_v32  ;;  %v3899_v32 = vld [vmem:[%s4709_s7 + $0x434] ss:$8 sps:$4 sm:$0xff]  }
 0x170   : > { %2996 = vmatprep.subr.bf16.mxu0 %v3811_v34  ;;  %v3897_v34 = vld [vmem:[%s4709_s7 + $0x430] ss:$8 sps:$4 sm:$0xff]  }
 0x171   : > { %3036 = vmatpush1.bf16.msra.mxu1 %v3806_v33  ;;  %v3902_v33 = vld [vmem:[%s4709_s7 + $0x534] ss:$8 sps:$4 sm:$0xff]  }
 0x172   : > { %3037 = vmatprep.subr.bf16.mxu1 %v3814_v35  ;;  %v3900_v35 = vld [vmem:[%s4709_s7 + $0x530] ss:$8 sps:$4 sm:$0xff]  }
 0x173   : > { %2997 = vmatpush1.bf16.msra.mxu0 %v3809_v36  ;;  %v3905_v36 = vld [vmem:[%s4709_s7 + $0x424] ss:$8 sps:$4 sm:$0xff]  }
 0x174   : > { %2998 = vmatprep.subr.bf16.mxu0 %v3817_v38  ;;  %v3903_v38 = vld [vmem:[%s4709_s7 + $0x420] ss:$8 sps:$4 sm:$0xff]  }
 0x175   : > { %3038 = vmatpush1.bf16.msra.mxu1 %v3812_v37  ;;  %v3908_v37 = vld [vmem:[%s4709_s7 + $0x524] ss:$8 sps:$4 sm:$0xff]  }
 0x176   : > { %3039 = vmatprep.subr.bf16.mxu1 %v3820_v39  ;;  %v3906_v39 = vld [vmem:[%s4709_s7 + $0x520] ss:$8 sps:$4 sm:$0xff]  }
 0x177   : > { %2999 = vmatpush1.bf16.msra.mxu0 %v3815_v40  ;;  %v3911_v40 = vld [vmem:[%s4709_s7 + $0x414] ss:$8 sps:$4 sm:$0xff]  }
 0x178   : > { %3000 = vmatprep.subr.bf16.mxu0 %v3823_v42  ;;  %v3909_v42 = vld [vmem:[%s4709_s7 + $0x410] ss:$8 sps:$4 sm:$0xff]  }
 0x179   : > { %3040 = vmatpush1.bf16.msra.mxu1 %v3818_v41  ;;  %v3914_v41 = vld [vmem:[%s4709_s7 + $0x514] ss:$8 sps:$4 sm:$0xff]  }
 0x17a   : > { %3041 = vmatprep.subr.bf16.mxu1 %v3826_v43  ;;  %v3912_v43 = vld [vmem:[%s4709_s7 + $0x510] ss:$8 sps:$4 sm:$0xff]  }
 0x17b   : > { %3001 = vmatpush2.bf16.msra.mxu0 %v3821_v44  ;;  %v3917_v44 = vld [vmem:[%s4709_s7 + $0x404] ss:$8 sps:$4 sm:$0xff]  }
 0x17c   : > { %3002 = vmatprep.subr.bf16.mxu0 %v3829_v46  ;;  %v3915_v46 = vld [vmem:[%s4709_s7 + $0x400] ss:$8 sps:$4 sm:$0xff]  }
 0x17d   : > { %3042 = vmatpush2.bf16.msra.mxu1 %v3824_v45  ;;  %v3920_v45 = vld [vmem:[%s4709_s7 + $0x504] ss:$8 sps:$4 sm:$0xff]  }
 0x17e   : > { %3043 = vmatprep.subr.bf16.mxu1 %v3832_v47  ;;  %v3918_v47 = vld [vmem:[%s4709_s7 + $0x500] ss:$8 sps:$4 sm:$0xff]  }
 0x17f   : > { %3003 = vmatpush2.bf16.msra.mxu0 %v3827_v48  ;;  %v3923_v48 = vld [vmem:[%s4709_s7 + $0x4f4] ss:$8 sps:$4 sm:$0xff]  }
 0x180   : > { %3004 = vmatprep.subr.bf16.mxu0 %v3835_v50  ;;  %v3921_v50 = vld [vmem:[%s4709_s7 + $0x4f0] ss:$8 sps:$4 sm:$0xff]  }
 0x181   : > { %3044 = vmatpush2.bf16.msra.mxu1 %v3830_v49  ;;  %v3926_v49 = vld [vmem:[%s4709_s7 + $0x5f4] ss:$8 sps:$4 sm:$0xff]  }
 0x182   : > { %3045 = vmatprep.subr.bf16.mxu1 %v3838_v51  ;;  %v3924_v51 = vld [vmem:[%s4709_s7 + $0x5f0] ss:$8 sps:$4 sm:$0xff]  }
 0x183   : > { %3005 = vmatpush2.bf16.msra.mxu0 %v3833_v52  ;;  %v3929_v52 = vld [vmem:[%s4709_s7 + $0x4e4] ss:$8 sps:$4 sm:$0xff]  }
 0x184   : > { %3006 = vmatprep.subr.bf16.mxu0 %v3841_v54  ;;  %v3927_v54 = vld [vmem:[%s4709_s7 + $0x4e0] ss:$8 sps:$4 sm:$0xff]  }
 0x185   : > { %3046 = vmatpush2.bf16.msra.mxu1 %v3836_v53  ;;  %v3932_v53 = vld [vmem:[%s4709_s7 + $0x5e4] ss:$8 sps:$4 sm:$0xff]  }
 0x186   : > { %3047 = vmatprep.subr.bf16.mxu1 %v3844_v55  ;;  %v3930_v55 = vld [vmem:[%s4709_s7 + $0x5e0] ss:$8 sps:$4 sm:$0xff]  }
 0x187   : > { %3007 = vmatpush2.bf16.msra.mxu0 %v3839_v56  ;;  %v3935_v56 = vld [vmem:[%s4709_s7 + $0x4d4] ss:$8 sps:$4 sm:$0xff]  }
 0x188   : > { %3008 = vmatprep.subr.bf16.mxu0 %v3847_v58  ;;  %v3933_v58 = vld [vmem:[%s4709_s7 + $0x4d0] ss:$8 sps:$4 sm:$0xff]  }
 0x189   : > { %3048 = vmatpush2.bf16.msra.mxu1 %v3842_v57  ;;  %v3938_v57 = vld [vmem:[%s4709_s7 + $0x5d4] ss:$8 sps:$4 sm:$0xff]  }
 0x18a   : > { %3049 = vmatprep.subr.bf16.mxu1 %v3850_v59  ;;  %v3936_v59 = vld [vmem:[%s4709_s7 + $0x5d0] ss:$8 sps:$4 sm:$0xff]  }
 0x18b   : > { %3009 = vmatpush2.bf16.msra.mxu0 %v3845_v60  ;;  %v3941_v60 = vld [vmem:[%s4709_s7 + $0x4c4] ss:$8 sps:$4 sm:$0xff]  }
 0x18c   : > { %3010 = vmatprep.subr.bf16.mxu0 %v3853_v62  ;;  %v3939_v62 = vld [vmem:[%s4709_s7 + $0x4c0] ss:$8 sps:$4 sm:$0xff]  }
 0x18d   : > { %3050 = vmatpush2.bf16.msra.mxu1 %v3848_v61  ;;  %v3944_v61 = vld [vmem:[%s4709_s7 + $0x5c4] ss:$8 sps:$4 sm:$0xff]  }
 0x18e   : > { %3051 = vmatprep.subr.bf16.mxu1 %v3856_v63  ;;  %v3942_v63 = vld [vmem:[%s4709_s7 + $0x5c0] ss:$8 sps:$4 sm:$0xff]  }
 0x18f   : > { %3011 = vmatpush2.bf16.msra.mxu0 %v3851_v2  ;;  %v3947_v2 = vld [vmem:[%s4709_s7 + $0x4b4] ss:$8 sps:$4 sm:$0xff]  }
 0x190   : > { %3012 = vmatprep.subr.bf16.mxu0 %v3859_v4  ;;  %v3945_v4 = vld [vmem:[%s4709_s7 + $0x4b0] ss:$8 sps:$4 sm:$0xff]  }
 0x191   : > { %3052 = vmatpush2.bf16.msra.mxu1 %v3854_v3  ;;  %v3950_v3 = vld [vmem:[%s4709_s7 + $0x5b4] ss:$8 sps:$4 sm:$0xff]  }
 0x192   : > { %3053 = vmatprep.subr.bf16.mxu1 %v3862_v5  ;;  %v3948_v5 = vld [vmem:[%s4709_s7 + $0x5b0] ss:$8 sps:$4 sm:$0xff]  }
 0x193   : > { %3013 = vmatpush2.bf16.msra.mxu0 %v3857_v6  ;;  %v3953_v6 = vld [vmem:[%s4709_s7 + $0x4a4] ss:$8 sps:$4 sm:$0xff]  }
 0x194   : > { %3014 = vmatprep.subr.bf16.mxu0 %v3865_v10  ;;  %v3951_v10 = vld [vmem:[%s4709_s7 + $0x4a0] ss:$8 sps:$4 sm:$0xff]  }
 0x195   : > { %3054 = vmatpush2.bf16.msra.mxu1 %v3860_v7  ;;  %v3956_v7 = vld [vmem:[%s4709_s7 + $0x5a4] ss:$8 sps:$4 sm:$0xff]  }
 0x196   : > { %3055 = vmatprep.subr.bf16.mxu1 %v3868_v11  ;;  %v3954_v11 = vld [vmem:[%s4709_s7 + $0x5a0] ss:$8 sps:$4 sm:$0xff]  }
 0x197   : > { %3015 = vmatpush2.bf16.msra.mxu0 %v3863_v12  ;;  %v3959_v12 = vld [vmem:[%s4709_s7 + $0x494] ss:$8 sps:$4 sm:$0xff]  }
 0x198   : > { %3066 = vmatprep.subr.bf16.mxu0 %v3875_v14  ;;  %v3957_v14 = vld [vmem:[%s4709_s7 + $0x490] ss:$8 sps:$4 sm:$0xff]  }
 0x199   : > { %3056 = vmatpush2.bf16.msra.mxu1 %v3866_v13  ;;  %v3962_v13 = vld [vmem:[%s4709_s7 + $0x594] ss:$8 sps:$4 sm:$0xff]  }
 0x19a   : > { %3107 = vmatprep.subr.bf16.mxu1 %v3878_v15  ;;  %3017 = vmatmul.mubr.bf16.vlgmr.msra.gmra.mxu0 %v3362_v16  ;;  %v3960_v15 = vld [vmem:[%s4709_s7 + $0x590] ss:$8 sps:$4 sm:$0xff]   ;;  %v3965_v16 = vld [vmem:[%s4709_s7 + $0x484] ss:$8 sps:$4 sm:$0xff]  }
 0x19b   : > { %3067 = vmatpush1.bf16.msra.mxu0 %v3873_v1  ;;  %3098 = vmatprep.mubr.bf16.mxu0 %v3367_v20  ;;  %v3963_v1 = vld [vmem:[%s4709_s7 + $0x480] ss:$8 sps:$4 sm:$0xff]   ;;  %v3366_v20 = vcombine.low %v4868_v18, %v4868_v18  ;;  %v3976_v18 = vld [vmem:[%s4709_s7 + $0x770] ss:$8 sps:$4 sm:$0xff]  }
 0x19c   : > { %3058 = vmatmul.mubr.bf16.vlgmr.msra.gmra.mxu1 %v3364_v0  ;;  %3068 = vmatprep.subr.bf16.mxu0 %v3881_v8  ;;  %v3968_v0 = vld [vmem:[%s4709_s7 + $0x584] ss:$8 sps:$4 sm:$0xff]   ;;  %v3975_v8 = vld [vmem:[%s4709_s7 + $0x674] ss:$8 sps:$4 sm:$0xff]  }
 0x19d   : > { %3108 = vmatpush1.bf16.msra.mxu1 %v3876_v17  ;;  %3139 = vmatprep.mubr.bf16.mxu1 %v3369_v21  ;;  %v3966_v17 = vld [vmem:[%s4709_s7 + $0x580] ss:$8 sps:$4 sm:$0xff]   ;;  %v3368_v21 = vcombine.low %v4873_v19, %v4873_v19  ;;  %v3981_v19 = vld [vmem:[%s4709_s7 + $0x664] ss:$8 sps:$4 sm:$0xff]  }
 0x19e   : > { %3109 = vmatprep.subr.bf16.mxu1 %v3884_v9  ;;  %v3978_v9 = vld [vmem:[%s4709_s7 + $0x774] ss:$8 sps:$4 sm:$0xff]  }
 0x19f   : > { %3069 = vmatpush1.bf16.msra.mxu0 %v3879_v22  ;;  %v4948_v22 = vld [vmem:[%s5051_s0 + $0x30] sm:$0xff] }
 0x1a0   : > { %3070 = vmatprep.subr.bf16.mxu0 %v3887_v24  ;;  %v3973_v24 = vld [vmem:[%s4709_s7 + $0x670] ss:$8 sps:$4 sm:$0xff]  }
 0x1a1   : > { %3110 = vmatpush1.bf16.msra.mxu1 %v3882_v23  ;;  %v4953_v23 = vld [vmem:[%s5051_s0 + $0x38] sm:$0xff] }
 0x1a2   : > { %3111 = vmatprep.subr.bf16.mxu1 %v3890_v25  ;;  %v3984_v25 = vld [vmem:[%s4709_s7 + $0x764] ss:$8 sps:$4 sm:$0xff]  }
 0x1a3   : > { %3071 = vmatpush1.bf16.msra.mxu0 %v3885_v26  ;;  %v3371_v26 = vcombine.high %v4948_v22, %v4948_v22 }
 0x1a4   : > { %3072 = vmatprep.subr.bf16.mxu0 %v3893_v28  ;;  %v3979_v28 = vld [vmem:[%s4709_s7 + $0x660] ss:$8 sps:$4 sm:$0xff]  }
 0x1a5   : > { %3112 = vmatpush1.bf16.msra.mxu1 %v3888_v27  ;;  %v3373_v27 = vcombine.high %v4953_v23, %v4953_v23 }
 0x1a6   : > { %3113 = vmatprep.subr.bf16.mxu1 %v3896_v29  ;;  %v3982_v29 = vld [vmem:[%s4709_s7 + $0x760] ss:$8 sps:$4 sm:$0xff]  }
 0x1a7   : > { %3073 = vmatpush1.bf16.msra.mxu0 %v3891_v30  ;;  %v3987_v30 = vld [vmem:[%s4709_s7 + $0x654] ss:$8 sps:$4 sm:$0xff]  }
 0x1a8   : > { %3074 = vmatprep.subr.bf16.mxu0 %v3899_v32  ;;  %v3985_v32 = vld [vmem:[%s4709_s7 + $0x650] ss:$8 sps:$4 sm:$0xff]  }
 0x1a9   : > { %3114 = vmatpush1.bf16.msra.mxu1 %v3894_v31  ;;  %v3990_v31 = vld [vmem:[%s4709_s7 + $0x754] ss:$8 sps:$4 sm:$0xff]  }
 0x1aa   : > { %3115 = vmatprep.subr.bf16.mxu1 %v3902_v33  ;;  %v3988_v33 = vld [vmem:[%s4709_s7 + $0x750] ss:$8 sps:$4 sm:$0xff]  }
 0x1ab   : > { %3075 = vmatpush1.bf16.msra.mxu0 %v3897_v34  ;;  %v3993_v34 = vld [vmem:[%s4709_s7 + $0x644] ss:$8 sps:$4 sm:$0xff]  }
 0x1ac   : > { %3076 = vmatprep.subr.bf16.mxu0 %v3905_v36  ;;  %v3991_v36 = vld [vmem:[%s4709_s7 + $0x640] ss:$8 sps:$4 sm:$0xff]  }
 0x1ad   : > { %3116 = vmatpush1.bf16.msra.mxu1 %v3900_v35  ;;  %v3996_v35 = vld [vmem:[%s4709_s7 + $0x744] ss:$8 sps:$4 sm:$0xff]  }
 0x1ae   : > { %3117 = vmatprep.subr.bf16.mxu1 %v3908_v37  ;;  %v3994_v37 = vld [vmem:[%s4709_s7 + $0x740] ss:$8 sps:$4 sm:$0xff]  }
 0x1af   : > { %3077 = vmatpush1.bf16.msra.mxu0 %v3903_v38  ;;  %v3999_v38 = vld [vmem:[%s4709_s7 + $0x634] ss:$8 sps:$4 sm:$0xff]  }
 0x1b0   : > { %3078 = vmatprep.subr.bf16.mxu0 %v3911_v40  ;;  %v3997_v40 = vld [vmem:[%s4709_s7 + $0x630] ss:$8 sps:$4 sm:$0xff]  }
 0x1b1   : > { %3118 = vmatpush1.bf16.msra.mxu1 %v3906_v39  ;;  %v4002_v39 = vld [vmem:[%s4709_s7 + $0x734] ss:$8 sps:$4 sm:$0xff]  }
 0x1b2   : > { %3119 = vmatprep.subr.bf16.mxu1 %v3914_v41  ;;  %v4000_v41 = vld [vmem:[%s4709_s7 + $0x730] ss:$8 sps:$4 sm:$0xff]  }
 0x1b3   : > { %3079 = vmatpush1.bf16.msra.mxu0 %v3909_v42  ;;  %v4005_v42 = vld [vmem:[%s4709_s7 + $0x624] ss:$8 sps:$4 sm:$0xff]  }
 0x1b4   : > { %3080 = vmatprep.subr.bf16.mxu0 %v3917_v44  ;;  %v4003_v44 = vld [vmem:[%s4709_s7 + $0x620] ss:$8 sps:$4 sm:$0xff]  }
 0x1b5   : > { %3120 = vmatpush1.bf16.msra.mxu1 %v3912_v43  ;;  %v4008_v43 = vld [vmem:[%s4709_s7 + $0x724] ss:$8 sps:$4 sm:$0xff]  }
 0x1b6   : > { %3121 = vmatprep.subr.bf16.mxu1 %v3920_v45  ;;  %v4006_v45 = vld [vmem:[%s4709_s7 + $0x720] ss:$8 sps:$4 sm:$0xff]  }
 0x1b7   : > { %3081 = vmatpush1.bf16.msra.mxu0 %v3915_v46  ;;  %v4011_v46 = vld [vmem:[%s4709_s7 + $0x614] ss:$8 sps:$4 sm:$0xff]  }
 0x1b8   : > { %3082 = vmatprep.subr.bf16.mxu0 %v3923_v48  ;;  %v4009_v48 = vld [vmem:[%s4709_s7 + $0x610] ss:$8 sps:$4 sm:$0xff]  }
 0x1b9   : > { %3122 = vmatpush1.bf16.msra.mxu1 %v3918_v47  ;;  %v4014_v47 = vld [vmem:[%s4709_s7 + $0x714] ss:$8 sps:$4 sm:$0xff]  }
 0x1ba   : > { %3123 = vmatprep.subr.bf16.mxu1 %v3926_v49  ;;  %v4012_v49 = vld [vmem:[%s4709_s7 + $0x710] ss:$8 sps:$4 sm:$0xff]  }
 0x1bb   : > { %3083 = vmatpush2.bf16.msra.mxu0 %v3921_v50  ;;  %v4017_v50 = vld [vmem:[%s4709_s7 + $0x604] ss:$8 sps:$4 sm:$0xff]  }
 0x1bc   : > { %3084 = vmatprep.subr.bf16.mxu0 %v3929_v52  ;;  %v4015_v52 = vld [vmem:[%s4709_s7 + $0x600] ss:$8 sps:$4 sm:$0xff]  }
 0x1bd   : > { %3124 = vmatpush2.bf16.msra.mxu1 %v3924_v51  ;;  %v4020_v51 = vld [vmem:[%s4709_s7 + $0x704] ss:$8 sps:$4 sm:$0xff]  }
 0x1be   : > { %3125 = vmatprep.subr.bf16.mxu1 %v3932_v53  ;;  %v4018_v53 = vld [vmem:[%s4709_s7 + $0x700] ss:$8 sps:$4 sm:$0xff]  }
 0x1bf   : > { %3085 = vmatpush2.bf16.msra.mxu0 %v3927_v54  ;;  %v4023_v54 = vld [vmem:[%s4709_s7 + $0x6f4] ss:$8 sps:$4 sm:$0xff]  }
 0x1c0   : > { %3086 = vmatprep.subr.bf16.mxu0 %v3935_v56  ;;  %v4021_v56 = vld [vmem:[%s4709_s7 + $0x6f0] ss:$8 sps:$4 sm:$0xff]  }
 0x1c1   : > { %3126 = vmatpush2.bf16.msra.mxu1 %v3930_v55  ;;  %v4026_v55 = vld [vmem:[%s4709_s7 + $0x7f4] ss:$8 sps:$4 sm:$0xff]  }
 0x1c2   : > { %3127 = vmatprep.subr.bf16.mxu1 %v3938_v57  ;;  %v4024_v57 = vld [vmem:[%s4709_s7 + $0x7f0] ss:$8 sps:$4 sm:$0xff]  }
 0x1c3   : > { %3087 = vmatpush2.bf16.msra.mxu0 %v3933_v58  ;;  %v4029_v58 = vld [vmem:[%s4709_s7 + $0x6e4] ss:$8 sps:$4 sm:$0xff]  }
 0x1c4   : > { %3088 = vmatprep.subr.bf16.mxu0 %v3941_v60  ;;  %v4027_v60 = vld [vmem:[%s4709_s7 + $0x6e0] ss:$8 sps:$4 sm:$0xff]  }
 0x1c5   : > { %3128 = vmatpush2.bf16.msra.mxu1 %v3936_v59  ;;  %v4032_v59 = vld [vmem:[%s4709_s7 + $0x7e4] ss:$8 sps:$4 sm:$0xff]  }
 0x1c6   : > { %3129 = vmatprep.subr.bf16.mxu1 %v3944_v61  ;;  %v4030_v61 = vld [vmem:[%s4709_s7 + $0x7e0] ss:$8 sps:$4 sm:$0xff]  }
 0x1c7   : > { %3089 = vmatpush2.bf16.msra.mxu0 %v3939_v62  ;;  %v4035_v62 = vld [vmem:[%s4709_s7 + $0x6d4] ss:$8 sps:$4 sm:$0xff]  }
 0x1c8   : > { %3090 = vmatprep.subr.bf16.mxu0 %v3947_v2  ;;  %v4033_v2 = vld [vmem:[%s4709_s7 + $0x6d0] ss:$8 sps:$4 sm:$0xff]  }
 0x1c9   : > { %3130 = vmatpush2.bf16.msra.mxu1 %v3942_v63  ;;  %v4038_v63 = vld [vmem:[%s4709_s7 + $0x7d4] ss:$8 sps:$4 sm:$0xff]  }
 0x1ca   : > { %3131 = vmatprep.subr.bf16.mxu1 %v3950_v3  ;;  %v4036_v3 = vld [vmem:[%s4709_s7 + $0x7d0] ss:$8 sps:$4 sm:$0xff]  }
 0x1cb   : > { %3091 = vmatpush2.bf16.msra.mxu0 %v3945_v4  ;;  %v4041_v4 = vld [vmem:[%s4709_s7 + $0x6c4] ss:$8 sps:$4 sm:$0xff]  }
 0x1cc   : > { %3092 = vmatprep.subr.bf16.mxu0 %v3953_v6  ;;  %v4039_v6 = vld [vmem:[%s4709_s7 + $0x6c0] ss:$8 sps:$4 sm:$0xff]  }
 0x1cd   : > { %3132 = vmatpush2.bf16.msra.mxu1 %v3948_v5  ;;  %v4044_v5 = vld [vmem:[%s4709_s7 + $0x7c4] ss:$8 sps:$4 sm:$0xff]  }
 0x1ce   : > { %3133 = vmatprep.subr.bf16.mxu1 %v3956_v7  ;;  %v4042_v7 = vld [vmem:[%s4709_s7 + $0x7c0] ss:$8 sps:$4 sm:$0xff]  }
 0x1cf   : > { %3093 = vmatpush2.bf16.msra.mxu0 %v3951_v10  ;;  %v4047_v10 = vld [vmem:[%s4709_s7 + $0x6b4] ss:$8 sps:$4 sm:$0xff]  }
 0x1d0   : > { %3094 = vmatprep.subr.bf16.mxu0 %v3959_v12  ;;  %v4045_v12 = vld [vmem:[%s4709_s7 + $0x6b0] ss:$8 sps:$4 sm:$0xff]  }
 0x1d1   : > { %3134 = vmatpush2.bf16.msra.mxu1 %v3954_v11  ;;  %v4050_v11 = vld [vmem:[%s4709_s7 + $0x7b4] ss:$8 sps:$4 sm:$0xff]  }
 0x1d2   : > { %3135 = vmatprep.subr.bf16.mxu1 %v3962_v13  ;;  %v4048_v13 = vld [vmem:[%s4709_s7 + $0x7b0] ss:$8 sps:$4 sm:$0xff]  }
 0x1d3   : > { %3095 = vmatpush2.bf16.msra.mxu0 %v3957_v14  ;;  %v4053_v14 = vld [vmem:[%s4709_s7 + $0x6a4] ss:$8 sps:$4 sm:$0xff]  }
 0x1d4   : > { %3096 = vmatprep.subr.bf16.mxu0 %v3965_v16  ;;  %v4051_v16 = vld [vmem:[%s4709_s7 + $0x6a0] ss:$8 sps:$4 sm:$0xff]  }
 0x1d5   : > { %3136 = vmatpush2.bf16.msra.mxu1 %v3960_v15  ;;  %v4056_v15 = vld [vmem:[%s4709_s7 + $0x7a4] ss:$8 sps:$4 sm:$0xff]  }
 0x1d6   : > { %3137 = vmatprep.subr.bf16.mxu1 %v3968_v0  ;;  %v4054_v0 = vld [vmem:[%s4709_s7 + $0x7a0] ss:$8 sps:$4 sm:$0xff]  }
 0x1d7   : > { %3097 = vmatpush2.bf16.msra.mxu0 %v3963_v1  ;;  %v1556_v1 = vlaneseq }
 0x1d8   : > { %3148 = vmatprep.subr.bf16.mxu0 %v3975_v8  ;;  %v4062_v8 = vld [vmem:[%s4709_s7 + $0x794] ss:$8 sps:$4 sm:$0xff]  }
 0x1d9   : > { %3138 = vmatpush2.bf16.msra.mxu1 %v3966_v17  ;;  %v4059_v17 = vld [vmem:[%s4709_s7 + $0x694] ss:$8 sps:$4 sm:$0xff]  }
 0x1da   : > { %3189 = vmatprep.subr.bf16.mxu1 %v3978_v9  ;;  %3099 = vmatmul.mubr.bf16.vlgmr.msra.gmra.mxu0 %v3366_v20  ;;  %v4057_v9 = vld [vmem:[%s4709_s7 + $0x690] ss:$8 sps:$4 sm:$0xff]  }
 0x1db   : > { %3149 = vmatpush1.bf16.msra.mxu0 %v3973_v24  ;;  %3180 = vmatprep.mubr.bf16.mxu0 %v3371_v26  ;;  %v4060_v20 = vld [vmem:[%s4709_s7 + $0x790] ss:$8 sps:$4 sm:$0xff]   ;;  %v4065_v24 = vld [vmem:[%s4709_s7 + $0x684] ss:$8 sps:$4 sm:$0xff]  }
 0x1dc   : > { %3140 = vmatmul.mubr.bf16.vlgmr.msra.gmra.mxu1 %v3368_v21  ;;  %3150 = vmatprep.subr.bf16.mxu0 %v3981_v19  ;;  %v1557_v21 = vshrl.u32 %v1556_v1, 7  ;;  %v4063_v19 = vld [vmem:[%s4709_s7 + $0x680] ss:$8 sps:$4 sm:$0xff]  }
 0x1dd   : > { %3190 = vmatpush1.bf16.msra.mxu1 %v3976_v18  ;;  %3221 = vmatprep.mubr.bf16.mxu1 %v3373_v27  ;;  %v4068_v18 = vld [vmem:[%s4709_s7 + $0x784] ss:$8 sps:$4 sm:$0xff]   ;;  %v1554_v27 = vld [vmem:[%s1278_s28] sm:$0x3] }
 0x1de   : > { %3191 = vmatprep.subr.bf16.mxu1 %v3984_v25  ;;  %v4066_v25 = vld [vmem:[%s4709_s7 + $0x780] ss:$8 sps:$4 sm:$0xff]   ;;  %v1558_v26 = vsub.s32 0, %v1557_v21 }
 0x1df   : > { %3151 = vmatpush1.bf16.msra.mxu0 %v3979_v28  ;;  %v1562_v28 = vsub.s32 1, %v1557_v21 }
 0x1e0   : > { %3152 = vmatprep.subr.bf16.mxu0 %v3987_v30  ;;  %v3372_v30 = vcombine.low %v4953_v23, %v4953_v23 }
 0x1e1   : > { %3192 = vmatpush1.bf16.msra.mxu1 %v3982_v29  ;;  %v3370_v29 = vcombine.low %v4948_v22, %v4948_v22 }
 0x1e2   : > { %3193 = vmatprep.subr.bf16.mxu1 %v3990_v31  ;;  %v1559_v31 = vrot.slane %v1554_v27, %v1558_v26 }
 0x1e3   : > { %3153 = vmatpush1.bf16.msra.mxu0 %v3985_v32  ;;  %v1563_v32 = vrot.slane %v1554_v27, %v1562_v28 }
 0x1e4   : > { %3154 = vmatprep.subr.bf16.mxu0 %v3993_v34 }
 0x1e5   : > { %3194 = vmatpush1.bf16.msra.mxu1 %v3988_v33 }
 0x1e6   : > { %3195 = vmatprep.subr.bf16.mxu1 %v3996_v35 }
 0x1e7   : > { %3155 = vmatpush1.bf16.msra.mxu0 %v3991_v36 }
 0x1e8   : > { %3156 = vmatprep.subr.bf16.mxu0 %v3999_v38 }
 0x1e9   : > { %3196 = vmatpush1.bf16.msra.mxu1 %v3994_v37 }
 0x1ea   : > { %3197 = vmatprep.subr.bf16.mxu1 %v4002_v39 }
 0x1eb   : > { %3157 = vmatpush1.bf16.msra.mxu0 %v3997_v40 }
 0x1ec   : > { %3158 = vmatprep.subr.bf16.mxu0 %v4005_v42 }
 0x1ed   : > { %3198 = vmatpush1.bf16.msra.mxu1 %v4000_v41 }
 0x1ee   : > { %3199 = vmatprep.subr.bf16.mxu1 %v4008_v43 }
 0x1ef   : > { %3159 = vmatpush1.bf16.msra.mxu0 %v4003_v44 }
 0x1f0   : > { %3160 = vmatprep.subr.bf16.mxu0 %v4011_v46 }
 0x1f1   : > { %3200 = vmatpush1.bf16.msra.mxu1 %v4006_v45 }
 0x1f2   : > { %3201 = vmatprep.subr.bf16.mxu1 %v4014_v47 }
 0x1f3   : > { %3161 = vmatpush1.bf16.msra.mxu0 %v4009_v48 }
 0x1f4   : > { %3162 = vmatprep.subr.bf16.mxu0 %v4017_v50 }
 0x1f5   : > { %3202 = vmatpush1.bf16.msra.mxu1 %v4012_v49 }
 0x1f6   : > { %3203 = vmatprep.subr.bf16.mxu1 %v4020_v51 }
 0x1f7   : > { %3163 = vmatpush1.bf16.msra.mxu0 %v4015_v52 }
 0x1f8   : > { %3164 = vmatprep.subr.bf16.mxu0 %v4023_v54 }
 0x1f9   : > { %3204 = vmatpush1.bf16.msra.mxu1 %v4018_v53 }
 0x1fa   : > { %3205 = vmatprep.subr.bf16.mxu1 %v4026_v55 }
 0x1fb   : > { %3165 = vmatpush2.bf16.msra.mxu0 %v4021_v56 }
 0x1fc   : > { %3166 = vmatprep.subr.bf16.mxu0 %v4029_v58 }
 0x1fd   : > { %3206 = vmatpush2.bf16.msra.mxu1 %v4024_v57 }
 0x1fe   : > { %3207 = vmatprep.subr.bf16.mxu1 %v4032_v59 }
 0x1ff   : > { %3167 = vmatpush2.bf16.msra.mxu0 %v4027_v60 }
 0x200   : > { %3168 = vmatprep.subr.bf16.mxu0 %v4035_v62 }
 0x201   : > { %3208 = vmatpush2.bf16.msra.mxu1 %v4030_v61 }
 0x202   : > { %3209 = vmatprep.subr.bf16.mxu1 %v4038_v63 }
 0x203   : > { %3169 = vmatpush2.bf16.msra.mxu0 %v4033_v2 }
 0x204   : > { %3170 = vmatprep.subr.bf16.mxu0 %v4041_v4 }
 0x205   : > { %3210 = vmatpush2.bf16.msra.mxu1 %v4036_v3 }
 0x206   : > { %3211 = vmatprep.subr.bf16.mxu1 %v4044_v5 }
 0x207   : > { %3171 = vmatpush2.bf16.msra.mxu0 %v4039_v6 }
 0x208   : > { %3172 = vmatprep.subr.bf16.mxu0 %v4047_v10 }
 0x209   : > { %3212 = vmatpush2.bf16.msra.mxu1 %v4042_v7 }
 0x20a   : > { %3213 = vmatprep.subr.bf16.mxu1 %v4050_v11 }
 0x20b   : > { %3173 = vmatpush2.bf16.msra.mxu0 %v4045_v12 }
 0x20c   : > { %3174 = vmatprep.subr.bf16.mxu0 %v4053_v14 }
 0x20d   : > { %3214 = vmatpush2.bf16.msra.mxu1 %v4048_v13 }
 0x20e   : > { %3215 = vmatprep.subr.bf16.mxu1 %v4056_v15 }
 0x20f   : > { %3175 = vmatpush2.bf16.msra.mxu0 %v4051_v16 }
 0x210   : > { %3176 = vmatprep.subr.bf16.mxu0 %v4059_v17 }
 0x211   : > { %3216 = vmatpush2.bf16.msra.mxu1 %v4054_v0 }
 0x212   : > { %3217 = vmatprep.subr.bf16.mxu1 %v4062_v8 }
 0x213   : > { %3177 = vmatpush2.bf16.msra.mxu0 %v4057_v9 }
 0x214   : > { %3178 = vmatprep.subr.bf16.mxu0 %v4065_v24 }
 0x215   : > { %3218 = vmatpush2.bf16.msra.mxu1 %v4060_v20 }
 0x216   : > { %3219 = vmatprep.subr.bf16.mxu1 %v4068_v18 }
 0x217   : > { %3179 = vmatpush2.bf16.msra.mxu0 %v4063_v19 }
 0x219   : > { %3220 = vmatpush2.bf16.msra.mxu1 %v4066_v25 }
 0x21a   : > { %v2936_v33 = vpop.f32.mrf.mxu0  ;;  %3181 = vmatmul.mubr.bf16.vlgmr.msra.gmra.mxu0 %v3370_v29 }
 0x21b   : > { %v2937_v35 = vadd.f32 %v2936_v33, %v1559_v31 }
 0x21c   : > { %v2977_v34 = vpop.f32.mrf.mxu1  ;;  %3222 = vmatmul.mubr.bf16.vlgmr.msra.gmra.mxu1 %v3372_v30  ;;  %v2938_v36 = vpop.f32.mrf.mxu0 }
 0x21d   : > { %v2978_v38 = vadd.f32 %v2977_v34, %v2937_v35  ;;  %v2939_v39 = vadd.f32 %v2938_v36, %v1563_v32 }
 0x21e   : > { %v2979_v37 = vpop.f32.mrf.mxu1  ;;  %v2940_v40 = vpop.f32.mrf.mxu0 }
 0x21f   : > { %v2980_v42 = vadd.f32 %v2979_v37, %v2939_v39 }
 0x220   : > { %v2981_v41 = vpop.f32.mrf.mxu1  ;;  %v2941_v22 = vpop.f32.mrf.mxu0 }
 0x222   : > { %v2982_v43 = vpop.f32.mrf.mxu1 }
 0x25a   : > { %v3018_v44 = vpop.f32.mrf.mxu0 }
 0x25b   : > { %v3019_v45 = vadd.f32 %v3018_v44, %v2978_v38 }
 0x25c   : > { %v3059_v23 = vpop.f32.mrf.mxu1  ;;  %v3020_v46 = vpop.f32.mrf.mxu0 }
 0x25d   : > { %v3060_v48 = vadd.f32 %v3059_v23, %v3019_v45  ;;  %v3021_v49 = vadd.f32 %v3020_v46, %v2980_v42 }
 0x25e   : > { %v3061_v47 = vpop.f32.mrf.mxu1  ;;  %v3022_v50 = vpop.f32.mrf.mxu0 }
 0x25f   : > { %v3062_v52 = vadd.f32 %v3061_v47, %v3021_v49 }
 0x260   : > { %v3063_v51 = vpop.f32.mrf.mxu1  ;;  %v3023_v53 = vpop.f32.mrf.mxu0 }
 0x262   : > { %v3064_v54 = vpop.f32.mrf.mxu1 }
 0x29a   : > { %v3100_v55 = vpop.f32.mrf.mxu0 }
 0x29b   : > { %v3101_v63 = vadd.f32 %v3100_v55, %v3060_v48 }
 0x29c   : > { %v3141_v56 = vpop.f32.mrf.mxu1  ;;  %v3102_v57 = vpop.f32.mrf.mxu0 }
 0x29d   : > { %v3103_v2 = vadd.f32 %v3102_v57, %v3062_v52  ;;  %v3142_v3 = vadd.f32 %v3141_v56, %v3101_v63 }
 0x29e   : > { %v3143_v58 = vpop.f32.mrf.mxu1  ;;  %v3104_v59 = vpop.f32.mrf.mxu0 }
 0x29f   : > { %v3144_v6 = vadd.f32 %v3143_v58, %v3103_v2 }
 0x2a0   : > { %v3145_v60 = vpop.f32.mrf.mxu1  ;;  %v3105_v61 = vpop.f32.mrf.mxu0 }
 0x2a2   : > { %v3146_v62 = vpop.f32.mrf.mxu1 }
 0x2da   : > { %v3182_v4 = vpop.f32.mrf.mxu0 }
 0x2db   : > { %v3183_v7 = vadd.f32 %v3182_v4, %v3142_v3 }
 0x2dc   : > { %v3223_v5 = vpop.f32.mrf.mxu1  ;;  %v3184_v10 = vpop.f32.mrf.mxu0 }
 0x2dd   : > { %v3224_v12 = vadd.f32 %v3223_v5, %v3183_v7  ;;  %v3185_v13 = vadd.f32 %v3184_v10, %v3144_v6 }
 0x2de   : > { %v3225_v11 = vpop.f32.mrf.mxu1  ;;  %v3186_v14 = vpop.f32.mrf.mxu0 }
 0x2df   : > { %v3230_v16 = vmax.f32 %v3224_v12, 0.0  ;;  %v3226_v0 = vadd.f32 %v3225_v11, %v3185_v13 }
 0x2e0   : > { %v3227_v15 = vpop.f32.mrf.mxu1  ;;  %v3187_v1 = vpop.f32.mrf.mxu0 }
 0x2e1   : > { %3232 = vst [vmem:[%s1288_s5] sm:$0xff] %v3230_v16  ;;  %v3231_v8 = vmax.f32 %v3226_v0, 0.0 }
 0x2e2   : > { %v3228_v17 = vpop.f32.mrf.mxu1 }
 0x2e3   : > { %3233 = vst [vmem:[%s1288_s5 + $0x8] sm:$0xff] %v3231_v8 }
 0x2e4 PF: > { %s13_s16 = sadd.s32 1, %s4111_s16   ;;  %s5055_s12 = smov %s4099_s13 }
 0x2e5   : > { %p10_p10 = scmp.ge.s32.totalorder %s13_s16, 6   ;;  %s5056_s13 = smov %s4168_s20 }
 0x2e6   : > { %s5057_s14 = smov %s4107_s15  ;;  %s5058_s15 = smov %s5060_s17 }
 0x2e7   :  { %12 = sbr.rel (!%p10_p10) target bundleno = 3 (0x3), region = 111 }

</bundles_post_ra>
